<compile_context>
chip_gen: v5e
topology: v5e:2x2
jax: 0.10.0
libtpu: 0.0.40
codegen_flags: <defaults>
</compile_context>

<pallas_src>
import functools
import math

import jax
import jax.numpy as jnp
from jax.experimental import pallas as pl
from jax.experimental.pallas import tpu as pltpu

LANE = 128  # every feature dim is zero-padded to the 128-lane vreg width


# ----------------------------------------------------------------------------
# Fused forward kernel (single grid step, everything VMEM-resident)
# ----------------------------------------------------------------------------

def _dqn_fused_kernel(ids_col_ref, ids_row_ref, amask_ref,
                      misc_mat_ref, misc_vec_ref, layer_mat_ref, layer_vec_ref,
                      o_ref,
                      *, num_layers, num_heads, d_model, seq_len, batch,
                      pad_token_id, vocab_size):
    f32, bf16 = jnp.float32, jnp.bfloat16
    BS = batch * seq_len
    inv_s = 1.0 / seq_len

    mv = misc_vec_ref[...]                                    # [8, LANE] f32

    # Lane-validity mask for LayerNorm, built ONCE (JAX does not CSE iotas).
    lane = jax.lax.broadcasted_iota(jnp.int32, (BS, LANE), 1)
    ln_valid = (lane < d_model).astype(f32)
    inv_d = 1.0 / d_model

    def layernorm(x, g, b):
        # stats over the true d_model lanes; padded lanes of x are exactly 0.
        mu = jnp.sum(x, axis=-1, keepdims=True) * inv_d
        xc = (x - mu) * ln_valid
        var = jnp.sum(xc * xc, axis=-1, keepdims=True) * inv_d
        return xc * jax.lax.rsqrt(var + 1e-12) * g + b

    # --- embedding lookup (word + position) as one one-hot MXU pass ----------
    ids_f = ids_col_ref[...].astype(f32)                      # [BS, 1]
    col_f = jax.lax.broadcasted_iota(jnp.int32, (BS, 2 * LANE), 1).astype(f32)
    row_f = jax.lax.broadcasted_iota(jnp.int32, (BS, 2 * LANE), 0).astype(f32)
    # position within the sequence, via exact float floor (avoids int div/rem)
    pos_f = row_f - seq_len * jnp.floor((row_f + 0.5) * inv_s)
    onehot = jnp.where(
        jnp.logical_or(col_f == ids_f, col_f == pos_f + float(LANE)), 1.0, 0.0
    ).astype(bf16)                                            # [BS, 2*LANE]
    h = jnp.dot(onehot, misc_mat_ref[0:2 * LANE, :],
                preferred_element_type=f32)                   # [BS, LANE]
    h = layernorm(h, mv[0:1], mv[1:2])

    # --- additive attention bias: block-diagonal batches + key padding -------
    rb = jnp.floor((jax.lax.broadcasted_iota(jnp.int32, (BS, BS), 0).astype(f32)
                    + 0.5) * inv_s)
    cb = jnp.floor((jax.lax.broadcasted_iota(jnp.int32, (BS, BS), 1).astype(f32)
                    + 0.5) * inv_s)
    key_ok = ids_row_ref[...] != pad_token_id                 # [1, BS]
    attn_bias = jnp.where(jnp.logical_and(rb == cb, key_ok), 0.0, -1e9)

    wo_base = 3 * num_heads          # column-block offset of the Wo blocks
    ff_base = 4 * num_heads          # column-block offset of Wff1 / Wff2

    for l in range(num_layers):                               # static unroll
        wm = layer_mat_ref.at[l]                              # [LANE, (4H+2)*LANE] bf16
        lv = layer_vec_ref[l]                                 # [16, LANE] f32

        # Fused QKV projection: one MXU pass, each head's q/k/v in its own
        # 128-lane block (all later slices are full-vreg views).
        qkv = jnp.dot(h.astype(bf16), wm[:, 0:3 * num_heads * LANE],
                      preferred_element_type=f32)             # [BS, 3H*LANE]

        attn = None
        for hd in range(num_heads):                           # static unroll
            base = 3 * hd * LANE
            q = qkv[:, base:base + LANE] + lv[7 + 3 * hd:8 + 3 * hd]
            k = qkv[:, base + LANE:base + 2 * LANE] + lv[8 + 3 * hd:9 + 3 * hd]
            v = qkv[:, base + 2 * LANE:base + 3 * LANE] + lv[9 + 3 * hd:10 + 3 * hd]
            # 1/sqrt(d_head) is folded into Wq/bq at init time.
            s = jax.lax.dot_general(q.astype(bf16), k.astype(bf16),
                                    (((1,), (1,)), ((), ())),
                                    preferred_element_type=f32) + attn_bias
            p = jnp.exp(s - jnp.max(s, axis=-1, keepdims=True))
            p = p / jnp.sum(p, axis=-1, keepdims=True)        # exact softmax
            ctx = jnp.dot(p.astype(bf16), v.astype(bf16),
                          preferred_element_type=f32)         # [BS, LANE]
            proj = jnp.dot(ctx.astype(bf16),
                           wm[:, (wo_base + hd) * LANE:(wo_base + hd + 1) * LANE],
                           preferred_element_type=f32)
            attn = proj if attn is None else attn + proj
        h = layernorm(attn + h + lv[0:1], lv[1:2], lv[2:3])

        # Feed-forward block.
        ff = jnp.dot(h.astype(bf16), wm[:, ff_base * LANE:(ff_base + 1) * LANE],
                     preferred_element_type=f32) + lv[3:4]
        # TODO(synk): HF BERT uses exact (erf) GELU; tanh approx kept for robust lowering.
        ff = jax.nn.gelu(ff, approximate=True)
        ff = jnp.dot(ff.astype(bf16),
                     wm[:, (ff_base + 1) * LANE:(ff_base + 2) * LANE],
                     preferred_element_type=f32) + lv[4:5]
        h = layernorm(ff + h, lv[5:6], lv[6:7])

    # --- pooler (CLS, tanh) + DQN head (Linear-ReLU-Linear) + masked_fill -----
    cls = jnp.concatenate(
        [h[b * seq_len:b * seq_len + 1, :] for b in range(batch)], axis=0)  # [B, LANE]
    pooled = jnp.tanh(jnp.dot(cls.astype(bf16), misc_mat_ref[2 * LANE:3 * LANE, :],
                              preferred_element_type=f32) + mv[2:3])
    hid = jnp.maximum(jnp.dot(pooled.astype(bf16), misc_mat_ref[3 * LANE:4 * LANE, :],
                              preferred_element_type=f32) + mv[3:4], 0.0)
    qv = jnp.dot(hid.astype(bf16), misc_mat_ref[4 * LANE:5 * LANE, :],
                 preferred_element_type=f32) + mv[4:5]        # [B, LANE]
    qv = jnp.where(amask_ref[...] == 0, -1000000000.0, qv[:, :vocab_size])
    o_ref[...] = qv.astype(o_ref.dtype)


# ----------------------------------------------------------------------------
# Wrapper — only dtype casts / metadata reshapes run outside the kernel.
# ----------------------------------------------------------------------------

def _full_spec(shape):
    if len(shape) == 2:
        return pl.BlockSpec(shape, lambda i: (0, 0))
    return pl.BlockSpec(shape, lambda i: (0, 0, 0))


def dqn_forward(params, x_ids, mask, *, pad_token_id, num_heads, num_layers,
                d_model, vocab_size):
    """Equivalent of DQN.forward(x, mask); returns [B, vocab_size] float32."""
    B, S = x_ids.shape
    BS = B * S

    ids_col = x_ids.reshape(BS, 1).astype(jnp.int32)   # for the one-hot gather
    ids_row = x_ids.reshape(1, BS).astype(jnp.int32)   # for key-padding mask
    amask = mask.astype(jnp.int32)                     # action mask (masked_fill)

    operands = (ids_col, ids_row, amask,
                params["misc_mat"], params["misc_vec"],
                params["layer_mat"], params["layer_vec"])

    in_specs = [_full_spec(a.shape) for a in operands]
    out_spec = pl.BlockSpec((B, vocab_size), lambda i: (0, 0))

    kernel = functools.partial(
        _dqn_fused_kernel, num_layers=num_layers, num_heads=num_heads,
        d_model=d_model, seq_len=S, batch=B, pad_token_id=pad_token_id,
        vocab_size=vocab_size)

    # Advisory cost estimate for the XLA scheduler.
    H, L = num_heads, num_layers
    flops = (2 * BS * (2 * LANE) * LANE
             + L * (2 * BS * LANE * 3 * H * LANE
                    + H * (4 * BS * BS * LANE + 2 * BS * LANE * LANE)
                    + 4 * BS * LANE * LANE)
             + 6 * B * LANE * LANE)
    transcendentals = L * (H * BS * BS + BS * LANE) + B * LANE
    bytes_accessed = (sum(int(a.size) * a.dtype.itemsize for a in operands)
                      + B * vocab_size * 4)

    out = pl.pallas_call(
        kernel,
        out_shape=jax.ShapeDtypeStruct((B, vocab_size), jnp.float32),
        grid=(1,),
        in_specs=in_specs,
        out_specs=out_spec,
        compiler_params=pltpu.CompilerParams(
            dimension_semantics=("arbitrary",),
            vmem_limit_bytes=32 * 1024 * 1024),
        cost_estimate=pl.CostEstimate(flops=flops,
                                      transcendentals=transcendentals,
                                      bytes_accessed=bytes_accessed),
    )(*operands)
    return out


# ----------------------------------------------------------------------------
# Synthetic (deterministic) parameters, pre-packed into the kernel's slabs.
# ----------------------------------------------------------------------------

def init_params(key, *, token_vocab, max_pos, d_model, ff_dim, num_layers,
                num_heads, hidden_dim, vocab_size):
    d_head = d_model // num_heads
    scale = 1.0 / math.sqrt(d_head)
    keys = jax.random.split(key, 64)
    it = iter(range(64))

    def dense(shape):
        return jax.random.normal(keys[next(it)], shape, jnp.float32) * 0.02

    # misc_mat rows: [0:128) word_emb, [128:256) pos_emb, [256:384) pooler W,
    #                [384:512) head W1, [512:640) head W2.
    mm = jnp.zeros((5 * LANE, LANE), jnp.float32)
    mm = mm.at[:token_vocab, :d_model].set(dense((token_vocab, d_model)))
    mm = mm.at[LANE:LANE + max_pos, :d_model].set(dense((max_pos, d_model)))
    mm = mm.at[2 * LANE:2 * LANE + d_model, :d_model].set(dense((d_model, d_model)))
    mm = mm.at[3 * LANE:3 * LANE + d_model, :hidden_dim].set(dense((d_model, hidden_dim)))
    mm = mm.at[4 * LANE:4 * LANE + hidden_dim, :vocab_size].set(dense((hidden_dim, vocab_size)))

    # misc_vec rows: 0 emb_ln_g, 1 emb_ln_b, 2 pool_b, 3 head_b1, 4 head_b2.
    mv = jnp.zeros((8, LANE), jnp.float32)
    mv = mv.at[0, :d_model].set(1.0)
    mv = mv.at[1, :d_model].set(dense((d_model,)))
    mv = mv.at[2, :d_model].set(dense((d_model,)))
    mv = mv.at[3, :hidden_dim].set(dense((hidden_dim,)))
    mv = mv.at[4, :vocab_size].set(dense((vocab_size,)))

    # layer_mat columns (per layer): per head h -> [Wq|Wk|Wv] 128-lane blocks,
    # then per head Wo block, then Wff1, Wff2.
    n_cols = (4 * num_heads + 2) * LANE
    lm = jnp.zeros((num_layers, LANE, n_cols), jnp.float32)
    lv = jnp.zeros((num_layers, 16, LANE), jnp.float32)
    for l in range(num_layers):
        wq, wk, wv_ = dense((d_model, d_model)), dense((d_model, d_model)), dense((d_model, d_model))
        wo = dense((d_model, d_model))
        bq, bk, bv = dense((d_model,)), dense((d_model,)), dense((d_model,))
        bo = dense((d_model,))
        wff1, bff1 = dense((d_model, ff_dim)), dense((ff_dim,))
        wff2, bff2 = dense((ff_dim, d_model)), dense((d_model,))
        ln1b, ln2b = dense((d_model,)), dense((d_model,))
        for hh in range(num_heads):
            cs = slice(hh * d_head, (hh + 1) * d_head)
            base = 3 * hh * LANE
            lm = lm.at[l, :d_model, base:base + d_head].set(wq[:, cs] * scale)
            lm = lm.at[l, :d_model, base + LANE:base + LANE + d_head].set(wk[:, cs])
            lm = lm.at[l, :d_model, base + 2 * LANE:base + 2 * LANE + d_head].set(wv_[:, cs])
            wo_c = (3 * num_heads + hh) * LANE
            lm = lm.at[l, :d_head, wo_c:wo_c + d_model].set(wo[cs, :])
            lv = lv.at[l, 7 + 3 * hh, :d_head].set(bq[cs] * scale)
            lv = lv.at[l, 8 + 3 * hh, :d_head].set(bk[cs])
            lv = lv.at[l, 9 + 3 * hh, :d_head].set(bv[cs])
        ff_c = 4 * num_heads * LANE
        lm = lm.at[l, :d_model, ff_c:ff_c + ff_dim].set(wff1)
        lm = lm.at[l, :ff_dim, ff_c + LANE:ff_c + LANE + d_model].set(wff2)
        lv = lv.at[l, 0, :d_model].set(bo)
        lv = lv.at[l, 1, :d_model].set(1.0)      # ln1 gamma
        lv = lv.at[l, 2, :d_model].set(ln1b)
        lv = lv.at[l, 3, :ff_dim].set(bff1)
        lv = lv.at[l, 4, :d_model].set(bff2)
        lv = lv.at[l, 5, :d_model].set(1.0)      # ln2 gamma
        lv = lv.at[l, 6, :d_model].set(ln2b)

    return {"misc_mat": mm.astype(jnp.bfloat16), "misc_vec": mv,
            "layer_mat": lm.astype(jnp.bfloat16), "layer_vec": lv}


if __name__ == "__main__":
    B, S = 2, 8
    TOKEN_VOCAB = 32       # BERT token-id vocabulary
    MAX_POS = 16
    BERT_DIM = 32          # bert_dim
    NUM_HEADS = 2
    FF_DIM = 64
    NUM_LAYERS = 2
    HIDDEN_DIM = 32        # hidden_dim of the DQN head
    VOCAB_SIZE = 26        # hangman action space (letters)
    PAD_ID = 0

    key = jax.random.PRNGKey(0)
    k_param, k_x, k_mask = jax.random.split(key, 3)

    params = init_params(k_param, token_vocab=TOKEN_VOCAB, max_pos=MAX_POS,
                         d_model=BERT_DIM, ff_dim=FF_DIM, num_layers=NUM_LAYERS,
                         num_heads=NUM_HEADS, hidden_dim=HIDDEN_DIM,
                         vocab_size=VOCAB_SIZE)

    x = jax.random.randint(k_x, (B, S), 1, TOKEN_VOCAB, dtype=jnp.int32)
    x = x.at[:, -2:].set(PAD_ID)  # trailing padding tokens
    mask = jax.random.bernoulli(k_mask, 0.7, (B, VOCAB_SIZE)).astype(jnp.int32)

    fwd = jax.jit(functools.partial(
        dqn_forward, pad_token_id=PAD_ID, num_heads=NUM_HEADS,
        num_layers=NUM_LAYERS, d_model=BERT_DIM, vocab_size=VOCAB_SIZE))

    q = jax.block_until_ready(fwd(params, x, mask))

    assert q.shape == (B, VOCAB_SIZE) and q.dtype == jnp.float32
    # masked actions must be exactly -1e9
    assert bool(jnp.all(jnp.where(mask == 0, q == -1e9, True)))
    print("KERNEL_OK")
</pallas_src>

<mosaic_0001>
module attributes {stable_mosaic.version = 11 : i64} {
  func.func @_dqn_fused_kernel(%arg0: i32, %arg1: memref<16x1xi32, #tpu.memory_space<vmem>>, %arg2: memref<1x16xi32, #tpu.memory_space<vmem>>, %arg3: memref<2x26xi32, #tpu.memory_space<vmem>>, %arg4: memref<640x128xbf16, #tpu.memory_space<vmem>>, %arg5: memref<8x128xf32, #tpu.memory_space<vmem>>, %arg6: memref<2x128x1280xbf16, #tpu.memory_space<vmem>>, %arg7: memref<2x16x128xf32, #tpu.memory_space<vmem>>, %arg8: memref<2x26xf32, #tpu.memory_space<vmem>>) attributes {dimension_semantics = [#tpu.dimension_semantics<arbitrary>], iteration_bounds = array<i64: 1>, scalar_prefetch = 0 : i64, scratch_operands = 0 : i64, tpu.core_type = #tpu.core_type<tc>, window_params = [{pipeline_mode = #tpu.pipeline_mode<synchronous>, transform_indices = @transform_0, window_bounds = array<i64: 16, 1>}, {pipeline_mode = #tpu.pipeline_mode<synchronous>, transform_indices = @transform_1, window_bounds = array<i64: 1, 16>}, {pipeline_mode = #tpu.pipeline_mode<synchronous>, transform_indices = @transform_2, window_bounds = array<i64: 2, 26>}, {pipeline_mode = #tpu.pipeline_mode<synchronous>, transform_indices = @transform_3, window_bounds = array<i64: 640, 128>}, {pipeline_mode = #tpu.pipeline_mode<synchronous>, transform_indices = @transform_4, window_bounds = array<i64: 8, 128>}, {pipeline_mode = #tpu.pipeline_mode<synchronous>, transform_indices = @transform_5, window_bounds = array<i64: 2, 128, 1280>}, {pipeline_mode = #tpu.pipeline_mode<synchronous>, transform_indices = @transform_6, window_bounds = array<i64: 2, 16, 128>}, {pipeline_mode = #tpu.pipeline_mode<synchronous>, transform_indices = @transform_7, window_bounds = array<i64: 2, 26>}]} {
    %c0 = arith.constant 0 : index
    %c0_0 = arith.constant 0 : index
    %0 = vector.load %arg5[%c0, %c0_0] : memref<8x128xf32, #tpu.memory_space<vmem>>, vector<8x128xf32>
    %1 = tpu.iota {dimensions = array<i32: 1>} : vector<16x128xi32>
    %c32_i32 = arith.constant 32 : i32
    %2 = vector.broadcast %c32_i32 : i32 to vector<16x128xi32>
    %3 = arith.cmpi slt, %1, %2 : vector<16x128xi32>
    %4 = arith.extui %3 : vector<16x128xi1> to vector<16x128xi32>
    %5 = arith.sitofp %4 : vector<16x128xi32> to vector<16x128xf32>
    %c0_1 = arith.constant 0 : index
    %c0_2 = arith.constant 0 : index
    %6 = vector.load %arg1[%c0_1, %c0_2] : memref<16x1xi32, #tpu.memory_space<vmem>>, vector<16x1xi32>
    %7 = arith.sitofp %6 : vector<16x1xi32> to vector<16x1xf32>
    %8 = tpu.iota {dimensions = array<i32: 1>} : vector<16x256xi32>
    %9 = arith.sitofp %8 : vector<16x256xi32> to vector<16x256xf32>
    %10 = tpu.iota {dimensions = array<i32: 0>} : vector<16x256xi32>
    %11 = arith.sitofp %10 : vector<16x256xi32> to vector<16x256xf32>
    %cst = arith.constant 5.000000e-01 : f32
    %12 = vector.broadcast %cst : f32 to vector<16x256xf32>
    %13 = arith.addf %11, %12 : vector<16x256xf32>
    %cst_3 = arith.constant 1.250000e-01 : f32
    %14 = vector.broadcast %cst_3 : f32 to vector<16x256xf32>
    %15 = arith.mulf %13, %14 : vector<16x256xf32>
    %16 = math.floor %15 : vector<16x256xf32>
    %cst_4 = arith.constant 8.000000e+00 : f32
    %17 = vector.broadcast %cst_4 : f32 to vector<16x256xf32>
    %18 = arith.mulf %17, %16 : vector<16x256xf32>
    %19 = arith.subf %11, %18 : vector<16x256xf32>
    %20 = vector.broadcast %7 : vector<16x1xf32> to vector<16x256xf32>
    %21 = arith.cmpf oeq, %9, %20 : vector<16x256xf32>
    %cst_5 = arith.constant 1.280000e+02 : f32
    %22 = vector.broadcast %cst_5 : f32 to vector<16x256xf32>
    %23 = arith.addf %19, %22 : vector<16x256xf32>
    %24 = arith.cmpf oeq, %9, %23 : vector<16x256xf32>
    %25 = arith.ori %21, %24 : vector<16x256xi1>
    %cst_6 = arith.constant 1.000000e+00 : f32
    %cst_7 = arith.constant 0.000000e+00 : f32
    %26 = vector.broadcast %cst_6 : f32 to vector<16x256xf32>
    %27 = vector.broadcast %cst_7 : f32 to vector<16x256xf32>
    %28 = arith.select %25, %26, %27 : vector<16x256xi1>, vector<16x256xf32>
    %29 = arith.truncf %28 : vector<16x256xf32> to vector<16x256xbf16>
    %c0_8 = arith.constant 0 : index
    %c0_9 = arith.constant 0 : index
    %30 = vector.load %arg4[%c0_8, %c0_9] : memref<640x128xbf16, #tpu.memory_space<vmem>>, vector<256x128xbf16>
    %cst_10 = arith.constant dense<0.000000e+00> : vector<16x128xf32>
    %31 = tpu.matmul %29, %30, %cst_10 {dimension_numbers = #tpu.dot_dimension_numbers<[1], [0], [0], [1], [0, 0, 1, 1], [], []>} : vector<16x256xbf16>, vector<256x128xbf16>, vector<16x128xf32> -> vector<16x128xf32>
    %32 = vector.extract_strided_slice %0 {offsets = [0, 0], sizes = [1, 128], strides = [1, 1]} : vector<8x128xf32> to vector<1x128xf32>
    %33 = vector.extract_strided_slice %0 {offsets = [1, 0], sizes = [1, 128], strides = [1, 1]} : vector<8x128xf32> to vector<1x128xf32>
    %cst_11 = arith.constant dense<0.000000e+00> : vector<16xf32>
    %34 = vector.multi_reduction <add>, %31, %cst_11 [1] : vector<16x128xf32> to vector<16xf32>
    %35 = vector.shape_cast %34 : vector<16xf32> to vector<16x1xf32>
    %cst_12 = arith.constant 3.125000e-02 : f32
    %36 = vector.broadcast %cst_12 : f32 to vector<16x1xf32>
    %37 = arith.mulf %35, %36 : vector<16x1xf32>
    %38 = vector.broadcast %37 : vector<16x1xf32> to vector<16x128xf32>
    %39 = arith.subf %31, %38 : vector<16x128xf32>
    %40 = arith.mulf %39, %5 : vector<16x128xf32>
    %41 = arith.mulf %40, %40 : vector<16x128xf32>
    %cst_13 = arith.constant dense<0.000000e+00> : vector<16xf32>
    %42 = vector.multi_reduction <add>, %41, %cst_13 [1] : vector<16x128xf32> to vector<16xf32>
    %43 = vector.shape_cast %42 : vector<16xf32> to vector<16x1xf32>
    %cst_14 = arith.constant 3.125000e-02 : f32
    %44 = vector.broadcast %cst_14 : f32 to vector<16x1xf32>
    %45 = arith.mulf %43, %44 : vector<16x1xf32>
    %cst_15 = arith.constant 9.99999996E-13 : f32
    %46 = vector.broadcast %cst_15 : f32 to vector<16x1xf32>
    %47 = arith.addf %45, %46 : vector<16x1xf32>
    %48 = math.rsqrt %47 : vector<16x1xf32>
    %49 = vector.broadcast %48 : vector<16x1xf32> to vector<16x128xf32>
    %50 = arith.mulf %40, %49 : vector<16x128xf32>
    %51 = vector.broadcast %32 : vector<1x128xf32> to vector<16x128xf32>
    %52 = arith.mulf %50, %51 : vector<16x128xf32>
    %53 = vector.broadcast %33 : vector<1x128xf32> to vector<16x128xf32>
    %54 = arith.addf %52, %53 : vector<16x128xf32>
    %55 = tpu.iota {dimensions = array<i32: 0>} : vector<16x16xi32>
    %56 = arith.sitofp %55 : vector<16x16xi32> to vector<16x16xf32>
    %cst_16 = arith.constant 5.000000e-01 : f32
    %57 = vector.broadcast %cst_16 : f32 to vector<16x16xf32>
    %58 = arith.addf %56, %57 : vector<16x16xf32>
    %cst_17 = arith.constant 1.250000e-01 : f32
    %59 = vector.broadcast %cst_17 : f32 to vector<16x16xf32>
    %60 = arith.mulf %58, %59 : vector<16x16xf32>
    %61 = math.floor %60 : vector<16x16xf32>
    %62 = tpu.iota {dimensions = array<i32: 1>} : vector<16x16xi32>
    %63 = arith.sitofp %62 : vector<16x16xi32> to vector<16x16xf32>
    %cst_18 = arith.constant 5.000000e-01 : f32
    %64 = vector.broadcast %cst_18 : f32 to vector<16x16xf32>
    %65 = arith.addf %63, %64 : vector<16x16xf32>
    %cst_19 = arith.constant 1.250000e-01 : f32
    %66 = vector.broadcast %cst_19 : f32 to vector<16x16xf32>
    %67 = arith.mulf %65, %66 : vector<16x16xf32>
    %68 = math.floor %67 : vector<16x16xf32>
    %c0_20 = arith.constant 0 : index
    %c0_21 = arith.constant 0 : index
    %69 = vector.load %arg2[%c0_20, %c0_21] : memref<1x16xi32, #tpu.memory_space<vmem>>, vector<1x16xi32>
    %c0_i32 = arith.constant 0 : i32
    %70 = vector.broadcast %c0_i32 : i32 to vector<1x16xi32>
    %71 = arith.cmpi ne, %69, %70 : vector<1x16xi32>
    %72 = arith.cmpf oeq, %61, %68 : vector<16x16xf32>
    %73 = vector.broadcast %71 : vector<1x16xi1> to vector<16x16xi1>
    %74 = arith.andi %72, %73 : vector<16x16xi1>
    %cst_22 = arith.constant 0.000000e+00 : f32
    %cst_23 = arith.constant -1.000000e+09 : f32
    %75 = vector.broadcast %cst_22 : f32 to vector<16x16xf32>
    %76 = vector.broadcast %cst_23 : f32 to vector<16x16xf32>
    %77 = arith.select %74, %75, %76 : vector<16x16xi1>, vector<16x16xf32>
    %c0_24 = arith.constant 0 : index
    %c0_25 = arith.constant 0 : index
    %c0_26 = arith.constant 0 : index
    %78 = vector.load %arg7[%c0_24, %c0_25, %c0_26] : memref<2x16x128xf32, #tpu.memory_space<vmem>>, vector<1x16x128xf32>
    %79 = vector.shape_cast %78 : vector<1x16x128xf32> to vector<16x128xf32>
    %80 = arith.truncf %54 : vector<16x128xf32> to vector<16x128xbf16>
    %c0_i32_27 = arith.constant 0 : i32
    %c0_i32_28 = arith.constant 0 : i32
    %c0_i32_29 = arith.constant 0 : i32
    %81 = tpu.memref_slice %arg6[%c0_i32_27, %c0_i32_28, %c0_i32_29] : memref<2x128x1280xbf16, #tpu.memory_space<vmem>> -> memref<1x128x1280xbf16, #tpu.memory_space<vmem>>
    %82 = tpu.memref_squeeze %81 : memref<1x128x1280xbf16, #tpu.memory_space<vmem>> -> memref<128x1280xbf16, #tpu.memory_space<vmem>>
    %c0_30 = arith.constant 0 : index
    %c0_31 = arith.constant 0 : index
    %83 = vector.load %82[%c0_30, %c0_31] : memref<128x1280xbf16, #tpu.memory_space<vmem>>, vector<128x768xbf16>
    %cst_32 = arith.constant dense<0.000000e+00> : vector<16x768xf32>
    %84 = tpu.matmul %80, %83, %cst_32 {dimension_numbers = #tpu.dot_dimension_numbers<[1], [0], [0], [1], [0, 0, 1, 1], [], []>} : vector<16x128xbf16>, vector<128x768xbf16>, vector<16x768xf32> -> vector<16x768xf32>
    %85 = vector.extract_strided_slice %84 {offsets = [0, 0], sizes = [16, 128], strides = [1, 1]} : vector<16x768xf32> to vector<16x128xf32>
    %86 = vector.extract_strided_slice %79 {offsets = [7, 0], sizes = [1, 128], strides = [1, 1]} : vector<16x128xf32> to vector<1x128xf32>
    %87 = vector.broadcast %86 : vector<1x128xf32> to vector<16x128xf32>
    %88 = arith.addf %85, %87 : vector<16x128xf32>
    %89 = vector.extract_strided_slice %84 {offsets = [0, 128], sizes = [16, 128], strides = [1, 1]} : vector<16x768xf32> to vector<16x128xf32>
    %90 = vector.extract_strided_slice %79 {offsets = [8, 0], sizes = [1, 128], strides = [1, 1]} : vector<16x128xf32> to vector<1x128xf32>
    %91 = vector.broadcast %90 : vector<1x128xf32> to vector<16x128xf32>
    %92 = arith.addf %89, %91 : vector<16x128xf32>
    %93 = vector.extract_strided_slice %84 {offsets = [0, 256], sizes = [16, 128], strides = [1, 1]} : vector<16x768xf32> to vector<16x128xf32>
    %94 = vector.extract_strided_slice %79 {offsets = [9, 0], sizes = [1, 128], strides = [1, 1]} : vector<16x128xf32> to vector<1x128xf32>
    %95 = vector.broadcast %94 : vector<1x128xf32> to vector<16x128xf32>
    %96 = arith.addf %93, %95 : vector<16x128xf32>
    %97 = arith.truncf %88 : vector<16x128xf32> to vector<16x128xbf16>
    %98 = arith.truncf %92 : vector<16x128xf32> to vector<16x128xbf16>
    %cst_33 = arith.constant dense<0.000000e+00> : vector<16x16xf32>
    %99 = tpu.matmul %97, %98, %cst_33 {dimension_numbers = #tpu.dot_dimension_numbers<[1], [1], [0], [0], [0, 0, 1, 0], [], []>} : vector<16x128xbf16>, vector<16x128xbf16>, vector<16x16xf32> -> vector<16x16xf32>
    %100 = arith.addf %99, %77 : vector<16x16xf32>
    %cst_34 = arith.constant dense<0xFF800000> : vector<16xf32>
    %101 = vector.multi_reduction <maximumf>, %100, %cst_34 [1] : vector<16x16xf32> to vector<16xf32>
    %102 = vector.shape_cast %101 : vector<16xf32> to vector<16x1xf32>
    %103 = vector.broadcast %102 : vector<16x1xf32> to vector<16x16xf32>
    %104 = arith.subf %100, %103 : vector<16x16xf32>
    %105 = math.exp %104 : vector<16x16xf32>
    %cst_35 = arith.constant dense<0.000000e+00> : vector<16xf32>
    %106 = vector.multi_reduction <add>, %105, %cst_35 [1] : vector<16x16xf32> to vector<16xf32>
    %107 = vector.shape_cast %106 : vector<16xf32> to vector<16x1xf32>
    %108 = vector.broadcast %107 : vector<16x1xf32> to vector<16x16xf32>
    %109 = arith.divf %105, %108 : vector<16x16xf32>
    %110 = arith.truncf %109 : vector<16x16xf32> to vector<16x16xbf16>
    %111 = arith.truncf %96 : vector<16x128xf32> to vector<16x128xbf16>
    %cst_36 = arith.constant dense<0.000000e+00> : vector<16x128xf32>
    %112 = tpu.matmul %110, %111, %cst_36 {dimension_numbers = #tpu.dot_dimension_numbers<[1], [0], [0], [1], [0, 0, 1, 1], [], []>} : vector<16x16xbf16>, vector<16x128xbf16>, vector<16x128xf32> -> vector<16x128xf32>
    %113 = arith.truncf %112 : vector<16x128xf32> to vector<16x128xbf16>
    %c0_i32_37 = arith.constant 0 : i32
    %c0_i32_38 = arith.constant 0 : i32
    %c0_i32_39 = arith.constant 0 : i32
    %114 = tpu.memref_slice %arg6[%c0_i32_37, %c0_i32_38, %c0_i32_39] : memref<2x128x1280xbf16, #tpu.memory_space<vmem>> -> memref<1x128x1280xbf16, #tpu.memory_space<vmem>>
    %115 = tpu.memref_squeeze %114 : memref<1x128x1280xbf16, #tpu.memory_space<vmem>> -> memref<128x1280xbf16, #tpu.memory_space<vmem>>
    %c0_40 = arith.constant 0 : index
    %c768 = arith.constant 768 : index
    %116 = vector.load %115[%c0_40, %c768] : memref<128x1280xbf16, #tpu.memory_space<vmem>>, vector<128x128xbf16>
    %cst_41 = arith.constant dense<0.000000e+00> : vector<16x128xf32>
    %117 = tpu.matmul %113, %116, %cst_41 {dimension_numbers = #tpu.dot_dimension_numbers<[1], [0], [0], [1], [0, 0, 1, 1], [], []>} : vector<16x128xbf16>, vector<128x128xbf16>, vector<16x128xf32> -> vector<16x128xf32>
    %118 = vector.extract_strided_slice %84 {offsets = [0, 384], sizes = [16, 128], strides = [1, 1]} : vector<16x768xf32> to vector<16x128xf32>
    %119 = vector.extract_strided_slice %79 {offsets = [10, 0], sizes = [1, 128], strides = [1, 1]} : vector<16x128xf32> to vector<1x128xf32>
    %120 = vector.broadcast %119 : vector<1x128xf32> to vector<16x128xf32>
    %121 = arith.addf %118, %120 : vector<16x128xf32>
    %122 = vector.extract_strided_slice %84 {offsets = [0, 512], sizes = [16, 128], strides = [1, 1]} : vector<16x768xf32> to vector<16x128xf32>
    %123 = vector.extract_strided_slice %79 {offsets = [11, 0], sizes = [1, 128], strides = [1, 1]} : vector<16x128xf32> to vector<1x128xf32>
    %124 = vector.broadcast %123 : vector<1x128xf32> to vector<16x128xf32>
    %125 = arith.addf %122, %124 : vector<16x128xf32>
    %126 = vector.extract_strided_slice %84 {offsets = [0, 640], sizes = [16, 128], strides = [1, 1]} : vector<16x768xf32> to vector<16x128xf32>
    %127 = vector.extract_strided_slice %79 {offsets = [12, 0], sizes = [1, 128], strides = [1, 1]} : vector<16x128xf32> to vector<1x128xf32>
    %128 = vector.broadcast %127 : vector<1x128xf32> to vector<16x128xf32>
    %129 = arith.addf %126, %128 : vector<16x128xf32>
    %130 = arith.truncf %121 : vector<16x128xf32> to vector<16x128xbf16>
    %131 = arith.truncf %125 : vector<16x128xf32> to vector<16x128xbf16>
    %cst_42 = arith.constant dense<0.000000e+00> : vector<16x16xf32>
    %132 = tpu.matmul %130, %131, %cst_42 {dimension_numbers = #tpu.dot_dimension_numbers<[1], [1], [0], [0], [0, 0, 1, 0], [], []>} : vector<16x128xbf16>, vector<16x128xbf16>, vector<16x16xf32> -> vector<16x16xf32>
    %133 = arith.addf %132, %77 : vector<16x16xf32>
    %cst_43 = arith.constant dense<0xFF800000> : vector<16xf32>
    %134 = vector.multi_reduction <maximumf>, %133, %cst_43 [1] : vector<16x16xf32> to vector<16xf32>
    %135 = vector.shape_cast %134 : vector<16xf32> to vector<16x1xf32>
    %136 = vector.broadcast %135 : vector<16x1xf32> to vector<16x16xf32>
    %137 = arith.subf %133, %136 : vector<16x16xf32>
    %138 = math.exp %137 : vector<16x16xf32>
    %cst_44 = arith.constant dense<0.000000e+00> : vector<16xf32>
    %139 = vector.multi_reduction <add>, %138, %cst_44 [1] : vector<16x16xf32> to vector<16xf32>
    %140 = vector.shape_cast %139 : vector<16xf32> to vector<16x1xf32>
    %141 = vector.broadcast %140 : vector<16x1xf32> to vector<16x16xf32>
    %142 = arith.divf %138, %141 : vector<16x16xf32>
    %143 = arith.truncf %142 : vector<16x16xf32> to vector<16x16xbf16>
    %144 = arith.truncf %129 : vector<16x128xf32> to vector<16x128xbf16>
    %cst_45 = arith.constant dense<0.000000e+00> : vector<16x128xf32>
    %145 = tpu.matmul %143, %144, %cst_45 {dimension_numbers = #tpu.dot_dimension_numbers<[1], [0], [0], [1], [0, 0, 1, 1], [], []>} : vector<16x16xbf16>, vector<16x128xbf16>, vector<16x128xf32> -> vector<16x128xf32>
    %146 = arith.truncf %145 : vector<16x128xf32> to vector<16x128xbf16>
    %c0_i32_46 = arith.constant 0 : i32
    %c0_i32_47 = arith.constant 0 : i32
    %c0_i32_48 = arith.constant 0 : i32
    %147 = tpu.memref_slice %arg6[%c0_i32_46, %c0_i32_47, %c0_i32_48] : memref<2x128x1280xbf16, #tpu.memory_space<vmem>> -> memref<1x128x1280xbf16, #tpu.memory_space<vmem>>
    %148 = tpu.memref_squeeze %147 : memref<1x128x1280xbf16, #tpu.memory_space<vmem>> -> memref<128x1280xbf16, #tpu.memory_space<vmem>>
    %c0_49 = arith.constant 0 : index
    %c896 = arith.constant 896 : index
    %149 = vector.load %148[%c0_49, %c896] : memref<128x1280xbf16, #tpu.memory_space<vmem>>, vector<128x128xbf16>
    %cst_50 = arith.constant dense<0.000000e+00> : vector<16x128xf32>
    %150 = tpu.matmul %146, %149, %cst_50 {dimension_numbers = #tpu.dot_dimension_numbers<[1], [0], [0], [1], [0, 0, 1, 1], [], []>} : vector<16x128xbf16>, vector<128x128xbf16>, vector<16x128xf32> -> vector<16x128xf32>
    %151 = arith.addf %117, %150 : vector<16x128xf32>
    %152 = arith.addf %151, %54 : vector<16x128xf32>
    %153 = vector.extract_strided_slice %79 {offsets = [0, 0], sizes = [1, 128], strides = [1, 1]} : vector<16x128xf32> to vector<1x128xf32>
    %154 = vector.broadcast %153 : vector<1x128xf32> to vector<16x128xf32>
    %155 = arith.addf %152, %154 : vector<16x128xf32>
    %156 = vector.extract_strided_slice %79 {offsets = [1, 0], sizes = [1, 128], strides = [1, 1]} : vector<16x128xf32> to vector<1x128xf32>
    %157 = vector.extract_strided_slice %79 {offsets = [2, 0], sizes = [1, 128], strides = [1, 1]} : vector<16x128xf32> to vector<1x128xf32>
    %cst_51 = arith.constant dense<0.000000e+00> : vector<16xf32>
    %158 = vector.multi_reduction <add>, %155, %cst_51 [1] : vector<16x128xf32> to vector<16xf32>
    %159 = vector.shape_cast %158 : vector<16xf32> to vector<16x1xf32>
    %cst_52 = arith.constant 3.125000e-02 : f32
    %160 = vector.broadcast %cst_52 : f32 to vector<16x1xf32>
    %161 = arith.mulf %159, %160 : vector<16x1xf32>
    %162 = vector.broadcast %161 : vector<16x1xf32> to vector<16x128xf32>
    %163 = arith.subf %155, %162 : vector<16x128xf32>
    %164 = arith.mulf %163, %5 : vector<16x128xf32>
    %165 = arith.mulf %164, %164 : vector<16x128xf32>
    %cst_53 = arith.constant dense<0.000000e+00> : vector<16xf32>
    %166 = vector.multi_reduction <add>, %165, %cst_53 [1] : vector<16x128xf32> to vector<16xf32>
    %167 = vector.shape_cast %166 : vector<16xf32> to vector<16x1xf32>
    %cst_54 = arith.constant 3.125000e-02 : f32
    %168 = vector.broadcast %cst_54 : f32 to vector<16x1xf32>
    %169 = arith.mulf %167, %168 : vector<16x1xf32>
    %cst_55 = arith.constant 9.99999996E-13 : f32
    %170 = vector.broadcast %cst_55 : f32 to vector<16x1xf32>
    %171 = arith.addf %169, %170 : vector<16x1xf32>
    %172 = math.rsqrt %171 : vector<16x1xf32>
    %173 = vector.broadcast %172 : vector<16x1xf32> to vector<16x128xf32>
    %174 = arith.mulf %164, %173 : vector<16x128xf32>
    %175 = vector.broadcast %156 : vector<1x128xf32> to vector<16x128xf32>
    %176 = arith.mulf %174, %175 : vector<16x128xf32>
    %177 = vector.broadcast %157 : vector<1x128xf32> to vector<16x128xf32>
    %178 = arith.addf %176, %177 : vector<16x128xf32>
    %179 = arith.truncf %178 : vector<16x128xf32> to vector<16x128xbf16>
    %c0_i32_56 = arith.constant 0 : i32
    %c0_i32_57 = arith.constant 0 : i32
    %c0_i32_58 = arith.constant 0 : i32
    %180 = tpu.memref_slice %arg6[%c0_i32_56, %c0_i32_57, %c0_i32_58] : memref<2x128x1280xbf16, #tpu.memory_space<vmem>> -> memref<1x128x1280xbf16, #tpu.memory_space<vmem>>
    %181 = tpu.memref_squeeze %180 : memref<1x128x1280xbf16, #tpu.memory_space<vmem>> -> memref<128x1280xbf16, #tpu.memory_space<vmem>>
    %c0_59 = arith.constant 0 : index
    %c1024 = arith.constant 1024 : index
    %182 = vector.load %181[%c0_59, %c1024] : memref<128x1280xbf16, #tpu.memory_space<vmem>>, vector<128x128xbf16>
    %cst_60 = arith.constant dense<0.000000e+00> : vector<16x128xf32>
    %183 = tpu.matmul %179, %182, %cst_60 {dimension_numbers = #tpu.dot_dimension_numbers<[1], [0], [0], [1], [0, 0, 1, 1], [], []>} : vector<16x128xbf16>, vector<128x128xbf16>, vector<16x128xf32> -> vector<16x128xf32>
    %184 = vector.extract_strided_slice %79 {offsets = [3, 0], sizes = [1, 128], strides = [1, 1]} : vector<16x128xf32> to vector<1x128xf32>
    %185 = vector.broadcast %184 : vector<1x128xf32> to vector<16x128xf32>
    %186 = arith.addf %183, %185 : vector<16x128xf32>
    %187 = arith.mulf %186, %186 : vector<16x128xf32>
    %188 = arith.mulf %186, %187 : vector<16x128xf32>
    %cst_61 = arith.constant 4.471500e-02 : f32
    %189 = vector.broadcast %cst_61 : f32 to vector<16x128xf32>
    %190 = arith.mulf %189, %188 : vector<16x128xf32>
    %191 = arith.addf %186, %190 : vector<16x128xf32>
    %cst_62 = arith.constant 0.797884583 : f32
    %192 = vector.broadcast %cst_62 : f32 to vector<16x128xf32>
    %193 = arith.mulf %192, %191 : vector<16x128xf32>
    %194 = math.tanh %193 : vector<16x128xf32>
    %cst_63 = arith.constant 1.000000e+00 : f32
    %195 = vector.broadcast %cst_63 : f32 to vector<16x128xf32>
    %196 = arith.addf %195, %194 : vector<16x128xf32>
    %cst_64 = arith.constant 5.000000e-01 : f32
    %197 = vector.broadcast %cst_64 : f32 to vector<16x128xf32>
    %198 = arith.mulf %197, %196 : vector<16x128xf32>
    %199 = arith.mulf %186, %198 : vector<16x128xf32>
    %200 = arith.truncf %199 : vector<16x128xf32> to vector<16x128xbf16>
    %c0_i32_65 = arith.constant 0 : i32
    %c0_i32_66 = arith.constant 0 : i32
    %c0_i32_67 = arith.constant 0 : i32
    %201 = tpu.memref_slice %arg6[%c0_i32_65, %c0_i32_66, %c0_i32_67] : memref<2x128x1280xbf16, #tpu.memory_space<vmem>> -> memref<1x128x1280xbf16, #tpu.memory_space<vmem>>
    %202 = tpu.memref_squeeze %201 : memref<1x128x1280xbf16, #tpu.memory_space<vmem>> -> memref<128x1280xbf16, #tpu.memory_space<vmem>>
    %c0_68 = arith.constant 0 : index
    %c1152 = arith.constant 1152 : index
    %203 = vector.load %202[%c0_68, %c1152] : memref<128x1280xbf16, #tpu.memory_space<vmem>>, vector<128x128xbf16>
    %cst_69 = arith.constant dense<0.000000e+00> : vector<16x128xf32>
    %204 = tpu.matmul %200, %203, %cst_69 {dimension_numbers = #tpu.dot_dimension_numbers<[1], [0], [0], [1], [0, 0, 1, 1], [], []>} : vector<16x128xbf16>, vector<128x128xbf16>, vector<16x128xf32> -> vector<16x128xf32>
    %205 = vector.extract_strided_slice %79 {offsets = [4, 0], sizes = [1, 128], strides = [1, 1]} : vector<16x128xf32> to vector<1x128xf32>
    %206 = vector.broadcast %205 : vector<1x128xf32> to vector<16x128xf32>
    %207 = arith.addf %204, %206 : vector<16x128xf32>
    %208 = arith.addf %207, %178 : vector<16x128xf32>
    %209 = vector.extract_strided_slice %79 {offsets = [5, 0], sizes = [1, 128], strides = [1, 1]} : vector<16x128xf32> to vector<1x128xf32>
    %210 = vector.extract_strided_slice %79 {offsets = [6, 0], sizes = [1, 128], strides = [1, 1]} : vector<16x128xf32> to vector<1x128xf32>
    %cst_70 = arith.constant dense<0.000000e+00> : vector<16xf32>
    %211 = vector.multi_reduction <add>, %208, %cst_70 [1] : vector<16x128xf32> to vector<16xf32>
    %212 = vector.shape_cast %211 : vector<16xf32> to vector<16x1xf32>
    %cst_71 = arith.constant 3.125000e-02 : f32
    %213 = vector.broadcast %cst_71 : f32 to vector<16x1xf32>
    %214 = arith.mulf %212, %213 : vector<16x1xf32>
    %215 = vector.broadcast %214 : vector<16x1xf32> to vector<16x128xf32>
    %216 = arith.subf %208, %215 : vector<16x128xf32>
    %217 = arith.mulf %216, %5 : vector<16x128xf32>
    %218 = arith.mulf %217, %217 : vector<16x128xf32>
    %cst_72 = arith.constant dense<0.000000e+00> : vector<16xf32>
    %219 = vector.multi_reduction <add>, %218, %cst_72 [1] : vector<16x128xf32> to vector<16xf32>
    %220 = vector.shape_cast %219 : vector<16xf32> to vector<16x1xf32>
    %cst_73 = arith.constant 3.125000e-02 : f32
    %221 = vector.broadcast %cst_73 : f32 to vector<16x1xf32>
    %222 = arith.mulf %220, %221 : vector<16x1xf32>
    %cst_74 = arith.constant 9.99999996E-13 : f32
    %223 = vector.broadcast %cst_74 : f32 to vector<16x1xf32>
    %224 = arith.addf %222, %223 : vector<16x1xf32>
    %225 = math.rsqrt %224 : vector<16x1xf32>
    %226 = vector.broadcast %225 : vector<16x1xf32> to vector<16x128xf32>
    %227 = arith.mulf %217, %226 : vector<16x128xf32>
    %228 = vector.broadcast %209 : vector<1x128xf32> to vector<16x128xf32>
    %229 = arith.mulf %227, %228 : vector<16x128xf32>
    %230 = vector.broadcast %210 : vector<1x128xf32> to vector<16x128xf32>
    %231 = arith.addf %229, %230 : vector<16x128xf32>
    %c1 = arith.constant 1 : index
    %c0_75 = arith.constant 0 : index
    %c0_76 = arith.constant 0 : index
    %232 = vector.load %arg7[%c1, %c0_75, %c0_76] : memref<2x16x128xf32, #tpu.memory_space<vmem>>, vector<1x16x128xf32>
    %233 = vector.shape_cast %232 : vector<1x16x128xf32> to vector<16x128xf32>
    %234 = arith.truncf %231 : vector<16x128xf32> to vector<16x128xbf16>
    %c1_i32 = arith.constant 1 : i32
    %c0_i32_77 = arith.constant 0 : i32
    %c0_i32_78 = arith.constant 0 : i32
    %235 = tpu.memref_slice %arg6[%c1_i32, %c0_i32_77, %c0_i32_78] : memref<2x128x1280xbf16, #tpu.memory_space<vmem>> -> memref<1x128x1280xbf16, #tpu.memory_space<vmem>>
    %236 = tpu.memref_squeeze %235 : memref<1x128x1280xbf16, #tpu.memory_space<vmem>> -> memref<128x1280xbf16, #tpu.memory_space<vmem>>
    %c0_79 = arith.constant 0 : index
    %c0_80 = arith.constant 0 : index
    %237 = vector.load %236[%c0_79, %c0_80] : memref<128x1280xbf16, #tpu.memory_space<vmem>>, vector<128x768xbf16>
    %cst_81 = arith.constant dense<0.000000e+00> : vector<16x768xf32>
    %238 = tpu.matmul %234, %237, %cst_81 {dimension_numbers = #tpu.dot_dimension_numbers<[1], [0], [0], [1], [0, 0, 1, 1], [], []>} : vector<16x128xbf16>, vector<128x768xbf16>, vector<16x768xf32> -> vector<16x768xf32>
    %239 = vector.extract_strided_slice %238 {offsets = [0, 0], sizes = [16, 128], strides = [1, 1]} : vector<16x768xf32> to vector<16x128xf32>
    %240 = vector.extract_strided_slice %233 {offsets = [7, 0], sizes = [1, 128], strides = [1, 1]} : vector<16x128xf32> to vector<1x128xf32>
    %241 = vector.broadcast %240 : vector<1x128xf32> to vector<16x128xf32>
    %242 = arith.addf %239, %241 : vector<16x128xf32>
    %243 = vector.extract_strided_slice %238 {offsets = [0, 128], sizes = [16, 128], strides = [1, 1]} : vector<16x768xf32> to vector<16x128xf32>
    %244 = vector.extract_strided_slice %233 {offsets = [8, 0], sizes = [1, 128], strides = [1, 1]} : vector<16x128xf32> to vector<1x128xf32>
    %245 = vector.broadcast %244 : vector<1x128xf32> to vector<16x128xf32>
    %246 = arith.addf %243, %245 : vector<16x128xf32>
    %247 = vector.extract_strided_slice %238 {offsets = [0, 256], sizes = [16, 128], strides = [1, 1]} : vector<16x768xf32> to vector<16x128xf32>
    %248 = vector.extract_strided_slice %233 {offsets = [9, 0], sizes = [1, 128], strides = [1, 1]} : vector<16x128xf32> to vector<1x128xf32>
    %249 = vector.broadcast %248 : vector<1x128xf32> to vector<16x128xf32>
    %250 = arith.addf %247, %249 : vector<16x128xf32>
    %251 = arith.truncf %242 : vector<16x128xf32> to vector<16x128xbf16>
    %252 = arith.truncf %246 : vector<16x128xf32> to vector<16x128xbf16>
    %cst_82 = arith.constant dense<0.000000e+00> : vector<16x16xf32>
    %253 = tpu.matmul %251, %252, %cst_82 {dimension_numbers = #tpu.dot_dimension_numbers<[1], [1], [0], [0], [0, 0, 1, 0], [], []>} : vector<16x128xbf16>, vector<16x128xbf16>, vector<16x16xf32> -> vector<16x16xf32>
    %254 = arith.addf %253, %77 : vector<16x16xf32>
    %cst_83 = arith.constant dense<0xFF800000> : vector<16xf32>
    %255 = vector.multi_reduction <maximumf>, %254, %cst_83 [1] : vector<16x16xf32> to vector<16xf32>
    %256 = vector.shape_cast %255 : vector<16xf32> to vector<16x1xf32>
    %257 = vector.broadcast %256 : vector<16x1xf32> to vector<16x16xf32>
    %258 = arith.subf %254, %257 : vector<16x16xf32>
    %259 = math.exp %258 : vector<16x16xf32>
    %cst_84 = arith.constant dense<0.000000e+00> : vector<16xf32>
    %260 = vector.multi_reduction <add>, %259, %cst_84 [1] : vector<16x16xf32> to vector<16xf32>
    %261 = vector.shape_cast %260 : vector<16xf32> to vector<16x1xf32>
    %262 = vector.broadcast %261 : vector<16x1xf32> to vector<16x16xf32>
    %263 = arith.divf %259, %262 : vector<16x16xf32>
    %264 = arith.truncf %263 : vector<16x16xf32> to vector<16x16xbf16>
    %265 = arith.truncf %250 : vector<16x128xf32> to vector<16x128xbf16>
    %cst_85 = arith.constant dense<0.000000e+00> : vector<16x128xf32>
    %266 = tpu.matmul %264, %265, %cst_85 {dimension_numbers = #tpu.dot_dimension_numbers<[1], [0], [0], [1], [0, 0, 1, 1], [], []>} : vector<16x16xbf16>, vector<16x128xbf16>, vector<16x128xf32> -> vector<16x128xf32>
    %267 = arith.truncf %266 : vector<16x128xf32> to vector<16x128xbf16>
    %c1_i32_86 = arith.constant 1 : i32
    %c0_i32_87 = arith.constant 0 : i32
    %c0_i32_88 = arith.constant 0 : i32
    %268 = tpu.memref_slice %arg6[%c1_i32_86, %c0_i32_87, %c0_i32_88] : memref<2x128x1280xbf16, #tpu.memory_space<vmem>> -> memref<1x128x1280xbf16, #tpu.memory_space<vmem>>
    %269 = tpu.memref_squeeze %268 : memref<1x128x1280xbf16, #tpu.memory_space<vmem>> -> memref<128x1280xbf16, #tpu.memory_space<vmem>>
    %c0_89 = arith.constant 0 : index
    %c768_90 = arith.constant 768 : index
    %270 = vector.load %269[%c0_89, %c768_90] : memref<128x1280xbf16, #tpu.memory_space<vmem>>, vector<128x128xbf16>
    %cst_91 = arith.constant dense<0.000000e+00> : vector<16x128xf32>
    %271 = tpu.matmul %267, %270, %cst_91 {dimension_numbers = #tpu.dot_dimension_numbers<[1], [0], [0], [1], [0, 0, 1, 1], [], []>} : vector<16x128xbf16>, vector<128x128xbf16>, vector<16x128xf32> -> vector<16x128xf32>
    %272 = vector.extract_strided_slice %238 {offsets = [0, 384], sizes = [16, 128], strides = [1, 1]} : vector<16x768xf32> to vector<16x128xf32>
    %273 = vector.extract_strided_slice %233 {offsets = [10, 0], sizes = [1, 128], strides = [1, 1]} : vector<16x128xf32> to vector<1x128xf32>
    %274 = vector.broadcast %273 : vector<1x128xf32> to vector<16x128xf32>
    %275 = arith.addf %272, %274 : vector<16x128xf32>
    %276 = vector.extract_strided_slice %238 {offsets = [0, 512], sizes = [16, 128], strides = [1, 1]} : vector<16x768xf32> to vector<16x128xf32>
    %277 = vector.extract_strided_slice %233 {offsets = [11, 0], sizes = [1, 128], strides = [1, 1]} : vector<16x128xf32> to vector<1x128xf32>
    %278 = vector.broadcast %277 : vector<1x128xf32> to vector<16x128xf32>
    %279 = arith.addf %276, %278 : vector<16x128xf32>
    %280 = vector.extract_strided_slice %238 {offsets = [0, 640], sizes = [16, 128], strides = [1, 1]} : vector<16x768xf32> to vector<16x128xf32>
    %281 = vector.extract_strided_slice %233 {offsets = [12, 0], sizes = [1, 128], strides = [1, 1]} : vector<16x128xf32> to vector<1x128xf32>
    %282 = vector.broadcast %281 : vector<1x128xf32> to vector<16x128xf32>
    %283 = arith.addf %280, %282 : vector<16x128xf32>
    %284 = arith.truncf %275 : vector<16x128xf32> to vector<16x128xbf16>
    %285 = arith.truncf %279 : vector<16x128xf32> to vector<16x128xbf16>
    %cst_92 = arith.constant dense<0.000000e+00> : vector<16x16xf32>
    %286 = tpu.matmul %284, %285, %cst_92 {dimension_numbers = #tpu.dot_dimension_numbers<[1], [1], [0], [0], [0, 0, 1, 0], [], []>} : vector<16x128xbf16>, vector<16x128xbf16>, vector<16x16xf32> -> vector<16x16xf32>
    %287 = arith.addf %286, %77 : vector<16x16xf32>
    %cst_93 = arith.constant dense<0xFF800000> : vector<16xf32>
    %288 = vector.multi_reduction <maximumf>, %287, %cst_93 [1] : vector<16x16xf32> to vector<16xf32>
    %289 = vector.shape_cast %288 : vector<16xf32> to vector<16x1xf32>
    %290 = vector.broadcast %289 : vector<16x1xf32> to vector<16x16xf32>
    %291 = arith.subf %287, %290 : vector<16x16xf32>
    %292 = math.exp %291 : vector<16x16xf32>
    %cst_94 = arith.constant dense<0.000000e+00> : vector<16xf32>
    %293 = vector.multi_reduction <add>, %292, %cst_94 [1] : vector<16x16xf32> to vector<16xf32>
    %294 = vector.shape_cast %293 : vector<16xf32> to vector<16x1xf32>
    %295 = vector.broadcast %294 : vector<16x1xf32> to vector<16x16xf32>
    %296 = arith.divf %292, %295 : vector<16x16xf32>
    %297 = arith.truncf %296 : vector<16x16xf32> to vector<16x16xbf16>
    %298 = arith.truncf %283 : vector<16x128xf32> to vector<16x128xbf16>
    %cst_95 = arith.constant dense<0.000000e+00> : vector<16x128xf32>
    %299 = tpu.matmul %297, %298, %cst_95 {dimension_numbers = #tpu.dot_dimension_numbers<[1], [0], [0], [1], [0, 0, 1, 1], [], []>} : vector<16x16xbf16>, vector<16x128xbf16>, vector<16x128xf32> -> vector<16x128xf32>
    %300 = arith.truncf %299 : vector<16x128xf32> to vector<16x128xbf16>
    %c1_i32_96 = arith.constant 1 : i32
    %c0_i32_97 = arith.constant 0 : i32
    %c0_i32_98 = arith.constant 0 : i32
    %301 = tpu.memref_slice %arg6[%c1_i32_96, %c0_i32_97, %c0_i32_98] : memref<2x128x1280xbf16, #tpu.memory_space<vmem>> -> memref<1x128x1280xbf16, #tpu.memory_space<vmem>>
    %302 = tpu.memref_squeeze %301 : memref<1x128x1280xbf16, #tpu.memory_space<vmem>> -> memref<128x1280xbf16, #tpu.memory_space<vmem>>
    %c0_99 = arith.constant 0 : index
    %c896_100 = arith.constant 896 : index
    %303 = vector.load %302[%c0_99, %c896_100] : memref<128x1280xbf16, #tpu.memory_space<vmem>>, vector<128x128xbf16>
    %cst_101 = arith.constant dense<0.000000e+00> : vector<16x128xf32>
    %304 = tpu.matmul %300, %303, %cst_101 {dimension_numbers = #tpu.dot_dimension_numbers<[1], [0], [0], [1], [0, 0, 1, 1], [], []>} : vector<16x128xbf16>, vector<128x128xbf16>, vector<16x128xf32> -> vector<16x128xf32>
    %305 = arith.addf %271, %304 : vector<16x128xf32>
    %306 = arith.addf %305, %231 : vector<16x128xf32>
    %307 = vector.extract_strided_slice %233 {offsets = [0, 0], sizes = [1, 128], strides = [1, 1]} : vector<16x128xf32> to vector<1x128xf32>
    %308 = vector.broadcast %307 : vector<1x128xf32> to vector<16x128xf32>
    %309 = arith.addf %306, %308 : vector<16x128xf32>
    %310 = vector.extract_strided_slice %233 {offsets = [1, 0], sizes = [1, 128], strides = [1, 1]} : vector<16x128xf32> to vector<1x128xf32>
    %311 = vector.extract_strided_slice %233 {offsets = [2, 0], sizes = [1, 128], strides = [1, 1]} : vector<16x128xf32> to vector<1x128xf32>
    %cst_102 = arith.constant dense<0.000000e+00> : vector<16xf32>
    %312 = vector.multi_reduction <add>, %309, %cst_102 [1] : vector<16x128xf32> to vector<16xf32>
    %313 = vector.shape_cast %312 : vector<16xf32> to vector<16x1xf32>
    %cst_103 = arith.constant 3.125000e-02 : f32
    %314 = vector.broadcast %cst_103 : f32 to vector<16x1xf32>
    %315 = arith.mulf %313, %314 : vector<16x1xf32>
    %316 = vector.broadcast %315 : vector<16x1xf32> to vector<16x128xf32>
    %317 = arith.subf %309, %316 : vector<16x128xf32>
    %318 = arith.mulf %317, %5 : vector<16x128xf32>
    %319 = arith.mulf %318, %318 : vector<16x128xf32>
    %cst_104 = arith.constant dense<0.000000e+00> : vector<16xf32>
    %320 = vector.multi_reduction <add>, %319, %cst_104 [1] : vector<16x128xf32> to vector<16xf32>
    %321 = vector.shape_cast %320 : vector<16xf32> to vector<16x1xf32>
    %cst_105 = arith.constant 3.125000e-02 : f32
    %322 = vector.broadcast %cst_105 : f32 to vector<16x1xf32>
    %323 = arith.mulf %321, %322 : vector<16x1xf32>
    %cst_106 = arith.constant 9.99999996E-13 : f32
    %324 = vector.broadcast %cst_106 : f32 to vector<16x1xf32>
    %325 = arith.addf %323, %324 : vector<16x1xf32>
    %326 = math.rsqrt %325 : vector<16x1xf32>
    %327 = vector.broadcast %326 : vector<16x1xf32> to vector<16x128xf32>
    %328 = arith.mulf %318, %327 : vector<16x128xf32>
    %329 = vector.broadcast %310 : vector<1x128xf32> to vector<16x128xf32>
    %330 = arith.mulf %328, %329 : vector<16x128xf32>
    %331 = vector.broadcast %311 : vector<1x128xf32> to vector<16x128xf32>
    %332 = arith.addf %330, %331 : vector<16x128xf32>
    %333 = arith.truncf %332 : vector<16x128xf32> to vector<16x128xbf16>
    %c1_i32_107 = arith.constant 1 : i32
    %c0_i32_108 = arith.constant 0 : i32
    %c0_i32_109 = arith.constant 0 : i32
    %334 = tpu.memref_slice %arg6[%c1_i32_107, %c0_i32_108, %c0_i32_109] : memref<2x128x1280xbf16, #tpu.memory_space<vmem>> -> memref<1x128x1280xbf16, #tpu.memory_space<vmem>>
    %335 = tpu.memref_squeeze %334 : memref<1x128x1280xbf16, #tpu.memory_space<vmem>> -> memref<128x1280xbf16, #tpu.memory_space<vmem>>
    %c0_110 = arith.constant 0 : index
    %c1024_111 = arith.constant 1024 : index
    %336 = vector.load %335[%c0_110, %c1024_111] : memref<128x1280xbf16, #tpu.memory_space<vmem>>, vector<128x128xbf16>
    %cst_112 = arith.constant dense<0.000000e+00> : vector<16x128xf32>
    %337 = tpu.matmul %333, %336, %cst_112 {dimension_numbers = #tpu.dot_dimension_numbers<[1], [0], [0], [1], [0, 0, 1, 1], [], []>} : vector<16x128xbf16>, vector<128x128xbf16>, vector<16x128xf32> -> vector<16x128xf32>
    %338 = vector.extract_strided_slice %233 {offsets = [3, 0], sizes = [1, 128], strides = [1, 1]} : vector<16x128xf32> to vector<1x128xf32>
    %339 = vector.broadcast %338 : vector<1x128xf32> to vector<16x128xf32>
    %340 = arith.addf %337, %339 : vector<16x128xf32>
    %341 = arith.mulf %340, %340 : vector<16x128xf32>
    %342 = arith.mulf %340, %341 : vector<16x128xf32>
    %cst_113 = arith.constant 4.471500e-02 : f32
    %343 = vector.broadcast %cst_113 : f32 to vector<16x128xf32>
    %344 = arith.mulf %343, %342 : vector<16x128xf32>
    %345 = arith.addf %340, %344 : vector<16x128xf32>
    %cst_114 = arith.constant 0.797884583 : f32
    %346 = vector.broadcast %cst_114 : f32 to vector<16x128xf32>
    %347 = arith.mulf %346, %345 : vector<16x128xf32>
    %348 = math.tanh %347 : vector<16x128xf32>
    %cst_115 = arith.constant 1.000000e+00 : f32
    %349 = vector.broadcast %cst_115 : f32 to vector<16x128xf32>
    %350 = arith.addf %349, %348 : vector<16x128xf32>
    %cst_116 = arith.constant 5.000000e-01 : f32
    %351 = vector.broadcast %cst_116 : f32 to vector<16x128xf32>
    %352 = arith.mulf %351, %350 : vector<16x128xf32>
    %353 = arith.mulf %340, %352 : vector<16x128xf32>
    %354 = arith.truncf %353 : vector<16x128xf32> to vector<16x128xbf16>
    %c1_i32_117 = arith.constant 1 : i32
    %c0_i32_118 = arith.constant 0 : i32
    %c0_i32_119 = arith.constant 0 : i32
    %355 = tpu.memref_slice %arg6[%c1_i32_117, %c0_i32_118, %c0_i32_119] : memref<2x128x1280xbf16, #tpu.memory_space<vmem>> -> memref<1x128x1280xbf16, #tpu.memory_space<vmem>>
    %356 = tpu.memref_squeeze %355 : memref<1x128x1280xbf16, #tpu.memory_space<vmem>> -> memref<128x1280xbf16, #tpu.memory_space<vmem>>
    %c0_120 = arith.constant 0 : index
    %c1152_121 = arith.constant 1152 : index
    %357 = vector.load %356[%c0_120, %c1152_121] : memref<128x1280xbf16, #tpu.memory_space<vmem>>, vector<128x128xbf16>
    %cst_122 = arith.constant dense<0.000000e+00> : vector<16x128xf32>
    %358 = tpu.matmul %354, %357, %cst_122 {dimension_numbers = #tpu.dot_dimension_numbers<[1], [0], [0], [1], [0, 0, 1, 1], [], []>} : vector<16x128xbf16>, vector<128x128xbf16>, vector<16x128xf32> -> vector<16x128xf32>
    %359 = vector.extract_strided_slice %233 {offsets = [4, 0], sizes = [1, 128], strides = [1, 1]} : vector<16x128xf32> to vector<1x128xf32>
    %360 = vector.broadcast %359 : vector<1x128xf32> to vector<16x128xf32>
    %361 = arith.addf %358, %360 : vector<16x128xf32>
    %362 = arith.addf %361, %332 : vector<16x128xf32>
    %363 = vector.extract_strided_slice %233 {offsets = [5, 0], sizes = [1, 128], strides = [1, 1]} : vector<16x128xf32> to vector<1x128xf32>
    %364 = vector.extract_strided_slice %233 {offsets = [6, 0], sizes = [1, 128], strides = [1, 1]} : vector<16x128xf32> to vector<1x128xf32>
    %cst_123 = arith.constant dense<0.000000e+00> : vector<16xf32>
    %365 = vector.multi_reduction <add>, %362, %cst_123 [1] : vector<16x128xf32> to vector<16xf32>
    %366 = vector.shape_cast %365 : vector<16xf32> to vector<16x1xf32>
    %cst_124 = arith.constant 3.125000e-02 : f32
    %367 = vector.broadcast %cst_124 : f32 to vector<16x1xf32>
    %368 = arith.mulf %366, %367 : vector<16x1xf32>
    %369 = vector.broadcast %368 : vector<16x1xf32> to vector<16x128xf32>
    %370 = arith.subf %362, %369 : vector<16x128xf32>
    %371 = arith.mulf %370, %5 : vector<16x128xf32>
    %372 = arith.mulf %371, %371 : vector<16x128xf32>
    %cst_125 = arith.constant dense<0.000000e+00> : vector<16xf32>
    %373 = vector.multi_reduction <add>, %372, %cst_125 [1] : vector<16x128xf32> to vector<16xf32>
    %374 = vector.shape_cast %373 : vector<16xf32> to vector<16x1xf32>
    %cst_126 = arith.constant 3.125000e-02 : f32
    %375 = vector.broadcast %cst_126 : f32 to vector<16x1xf32>
    %376 = arith.mulf %374, %375 : vector<16x1xf32>
    %cst_127 = arith.constant 9.99999996E-13 : f32
    %377 = vector.broadcast %cst_127 : f32 to vector<16x1xf32>
    %378 = arith.addf %376, %377 : vector<16x1xf32>
    %379 = math.rsqrt %378 : vector<16x1xf32>
    %380 = vector.broadcast %379 : vector<16x1xf32> to vector<16x128xf32>
    %381 = arith.mulf %371, %380 : vector<16x128xf32>
    %382 = vector.broadcast %363 : vector<1x128xf32> to vector<16x128xf32>
    %383 = arith.mulf %381, %382 : vector<16x128xf32>
    %384 = vector.broadcast %364 : vector<1x128xf32> to vector<16x128xf32>
    %385 = arith.addf %383, %384 : vector<16x128xf32>
    %386 = vector.extract_strided_slice %385 {offsets = [0, 0], sizes = [1, 128], strides = [1, 1]} : vector<16x128xf32> to vector<1x128xf32>
    %387 = vector.extract_strided_slice %385 {offsets = [8, 0], sizes = [1, 128], strides = [1, 1]} : vector<16x128xf32> to vector<1x128xf32>
    %388 = tpu.concatenate %386, %387 in 0 : vector<1x128xf32>, vector<1x128xf32> -> vector<2x128xf32>
    %389 = arith.truncf %388 : vector<2x128xf32> to vector<2x128xbf16>
    %c256 = arith.constant 256 : index
    %c0_128 = arith.constant 0 : index
    %390 = vector.load %arg4[%c256, %c0_128] : memref<640x128xbf16, #tpu.memory_space<vmem>>, vector<128x128xbf16>
    %cst_129 = arith.constant dense<0.000000e+00> : vector<2x128xf32>
    %391 = tpu.matmul %389, %390, %cst_129 {dimension_numbers = #tpu.dot_dimension_numbers<[1], [0], [0], [1], [0, 0, 1, 1], [], []>} : vector<2x128xbf16>, vector<128x128xbf16>, vector<2x128xf32> -> vector<2x128xf32>
    %392 = vector.extract_strided_slice %0 {offsets = [2, 0], sizes = [1, 128], strides = [1, 1]} : vector<8x128xf32> to vector<1x128xf32>
    %393 = vector.broadcast %392 : vector<1x128xf32> to vector<2x128xf32>
    %394 = arith.addf %391, %393 : vector<2x128xf32>
    %395 = math.tanh %394 : vector<2x128xf32>
    %396 = arith.truncf %395 : vector<2x128xf32> to vector<2x128xbf16>
    %c384 = arith.constant 384 : index
    %c0_130 = arith.constant 0 : index
    %397 = vector.load %arg4[%c384, %c0_130] : memref<640x128xbf16, #tpu.memory_space<vmem>>, vector<128x128xbf16>
    %cst_131 = arith.constant dense<0.000000e+00> : vector<2x128xf32>
    %398 = tpu.matmul %396, %397, %cst_131 {dimension_numbers = #tpu.dot_dimension_numbers<[1], [0], [0], [1], [0, 0, 1, 1], [], []>} : vector<2x128xbf16>, vector<128x128xbf16>, vector<2x128xf32> -> vector<2x128xf32>
    %399 = vector.extract_strided_slice %0 {offsets = [3, 0], sizes = [1, 128], strides = [1, 1]} : vector<8x128xf32> to vector<1x128xf32>
    %400 = vector.broadcast %399 : vector<1x128xf32> to vector<2x128xf32>
    %401 = arith.addf %398, %400 : vector<2x128xf32>
    %cst_132 = arith.constant 0.000000e+00 : f32
    %402 = vector.broadcast %cst_132 : f32 to vector<2x128xf32>
    %403 = arith.maximumf %401, %402 : vector<2x128xf32>
    %404 = arith.truncf %403 : vector<2x128xf32> to vector<2x128xbf16>
    %c512 = arith.constant 512 : index
    %c0_133 = arith.constant 0 : index
    %405 = vector.load %arg4[%c512, %c0_133] : memref<640x128xbf16, #tpu.memory_space<vmem>>, vector<128x128xbf16>
    %cst_134 = arith.constant dense<0.000000e+00> : vector<2x128xf32>
    %406 = tpu.matmul %404, %405, %cst_134 {dimension_numbers = #tpu.dot_dimension_numbers<[1], [0], [0], [1], [0, 0, 1, 1], [], []>} : vector<2x128xbf16>, vector<128x128xbf16>, vector<2x128xf32> -> vector<2x128xf32>
    %407 = vector.extract_strided_slice %0 {offsets = [4, 0], sizes = [1, 128], strides = [1, 1]} : vector<8x128xf32> to vector<1x128xf32>
    %408 = vector.broadcast %407 : vector<1x128xf32> to vector<2x128xf32>
    %409 = arith.addf %406, %408 : vector<2x128xf32>
    %c0_135 = arith.constant 0 : index
    %c0_136 = arith.constant 0 : index
    %410 = vector.load %arg3[%c0_135, %c0_136] : memref<2x26xi32, #tpu.memory_space<vmem>>, vector<2x26xi32>
    %c0_i32_137 = arith.constant 0 : i32
    %411 = vector.broadcast %c0_i32_137 : i32 to vector<2x26xi32>
    %412 = arith.cmpi eq, %410, %411 : vector<2x26xi32>
    %413 = vector.extract_strided_slice %409 {offsets = [0, 0], sizes = [2, 26], strides = [1, 1]} : vector<2x128xf32> to vector<2x26xf32>
    %cst_138 = arith.constant -1.000000e+09 : f32
    %414 = vector.broadcast %cst_138 : f32 to vector<2x26xf32>
    %415 = arith.select %412, %414, %413 : vector<2x26xi1>, vector<2x26xf32>
    %c0_139 = arith.constant 0 : index
    %c0_140 = arith.constant 0 : index
    %416 = vector.load %arg8[%c0_139, %c0_140] : memref<2x26xf32, #tpu.memory_space<vmem>>, vector<2x26xf32>
    tpu.vector_store %arg8[%c0_139, %c0_140], %415 {strides = array<i32>} : memref<2x26xf32, #tpu.memory_space<vmem>>, vector<2x26xf32>,
    return
  }
  func.func @transform_0(%arg0: i32) -> (i32, i32) {
    %c0_i32 = arith.constant 0 : i32
    %c0_i32_0 = arith.constant 0 : i32
    %c0_i32_1 = arith.constant 0 : i32
    return %c0_i32, %c0_i32_0 : i32, i32
  }
  func.func @transform_1(%arg0: i32) -> (i32, i32) {
    %c0_i32 = arith.constant 0 : i32
    %c0_i32_0 = arith.constant 0 : i32
    %c0_i32_1 = arith.constant 0 : i32
    return %c0_i32, %c0_i32_0 : i32, i32
  }
  func.func @transform_2(%arg0: i32) -> (i32, i32) {
    %c0_i32 = arith.constant 0 : i32
    %c0_i32_0 = arith.constant 0 : i32
    %c0_i32_1 = arith.constant 0 : i32
    return %c0_i32, %c0_i32_0 : i32, i32
  }
  func.func @transform_3(%arg0: i32) -> (i32, i32) {
    %c0_i32 = arith.constant 0 : i32
    %c0_i32_0 = arith.constant 0 : i32
    %c0_i32_1 = arith.constant 0 : i32
    return %c0_i32, %c0_i32_0 : i32, i32
  }
  func.func @transform_4(%arg0: i32) -> (i32, i32) {
    %c0_i32 = arith.constant 0 : i32
    %c0_i32_0 = arith.constant 0 : i32
    %c0_i32_1 = arith.constant 0 : i32
    return %c0_i32, %c0_i32_0 : i32, i32
  }
  func.func @transform_5(%arg0: i32) -> (i32, i32, i32) {
    %c0_i32 = arith.constant 0 : i32
    %c0_i32_0 = arith.constant 0 : i32
    %c0_i32_1 = arith.constant 0 : i32
    %c0_i32_2 = arith.constant 0 : i32
    return %c0_i32, %c0_i32_0, %c0_i32_1 : i32, i32, i32
  }
  func.func @transform_6(%arg0: i32) -> (i32, i32, i32) {
    %c0_i32 = arith.constant 0 : i32
    %c0_i32_0 = arith.constant 0 : i32
    %c0_i32_1 = arith.constant 0 : i32
    %c0_i32_2 = arith.constant 0 : i32
    return %c0_i32, %c0_i32_0, %c0_i32_1 : i32, i32, i32
  }
  func.func @transform_7(%arg0: i32) -> (i32, i32) {
    %c0_i32 = arith.constant 0 : i32
    %c0_i32_0 = arith.constant 0 : i32
    %c0_i32_1 = arith.constant 0 : i32
    return %c0_i32, %c0_i32_0 : i32, i32
  }
}

</mosaic_0001>

<bundles_post_ra>
// kernel: dqn_forward.1
= control target key start
LH: loop header
LB: loop body
LE: loop exit
PB: predicated region body
PF: predicated region fallthrough
CT: control target
= control target key end

     0   :  { %12 = vsyncpa [#allocation3], 0  ;;  %s4156_s0 = inlined_call_operand.vmem [shape: s32[16,1], index: 0, kind: input, shape index: {}]   ;;  %s4157_s1 = inlined_call_operand.vmem [shape: s32[1,16], index: 1, kind: input, shape index: {}]   ;;  %s4158_s2 = inlined_call_operand.vmem [shape: s32[2,26], index: 2, kind: input, shape index: {}]   ;;  %s4159_s3 = inlined_call_operand.hbm [shape: bf16[640,128], index: 3, kind: input, shape index: {}]   ;;  %s4160_s4 = inlined_call_operand.vmem [shape: f32[8,128], index: 4, kind: input, shape index: {}]   ;;  %s4161_s5 = inlined_call_operand.hbm [shape: bf16[2,128,1280], index: 5, kind: input, shape index: {}]   ;;  %s4162_s6 = inlined_call_operand.hbm [shape: f32[2,16,128], index: 6, kind: input, shape index: {}]   ;;  %s4163_s7 = inlined_call_operand.hbm [shape: f32[2,26], index: 7, kind: output, shape index: {}]  }
   0x1   :  { %13 = vsyncpa [#allocation6], 0  ;;  %s40_s26 = sshll.u32 %s4161_s5, 4  ;;  %s41_s26 = int_to_ptr.hbm [resolvable:$true] %s40_s26 }
   0x2   :  { %14 = vsyncpa [#allocation4], 0  ;;  %s3807_s27 = smov [#allocation5]   ;;  %s25_s8 = sshll.u32 %s4159_s3, 4  ;;  %s26_s8 = int_to_ptr.hbm [resolvable:$true] %s25_s8 }
   0x3   :  { %s42_s28 = sshll.u32 %s3807_s27, 4  ;;  %s3808_s9 = smov 640   ;;  %s43_s28 = int_to_ptr.vmem [resolvable:$true] %s42_s28 }
   0x4   :  { %s3809_s10 = smov 40   ;;  %s3810_s11 = smov [#allocation2]  }
   0x5   :  { %48 = dma.hbm_to_vmem [thread:$0]  %s41_s26, 20480, %s43_s28, [#allocation6], %s3808_s9, %s3808_s9, %s3809_s10  }
   0x6   :  { %s27_s12 = sshll.u32 %s3810_s11, 4  ;;  %s3811_s13 = smov 64   ;;  %s28_s12 = int_to_ptr.vmem [resolvable:$true] %s27_s12 }
   0x7   :  { %s3812_s14 = smov 4   ;;  %s53_s16 = sshll.u32 %s4162_s6, 4  ;;  %s54_s16 = int_to_ptr.hbm [resolvable:$true] %s53_s16 }
   0x8   :  { %33 = dma.hbm_to_vmem [thread:$0]  %s26_s8, 5120, %s28_s12, [#allocation3], %s3811_s13, %s3811_s13, %s3812_s14  }
   0x9   :  { %s3813_s17 = smov [#allocation7]   ;;  %s3814_s19 = smov 128  }
   0xa   :  { %s55_s18 = sshll.u32 %s3813_s17, 4  ;;  %s3815_s3 = smov 8   ;;  %s56_s18 = int_to_ptr.vmem [resolvable:$true] %s55_s18 }
   0xb   :  { %61 = dma.hbm_to_vmem [thread:$0]  %s54_s16, 512, %s56_s18, [#allocation6], %s3814_s19, %s3814_s19, %s3815_s3  }
   0xc   :  { %3801 = dma.done.wait [#allocation3], 5120  }
   0xd   :  { %3802 = vsyncadd [#allocation3], 4294962176 }
   0xe   :  { %3803 = dma.done.wait [#allocation6], 20992  }
   0xf   :  { %3804 = vsyncadd [#allocation6], 4294946304  ;;  %v3816_v0 = vmov 0   ;;  %v81_v1 = vld [vmem:[%s4156_s0] sm:$0xff]  ;;  %v3433_v2 = vld [vmem:[#allocation2 + $0x38] sm:$0xff]  ;;  %v76_v17 = vlaneseq  ;;  %s3820_s28 = smov [#allocation8]  }
  0x10   :  { %3640 = vset.pattern.permute.xlu0 %v3816_v0  ;;  %v3441_v3 = vld [vmem:[#allocation2 + $0x78] sm:$0xff]  ;;  %v83_v4 = vcvt.s32.f32 %v81_v1  ;;  %261 = vmatpush.bf16.msra.mxu0 %v3433_v2  ;;  %v3432_v5 = vld [vmem:[#allocation2 + $0x30] sm:$0xff]  ;;  %v82_v7 = vld [vmem:[%s4156_s0 + $0x8] sm:$0xff]  ;;  %v3817_v44 = vmov 1.0|1.0   ;;  %v3818_v2 = vmov 0.0  }
  0x11   :  { %275 = vmatpush.bf16.msra.mxu1 %v3441_v3  ;;  %v3440_v6 = vld [vmem:[#allocation2 + $0x70] sm:$0xff]  ;;  %v3431_v8 = vld [vmem:[#allocation2 + $0x28] sm:$0xff]  ;;  %v84_v10 = vcvt.s32.f32 %v82_v7  ;;  %v3430_v11 = vld [vmem:[#allocation2 + $0x20] sm:$0xff]  ;;  %v89_v20 = vshrl.u32 %v76_v17, 7  ;;  %v77_v33 = vand.u32 127, %v76_v17  ;;  %s2604_s29 = sshll.u32 %s3820_s28, 4  ;;  %s2605_s29 = int_to_ptr.vmem [resolvable:$true] %s2604_s29 }
  0x12   :  { %105 = vperm.xlu0 %3640, %v83_v4   ;;  %v3439_v9 = vld [vmem:[#allocation2 + $0x68] sm:$0xff]  ;;  %v3438_v12 = vld [vmem:[#allocation2 + $0x60] sm:$0xff]  ;;  %v3429_v13 = vld [vmem:[#allocation2 + $0x18] sm:$0xff]  ;;  %s2606_s9 = sshll.u32 %s4163_s7, 4  ;;  %s2607_s9 = int_to_ptr.hbm [resolvable:$true] %s2606_s9 }
  0x13   :  { %v3437_v14 = vld [vmem:[#allocation2 + $0x58] sm:$0xff]  ;;  %v3428_v15 = vld [vmem:[#allocation2 + $0x10] sm:$0xff]  ;;  %v3427_v18 = vld [vmem:[#allocation2 + $0x8] sm:$0xff]  ;;  %v90_v21 = vadd.s32 8, %v89_v20  ;;  %v91_v24 = vcvt.s32.f32 %v89_v20  ;;  %v85_v36 = vadd.s32 128, %v77_v33  ;;  %v3887_v39 = vcvt.s32.f32 %v77_v33 }
  0x14   :  { %262 = vmatpush.bf16.msra.mxu0 %v3432_v5  ;;  %v3436_v16 = vld [vmem:[#allocation2 + $0x50] sm:$0xff]  ;;  %v3435_v19 = vld [vmem:[#allocation2 + $0x48] sm:$0xff]  ;;  %v3426_v22 = vld [vmem:[#allocation2] sm:$0xff]  ;;  %vm78_vm14 = vcmp.lt.s32.totalorder %v77_v33, 32 }
  0x15   :  { %276 = vmatpush.bf16.msra.mxu1 %v3440_v6  ;;  %v3434_v23 = vld [vmem:[#allocation2 + $0x40] sm:$0xff]  ;;  %v92_v25 = vcvt.s32.f32 %v90_v21  ;;  %v93_v26 = vadd.f32 0.5, %v91_v24  ;;  %v87_v41 = vcvt.s32.f32 %v85_v36  ;;  %v2856_v51 = vld [vmem:[#allocation5 + $0x230] sm:$0xf]  ;;  %v3487_v52 = vld [vmem:[#allocation5 + $0x254] sm:$0xf0] }
  0x16   :  { %v3484_v53 = vld [vmem:[#allocation5 + $0x234] sm:$0xf]  ;;  %v2857_v54 = vor.u32 %v3487_v52, %v2856_v51  ;;  %v2858_v55 = vld [vmem:[#allocation5 + $0x258] sm:$0xf0]  ;;  %v2832_v56 = vld [vmem:[#allocation5 + $0x1e0] sm:$0xf] }
  0x17   :  { %v94_v27 = vadd.f32 0.5, %v92_v25  ;;  %v3877_v28 = vmul.f32 0.125, %v93_v26  ;;  %v3481_v57 = vld [vmem:[#allocation5 + $0x204] sm:$0xf0]  ;;  %v2861_v58 = vor.u32 %v3484_v53, %v2858_v55  ;;  %v3478_v59 = vld [vmem:[#allocation5 + $0x1e4] sm:$0xf] }
  0x18   :  { %263 = vmatpush.bf16.msra.mxu0 %v3431_v8  ;;  %v2834_v60 = vld [vmem:[#allocation5 + $0x208] sm:$0xf0]  ;;  %642 = vmatpush.bf16.msra.mxu2 %v2857_v54  ;;  %v2833_v61 = vor.u32 %v3481_v57, %v2832_v56  ;;  %v3893_v3 = vsel %vm78_vm14, 1.0, %v3818_v2  ;;  %v3466_v20 = vld [vmem:[#allocation5 + $0x144] sm:$0xf] }
  0x19   :  { %277 = vmatpush.bf16.msra.mxu1 %v3439_v9  ;;  %v3879_v29 = vmul.f32 0.125, %v94_v27  ;;  %v97_v30 = vfloor.f32 %v3877_v28  ;;  %656 = vmatpush.bf16.msra.mxu3 %v2861_v58  ;;  %v2837_v62 = vor.u32 %v3478_v59, %v2834_v60  ;;  %v3485_v27 = vld [vmem:[#allocation5 + $0x23c] sm:$0xf]  ;;  %v3460_v36 = vld [vmem:[#allocation5 + $0xf4] sm:$0xf] }
  0x1a   :  { %110 = vperm.xlu0 %3640, %v84_v10   ;;  %v2738_v51 = vld [vmem:[#allocation5 + $0xc8] sm:$0xf0]  ;;  %v2816_v52 = vld [vmem:[#allocation5 + $0x198] sm:$0xf]  ;;  %v3476_v53 = vld [vmem:[#allocation5 + $0x1bc] sm:$0xf0] }
  0x1b   :  { %v98_v31 = vfloor.f32 %v3879_v29  ;;  %v99_v32 = vmul.f32 8.0, %v97_v30  ;;  %v2817_v55 = vor.u32 %v3476_v53, %v2816_v52  ;;  %v3473_v56 = vld [vmem:[#allocation5 + $0x19c] sm:$0xf]  ;;  %v2818_v57 = vld [vmem:[#allocation5 + $0x1c0] sm:$0xf0] }
  0x1c   :  { %264 = vmatpush.bf16.msra.mxu0 %v3430_v11  ;;  %643 = vmatpush.bf16.msra.mxu2 %v2833_v61  ;;  %v2821_v58 = vor.u32 %v3473_v56, %v2818_v57  ;;  %v2712_v59 = vld [vmem:[#allocation5 + $0x50] sm:$0xf]  ;;  %v3451_v60 = vld [vmem:[#allocation5 + $0x74] sm:$0xf0]  ;;  %v3448_v61 = vld [vmem:[#allocation5 + $0x54] sm:$0xf] }
  0x1d   :  { %278 = vmatpush.bf16.msra.mxu1 %v3438_v12  ;;  %v100_v34 = vmul.f32 8.0, %v98_v31  ;;  %v101_v35 = vsub.f32 %v91_v24, %v99_v32  ;;  %657 = vmatpush.bf16.msra.mxu3 %v2837_v62  ;;  %v2808_v12 = vld [vmem:[#allocation5 + $0x190] sm:$0xf]  ;;  %v3488_v24 = vld [vmem:[#allocation5 + $0x25c] sm:$0xf0]  ;;  %v2713_v62 = vor.u32 %v3451_v60, %v2712_v59 }
  0x1e   :  { %v2866_v32 = vld [vmem:[#allocation5 + $0x260] sm:$0xf0]  ;;  %v3470_v2 = vld [vmem:[#allocation5 + $0x16c] sm:$0xf0]  ;;  %v3477_v52 = vld [vmem:[#allocation5 + $0x1c4] sm:$0xf0] }
  0x1f   :  { %v102_v37 = vsub.f32 %v92_v25, %v100_v34  ;;  %v117_v40 = vadd.f32 128.0, %v101_v35  ;;  %v2869_v33 = vor.u32 %v3485_v27, %v2866_v32  ;;  %v2760_v34 = vld [vmem:[#allocation5 + $0xf0] sm:$0xf]  ;;  %v3463_v35 = vld [vmem:[#allocation5 + $0x114] sm:$0xf0] }
  0x20   :  { %265 = vmatpush.bf16.msra.mxu0 %v3429_v13  ;;  %v3475_v13 = vld [vmem:[#allocation5 + $0x1b4] sm:$0xf0]  ;;  %v2874_v27 = vld [vmem:[#allocation5 + $0x268] sm:$0xf0]  ;;  %v2696_v60 = vld [vmem:[#allocation5 + $0x8] sm:$0xf] }
  0x21   :  { %279 = vmatpush.bf16.msra.mxu1 %v3437_v14  ;;  %v118_v42 = vadd.f32 128.0, %v102_v37  ;;  %vm119_vm1 = vcmp.eq.f32.partialorder %v3887_v39, %v117_v40  ;;  %vm120_vm3 = vcmp.eq.f32.partialorder %v87_v41, %v117_v40  ;;  %v2809_v14 = vor.u32 %v3475_v13, %v2808_v12  ;;  %v2840_v40 = vld [vmem:[#allocation5 + $0x1e8] sm:$0xf]  ;;  %v3442_v13 = vld [vmem:[#allocation5 + $0x4] sm:$0xf] }
  0x22   :  { %v2761_v37 = vor.u32 %v3463_v35, %v2760_v34  ;;  %v3445_v12 = vld [vmem:[#allocation5 + $0x24] sm:$0xf0]  ;;  %v3458_v34 = vld [vmem:[#allocation5 + $0xcc] sm:$0xf0]  ;;  %v2826_v56 = vld [vmem:[#allocation5 + $0x1c8] sm:$0xf0] }
  0x23   :  { %vm121_vm4 = vcmp.eq.f32.partialorder %v3887_v39, %v118_v42  ;;  %vm122_vm8 = vcmp.eq.f32.partialorder %v87_v41, %v118_v42  ;;  %644 = vmatpush.bf16.msra.mxu2 %v2809_v14 }
  0x24   :  { %266 = vmatpush.bf16.msra.mxu0 %v3428_v15  ;;  %v3472_v15 = vld [vmem:[#allocation5 + $0x194] sm:$0xf] }
  0x25   :  { %280 = vmatpush.bf16.msra.mxu1 %v3436_v16  ;;  %v2810_v16 = vld [vmem:[#allocation5 + $0x1b8] sm:$0xf0] }
  0x26   :  { %v2813_v17 = vor.u32 %v3472_v15, %v2810_v16  ;;  %v2690_v15 = vld [vmem:[#allocation5 + $0x28] sm:$0xf0]  ;;  %v2768_v16 = vld [vmem:[#allocation5 + $0xf8] sm:$0xf] }
  0x28   :  { %267 = vmatpush.bf16.msra.mxu0 %v3427_v18  ;;  %658 = vmatpush.bf16.msra.mxu3 %v2813_v17  ;;  %v2784_v18 = vld [vmem:[#allocation5 + $0x140] sm:$0xf] }
  0x29   :  { %281 = vmatpush.bf16.msra.mxu1 %v3435_v19  ;;  %v3469_v19 = vld [vmem:[#allocation5 + $0x164] sm:$0xf0]  ;;  %v3464_v17 = vld [vmem:[#allocation5 + $0x11c] sm:$0xf0] }
  0x2a   :  { %v2785_v21 = vor.u32 %v3469_v19, %v2784_v18  ;;  %v2693_v18 = vor.u32 %v3442_v13, %v2690_v15  ;;  %v2769_v19 = vor.u32 %v3464_v17, %v2768_v16  ;;  %v2776_v13 = vld [vmem:[#allocation5 + $0x100] sm:$0xf]  ;;  %v3462_v15 = vld [vmem:[#allocation5 + $0x104] sm:$0xf]  ;;  %v2778_v17 = vld [vmem:[#allocation5 + $0x128] sm:$0xf0] }
  0x2c   :  { %268 = vmatpush.bf16.msra.mxu0 %v3426_v22  ;;  %v2786_v22 = vld [vmem:[#allocation5 + $0x168] sm:$0xf0]  ;;  %645 = vmatpush.bf16.msra.mxu2 %v2785_v21  ;;  %v2770_v21 = vld [vmem:[#allocation5 + $0x120] sm:$0xf0] }
  0x2d   :  { %282 = vmatpush.bf16.msra.mxu1 %v3434_v23  ;;  %v2864_v23 = vld [vmem:[#allocation5 + $0x238] sm:$0xf]  ;;  %v2789_v25 = vor.u32 %v3466_v20, %v2786_v22  ;;  %v3461_v20 = vld [vmem:[#allocation5 + $0xfc] sm:$0xf]  ;;  %v2872_v22 = vld [vmem:[#allocation5 + $0x240] sm:$0xf] }
  0x2e   :  { %v2865_v26 = vor.u32 %v3488_v24, %v2864_v23  ;;  %v2773_v23 = vor.u32 %v3461_v20, %v2770_v21  ;;  %v3489_v24 = vld [vmem:[#allocation5 + $0x264] sm:$0xf0]  ;;  %v2752_v20 = vld [vmem:[#allocation5 + $0xb0] sm:$0xf]  ;;  %v3459_v21 = vld [vmem:[#allocation5 + $0xd4] sm:$0xf0] }
  0x2f   :  { %659 = vmatpush.bf16.msra.mxu3 %v2789_v25  ;;  %v3486_v25 = vld [vmem:[#allocation5 + $0x244] sm:$0xf] }
  0x30   :  { %670 = vmatpush.bf16.msrb.mxu0 %v2865_v26  ;;  %646 = vmatpush.bf16.msra.mxu2 %v2761_v37  ;;  %v2873_v26 = vor.u32 %v3489_v24, %v2872_v22  ;;  %v2877_v32 = vor.u32 %v3486_v25, %v2874_v27  ;;  %v2746_v37 = vld [vmem:[#allocation5 + $0xd0] sm:$0xf0]  ;;  %v2754_v24 = vld [vmem:[#allocation5 + $0xd8] sm:$0xf0]  ;;  %v2753_v25 = vor.u32 %v3459_v21, %v2752_v20 }
  0x31   :  { %684 = vmatpush.bf16.msrb.mxu1 %v2869_v33  ;;  %v2744_v33 = vld [vmem:[#allocation5 + $0xa8] sm:$0xf]  ;;  %v3456_v22 = vld [vmem:[#allocation5 + $0xb4] sm:$0xf] }
  0x32   :  { %v2745_v35 = vor.u32 %v3458_v34, %v2744_v33  ;;  %v2728_v33 = vld [vmem:[#allocation5 + $0x60] sm:$0xf]  ;;  %v3453_v34 = vld [vmem:[#allocation5 + $0x84] sm:$0xf0] }
  0x84   :  { %v106_v38 = vpop.permute.xlu0 %105 }
  0x85   :  { %vm113_vm0 = vcmp.eq.f32.partialorder %v3887_v39, %v106_v38  ;;  %vm114_vm2 = vcmp.eq.f32.partialorder %v87_v41, %v106_v38  ;;  %v2762_v38 = vld [vmem:[#allocation5 + $0x118] sm:$0xf0] }
  0x86   :  { %vm123_vm5 = vmor %vm113_vm0, %vm119_vm1  ;;  %v2765_v42 = vor.u32 %v3460_v36, %v2762_v38  ;;  %v3455_v36 = vld [vmem:[#allocation5 + $0xac] sm:$0xf]  ;;  %v2848_v38 = vld [vmem:[#allocation5 + $0x1f0] sm:$0xf] }
  0x87   :  { %vm124_vm9 = vmor %vm114_vm2, %vm120_vm3 }
  0x88   :  { %660 = vmatpush.bf16.msra.mxu3 %v2765_v42  ;;  %v3480_v42 = vld [vmem:[#allocation5 + $0x1f4] sm:$0xf] }
  0x8c   :  { %v111_v43 = vpop.permute.xlu0 %110 }
  0x8d   :  { %vm115_vm6 = vcmp.eq.f32.partialorder %v3887_v39, %v111_v43  ;;  %vm116_vm7 = vcmp.eq.f32.partialorder %v87_v41, %v111_v43  ;;  %v3482_v41 = vld [vmem:[#allocation5 + $0x20c] sm:$0xf0] }
  0x8e   :  { %vm125_vm10 = vmor %vm115_vm6, %vm121_vm4  ;;  %v2841_v43 = vor.u32 %v3482_v41, %v2840_v40  ;;  %v2749_v40 = vor.u32 %v3455_v36, %v2746_v37  ;;  %v3483_v41 = vld [vmem:[#allocation5 + $0x214] sm:$0xf0]  ;;  %v3450_v36 = vld [vmem:[#allocation5 + $0x64] sm:$0xf] }
  0x8f   :  { %vm2682_vm11 = vmpackc.low %vm125_vm10, %vm123_vm5  ;;  %v2730_v37 = vld [vmem:[#allocation5 + $0x88] sm:$0xf0] }
  0x90   :  { %2683 = vmatmul.msk.bf16.vlgmr.msra.gmra.mxu0 %vm2682_vm11, %v3817_v44  ;;  %vm126_vm12 = vmor %vm116_vm7, %vm122_vm8 }
  0x91   :  { %vm2684_vm13 = vmpackc.low %vm126_vm12, %vm124_vm9  ;;  %671 = vmatpush.bf16.msrb.mxu0 %v2841_v43  ;;  %v2850_v43 = vld [vmem:[#allocation5 + $0x218] sm:$0xf0]  ;;  %vm751_vm9 = vcmask 130048  }
  0x92   :  { %2685 = vmatmul.msk.bf16.vlgmr.msra.gmra.mxu1 %vm2684_vm13, %v3817_v44  ;;  %v3479_v44 = vld [vmem:[#allocation5 + $0x1ec] sm:$0xf] }
  0x95   :  { %672 = vmatpush.bf16.msrb.mxu0 %v2817_v55  ;;  %v3474_v55 = vld [vmem:[#allocation5 + $0x1a4] sm:$0xf] }
 0x10d   :  { %v270_v45 = vpop.f32.mrf.mxu0 }
 0x10f   :  { %v284_v46 = vpop.f32.mrf.mxu1 }
 0x110   :  { %v285_v47 = vadd.f32 %v284_v46, %v270_v45  ;;  %v2842_v45 = vld [vmem:[#allocation5 + $0x210] sm:$0xf0] }
 0x111   :  { %v2845_v46 = vor.u32 %v3479_v44, %v2842_v45  ;;  %v2849_v44 = vor.u32 %v3483_v41, %v2848_v38  ;;  %v2853_v45 = vor.u32 %v3480_v42, %v2850_v43  ;;  %v2733_v41 = vor.u32 %v3450_v36, %v2730_v37  ;;  %v2704_v42 = vld [vmem:[#allocation5 + $0x10] sm:$0xf]  ;;  %v3447_v43 = vld [vmem:[#allocation5 + $0x34] sm:$0xf0] }
 0x112   :  { %289 = vadd.xlane.f32.xlu1 %v285_v47 }
 0x113   :  { %685 = vmatpush.bf16.msrb.mxu1 %v2845_v46  ;;  %v2720_v46 = vld [vmem:[#allocation5 + $0x58] sm:$0xf] }
 0x115   :  { %v272_v48 = vpop.f32.mrf.mxu0 }
 0x117   :  { %v286_v49 = vpop.f32.mrf.mxu1  ;;  %686 = vmatpush.bf16.msrb.mxu1 %v2821_v58  ;;  %v2829_v58 = vor.u32 %v3474_v55, %v2826_v56 }
 0x118   :  { %v287_v50 = vadd.f32 %v286_v49, %v272_v48  ;;  %v3457_v48 = vld [vmem:[#allocation5 + $0xc4] sm:$0xf0]  ;;  %v3454_v49 = vld [vmem:[#allocation5 + $0xa4] sm:$0xf] }
 0x119   :  { %v2741_v54 = vor.u32 %v3454_v49, %v2738_v51  ;;  %v2824_v51 = vld [vmem:[#allocation5 + $0x1a0] sm:$0xf] }
 0x11a   :  { %291 = vadd.xlane.f32.xlu1 %v287_v50 }
 0x11b   :  { %661 = vmatpush.bf16.msra.mxu3 %v2741_v54  ;;  %v2825_v54 = vor.u32 %v3477_v52, %v2824_v51 }
 0x185   :  { %v290_v63 = vpop.xlane.xlu1 %289 }
 0x186   :  { %v293_v1 = vmul.f32 0.03125, %v290_v63  ;;  %v2714_v63 = vld [vmem:[#allocation5 + $0x78] sm:$0xf0] }
 0x188   :  { %v295_v4 = vsub.f32 %v285_v47, %v293_v1  ;;  %v2736_v47 = vld [vmem:[#allocation5 + $0xa0] sm:$0xf]  ;;  %v2792_v1 = vld [vmem:[#allocation5 + $0x148] sm:$0xf] }
 0x18a   :  { %v3896_v5 = vmul.f32 %v3893_v3, %v295_v4  ;;  %v2717_v4 = vor.u32 %v3448_v61, %v2714_v63  ;;  %v3446_v61 = vld [vmem:[#allocation5 + $0x2c] sm:$0xf0]  ;;  %v3443_v63 = vld [vmem:[#allocation5 + $0xc] sm:$0xf] }
 0x18c   :  { %v299_v6 = vmul.f32 %v3896_v5, %v3896_v5  ;;  %662 = vmatpush.bf16.msra.mxu3 %v2717_v4 }
 0x18d   :  { %v292_v7 = vpop.xlane.xlu1 %291 }
 0x18e   :  { %v294_v8 = vmul.f32 0.03125, %v292_v7  ;;  %301 = vadd.xlane.f32.xlu2 %v299_v6  ;;  %v2793_v6 = vor.u32 %v3470_v2, %v2792_v1  ;;  %v3467_v7 = vld [vmem:[#allocation5 + $0x14c] sm:$0xf]  ;;  %v2698_v1 = vld [vmem:[#allocation5 + $0x30] sm:$0xf0] }
 0x18f   :  { %v2800_v2 = vld [vmem:[#allocation5 + $0x150] sm:$0xf] }
 0x190   :  { %v296_v9 = vsub.f32 %v287_v50, %v294_v8  ;;  %v2737_v50 = vor.u32 %v3457_v48, %v2736_v47  ;;  %v2794_v8 = vld [vmem:[#allocation5 + $0x170] sm:$0xf0]  ;;  %673 = vmatpush.bf16.msrb.mxu0 %v2793_v6  ;;  %663 = vmatpush.bf16.msra.mxu3 %v2693_v18  ;;  %v3452_v47 = vld [vmem:[#allocation5 + $0x7c] sm:$0xf0]  ;;  %v3449_v48 = vld [vmem:[#allocation5 + $0x5c] sm:$0xf]  ;;  %v2701_v6 = vor.u32 %v3443_v63, %v2698_v1 }
 0x191   :  { %v2721_v49 = vor.u32 %v3452_v47, %v2720_v46  ;;  %v2706_v46 = vld [vmem:[#allocation5 + $0x38] sm:$0xf0] }
 0x192   :  { %v3901_v10 = vmul.f32 %v3893_v3, %v296_v9  ;;  %647 = vmatpush.bf16.msra.mxu2 %v2737_v50  ;;  %v2797_v9 = vor.u32 %v3467_v7, %v2794_v8  ;;  %v2722_v50 = vld [vmem:[#allocation5 + $0x80] sm:$0xf0]  ;;  %v3471_v7 = vld [vmem:[#allocation5 + $0x174] sm:$0xf0]  ;;  %v3468_v8 = vld [vmem:[#allocation5 + $0x154] sm:$0xf] }
 0x193   :  { %v2725_v53 = vor.u32 %v3449_v48, %v2722_v50  ;;  %v2705_v48 = vor.u32 %v3447_v43, %v2704_v42 }
 0x194   :  { %v300_v11 = vmul.f32 %v3901_v10, %v3901_v10  ;;  %687 = vmatpush.bf16.msrb.mxu1 %v2797_v9  ;;  %674 = vmatpush.bf16.msrb.mxu0 %v2769_v19  ;;  %v2801_v9 = vor.u32 %v3471_v7, %v2800_v2  ;;  %v2781_v19 = vor.u32 %v3462_v15, %v2778_v17 }
 0x195   :  { %712 = vmatpush.bf16.msrb.mxu3 %v2877_v32  ;;  %v2757_v32 = vor.u32 %v3456_v22, %v2754_v24 }
 0x196   :  { %303 = vadd.xlane.f32.xlu2 %v300_v11  ;;  %648 = vmatpush.bf16.msra.mxu2 %v2713_v62  ;;  %v2688_v11 = vld [vmem:[#allocation5] sm:$0xf]  ;;  %v2697_v62 = vor.u32 %v3446_v61, %v2696_v60 }
 0x197   :  { %v2689_v14 = vor.u32 %v3445_v12, %v2688_v11  ;;  %v2802_v11 = vld [vmem:[#allocation5 + $0x178] sm:$0xf0] }
 0x198   :  { %688 = vmatpush.bf16.msrb.mxu1 %v2773_v23  ;;  %675 = vmatpush.bf16.msrb.mxu0 %v2745_v35  ;;  %v2805_v12 = vor.u32 %v3468_v8, %v2802_v11  ;;  %v352_v8 = vld [vmem:[#allocation7 + $0x8] sm:$0xff] }
 0x199   :  { %713 = vmatpush.bf16.msrb.mxu3 %v2853_v45  ;;  %v3444_v45 = vld [vmem:[#allocation5 + $0x14] sm:$0xf]  ;;  %v729_v15 = vperm.slane %v352_v8, 0 }
 0x19a   :  { %649 = vmatpush.bf16.msra.mxu2 %v2689_v14  ;;  %v3465_v14 = vld [vmem:[#allocation5 + $0x124] sm:$0xf0]  ;;  %v2709_v50 = vor.u32 %v3444_v45, %v2706_v46  ;;  %v836_v46 = vperm.slane %v352_v8, 2 }
 0x19b   :  { %v2777_v16 = vor.u32 %v3465_v14, %v2776_v13 }
 0x19c   :  { %689 = vmatpush.bf16.msrb.mxu1 %v2749_v40  ;;  %676 = vmatpush.bf16.msrb.mxu0 %v2721_v49  ;;  %v2729_v40 = vor.u32 %v3453_v34, %v2728_v33  ;;  %v839_v34 = vperm.slane %v352_v8, 3 }
 0x19d   :  { %714 = vmatpush.bf16.msrb.mxu3 %v2829_v58 }
 0x19e   :  { %698 = vmatpush.bf16.msrb.mxu2 %v2873_v26 }
 0x1a0   :  { %690 = vmatpush.bf16.msrb.mxu1 %v2725_v53  ;;  %677 = vmatpush.bf16.msrb.mxu0 %v2697_v62 }
 0x1a1   :  { %715 = vmatpush.bf16.msrb.mxu3 %v2805_v12 }
 0x1a2   :  { %699 = vmatpush.bf16.msrb.mxu2 %v2849_v44 }
 0x1a4   :  { %691 = vmatpush.bf16.msrb.mxu1 %v2701_v6 }
 0x1a5   :  { %716 = vmatpush.bf16.msrb.mxu3 %v2781_v19  ;;  %v3916_v19 = vld [vmem:[#allocation7] sm:$0xff] }
 0x1a6   :  { %700 = vmatpush.bf16.msrb.mxu2 %v2825_v54  ;;  %v75_v54 = vld [vmem:[%s4160_s4] sm:$0xff] }
 0x1a7   :  { %v334_v63 = vperm.slane %v75_v54, 1 }
 0x1a9   :  { %717 = vmatpush.bf16.msrb.mxu3 %v2757_v32 }
 0x1aa   :  { %701 = vmatpush.bf16.msrb.mxu2 %v2801_v9  ;;  %v732_v9 = vperm.slane %v352_v8, 1 }
 0x1ad   :  { %718 = vmatpush.bf16.msrb.mxu3 %v2733_v41 }
 0x1ae   :  { %702 = vmatpush.bf16.msrb.mxu2 %v2777_v16 }
 0x1b1   :  { %719 = vmatpush.bf16.msrb.mxu3 %v2709_v50  ;;  %v340_v50 = vld [vmem:[%s4157_s1] sm:$0x1] }
 0x1b2   :  { %703 = vmatpush.bf16.msrb.mxu2 %v2753_v25  ;;  %vm341_vm5 = vcmp.ne.s32.totalorder %v340_v50, 0  ;;  %v3503_v50 = vld [vmem:[#allocation5 + $0x1d0] sm:$0xf0] }
 0x1b6   :  { %704 = vmatpush.bf16.msrb.mxu2 %v2729_v40 }
 0x1ba   :  { %705 = vmatpush.bf16.msrb.mxu2 %v2705_v48 }
 0x201   :  { %v302_v57 = vpop.xlane.xlu2 %301 }
 0x202   :  { %v305_v59 = vmul.f32 0.03125, %v302_v57 }
 0x204   :  { %v307_v4 = vadd.f32 1e-12, %v305_v59  ;;  %v331_v59 = vperm.slane %v75_v54, 0 }
 0x206   :  { %3641 = vrsqrt.f32 %v307_v4  ;;  %vm315_vm0 = vweird.f32 %v307_v4 }
 0x209   :  { %v304_v18 = vpop.xlane.xlu2 %303 }
 0x20a   :  { %v306_v23 = vmul.f32 0.03125, %v304_v18 }
 0x20c   :  { %v3642_v26 = vpop.eup %3641  ;;  %v308_v27 = vadd.f32 1e-12, %v306_v23  ;;  %v726_v23 = vperm.slane %v3916_v19, 7 }
 0x20d   :  { %v310_v35 = vmul.f32 %v3642_v26, %v307_v4  ;;  %vm316_vm15 = vweird.f32 %v3642_v26 }
 0x20e   :  { %3643 = vrsqrt.f32 %v308_v27  ;;  %vm317_vm1 = vmor %vm315_vm0, %vm316_vm15  ;;  %vm325_vm3 = vweird.f32 %v308_v27 }
 0x20f   :  { %v311_v38 = vmul.f32 %v3642_v26, %v310_v35  ;;  %v842_v35 = vperm.slane %v352_v8, 4 }
 0x211   :  { %v312_v44 = vmul.f32 0.5, %v311_v38 }
 0x213   :  { %v313_v47 = vsub.f32 1.5, %v312_v44 }
 0x214   :  { %v3644_v49 = vpop.eup %3643 }
 0x215   :  { %v314_v51 = vmul.f32 %v3642_v26, %v313_v47  ;;  %v320_v52 = vmul.f32 %v3644_v49, %v308_v27  ;;  %vm326_vm2 = vweird.f32 %v3644_v49 }
 0x216   :  { %vm327_vm4 = vmor %vm325_vm3, %vm326_vm2 }
 0x217   :  { %v321_v53 = vmul.f32 %v3644_v49, %v320_v52  ;;  %v318_v55 = vsel %vm317_vm1, %v3642_v26, %v314_v51  ;;  %v337_v51 = vadd.f32 0.5, %v3887_v39 }
 0x218   :  { %v329_v58 = vmul.f32 %v318_v55, %v3896_v5 }
 0x219   :  { %v322_v56 = vmul.f32 0.5, %v321_v53  ;;  %v338_v52 = vmul.f32 0.125, %v337_v51  ;;  %v344_v53 = vsel %vm341_vm5, 1, %v3816_v0 }
 0x21a   :  { %v332_v62 = vmul.f32 %v331_v59, %v329_v58  ;;  %v345_v55 = vperm.slane %v344_v53, 0  ;;  %v3495_v53 = vld [vmem:[#allocation5 + $0x1cc] sm:$0xf0] }
 0x21b   :  { %v323_v57 = vsub.f32 1.5, %v322_v56  ;;  %v339_v54 = vfloor.f32 %v338_v52  ;;  %v2934_v52 = vld [vmem:[#allocation5 + $0x1a8] sm:$0xf] }
 0x21c   :  { %v3910_v4 = vadd.f32 %v334_v63, %v332_v62  ;;  %vm3926_vm7 = vcmp.eq.s32.totalorder %v345_v55, 1  ;;  %v2935_v56 = vor.u32 %v3495_v53, %v2934_v52 }
 0x21d   :  { %v324_v60 = vmul.f32 %v3644_v49, %v323_v57  ;;  %vm342_vm6 = vcmp.eq.f32.partialorder %v97_v30, %v339_v54  ;;  %v3819_v57 = vmov -1e+09   ;;  %vm343_vm10 = vcmp.eq.f32.partialorder %v98_v31, %v339_v54 }
 0x21e   :  { %vm347_vm8 = vmand %vm342_vm6, %vm3926_vm7 }
 0x21f   :  { %v328_v61 = vsel %vm327_vm4, %v3644_v49, %v324_v60  ;;  %v3932_v58 = vsel %vm347_vm8, 0.0, %v3819_v57  ;;  %vm348_vm11 = vmand %vm343_vm10, %vm3926_vm7 }
 0x220   :  { %v330_v1 = vmul.f32 %v328_v61, %v3901_v10  ;;  %v3942_v61 = vsel %vm348_vm11, 0.0, %v3819_v57  ;;  %v2898_v57 = vld [vmem:[#allocation5 + $0x15c] sm:$0xf] }
 0x222   :  { %v333_v2 = vmul.f32 %v331_v59, %v330_v1 }
 0x224   :  { %v3912_v6 = vadd.f32 %v334_v63, %v333_v2 }
 0x226   :  { %v353_v7 = vpack.c.bf16 %v3912_v6, %v3910_v4 }
 0x228   :  { %650 = vmatmul.bf16.vlgmr.msra.gmra.mxu2 %v353_v7  ;;  %664 = vmatmul.bf16.vlgmr.msra.gmra.mxu3 %v353_v7 }
 0x229   :  { %678 = vmatmul.bf16.vlgmr.msrb.gmra.mxu0 %v353_v7  ;;  %692 = vmatmul.bf16.vlgmr.msrb.gmra.mxu1 %v353_v7 }
 0x238   :  { %706 = vmatmul.bf16.vlgmr.msrb.gmra.mxu2 %v353_v7  ;;  %720 = vmatmul.bf16.vlgmr.msrb.gmra.mxu3 %v353_v7 }
 0x2a6   :  { %v679_v5 = vpop.f32.mrf.mxu0  ;;  %v693_v32 = vpop.f32.mrf.mxu1 }
 0x2a7   :  { %v733_v13 = vadd.f32 %v732_v9, %v679_v5  ;;  %v837_v48 = vadd.f32 %v836_v46, %v693_v32  ;;  %v2910_v32 = vld [vmem:[#allocation5 + $0x24c] sm:$0xf] }
 0x2ab   :  { %v651_v11 = vpop.f32.mrf.mxu2  ;;  %v665_v12 = vpop.f32.mrf.mxu3 }
 0x2ac   :  { %v730_v20 = vadd.f32 %v729_v15, %v665_v12  ;;  %v727_v25 = vadd.f32 %v726_v23, %v651_v11 }
 0x2ae   :  { %v681_v10 = vpop.f32.mrf.mxu0  ;;  %v695_v43 = vpop.f32.mrf.mxu1 }
 0x2af   :  { %v734_v14 = vadd.f32 %v732_v9, %v681_v10  ;;  %v838_v47 = vadd.f32 %v836_v46, %v695_v43  ;;  %v3496_v46 = vld [vmem:[#allocation5 + $0x21c] sm:$0xf0] }
 0x2b1   :  { %v801_v16 = vpack.c.bf16 %v734_v14, %v733_v13  ;;  %v845_v49 = vpack.c.bf16 %v838_v47, %v837_v48 }
 0x2b3   :  { %812 = vmatpush.bf16.msra.mxu1 %v801_v16  ;;  %v653_v17 = vpop.f32.mrf.mxu2  ;;  %v667_v18 = vpop.f32.mrf.mxu3 }
 0x2b4   :  { %v731_v21 = vadd.f32 %v729_v15, %v667_v18  ;;  %v728_v24 = vadd.f32 %v726_v23, %v653_v17 }
 0x2b6   :  { %v736_v22 = vpack.c.bf16 %v731_v21, %v730_v20  ;;  %v735_v33 = vpack.c.bf16 %v728_v24, %v727_v25 }
 0x2b8   :  { %744 = vmatpush.bf16.xpose.msra.mxu3 %v736_v22 }
 0x2bb   :  { %v707_v26 = vpop.f32.mrf.mxu2  ;;  %v721_v27 = vpop.f32.mrf.mxu3 }
 0x2bc   :  { %v840_v38 = vadd.f32 %v839_v34, %v707_v26  ;;  %v843_v40 = vadd.f32 %v842_v35, %v721_v27 }
 0x2bf   :  { %745 = vmatmul.bf16.vlgmr.msra.gmra.mxu3 %v735_v33  ;;  %v3505_v33 = vld [vmem:[#allocation5 + $0x270] sm:$0xf0] }
 0x2c3   :  { %v709_v36 = vpop.f32.mrf.mxu2  ;;  %v723_v37 = vpop.f32.mrf.mxu3 }
 0x2c4   :  { %v841_v41 = vadd.f32 %v839_v34, %v709_v36  ;;  %v844_v42 = vadd.f32 %v842_v35, %v723_v37  ;;  %v2942_v34 = vld [vmem:[#allocation5 + $0x248] sm:$0xf]  ;;  %v2911_v36 = vor.u32 %v3505_v33, %v2910_v32  ;;  %v3497_v37 = vld [vmem:[#allocation5 + $0x26c] sm:$0xf0] }
 0x2c6   :  { %v846_v44 = vpack.c.bf16 %v841_v41, %v840_v38  ;;  %v910_v45 = vpack.c.bf16 %v844_v42, %v843_v40  ;;  %v2906_v38 = vld [vmem:[#allocation5 + $0x1fc] sm:$0xf]  ;;  %v3504_v40 = vld [vmem:[#allocation5 + $0x220] sm:$0xf0]  ;;  %993 = vmatpush.bf16.msra.mxu0 %v2911_v36 }
 0x2c7   :  { %v2907_v47 = vor.u32 %v3504_v40, %v2906_v38 }
 0x2c8   :  { %854 = vmatpush.bf16.xpose.msra.mxu2 %v846_v44  ;;  %921 = vmatpush.bf16.msrb.mxu3 %v910_v45  ;;  %v2943_v44 = vor.u32 %v3497_v37, %v2942_v34  ;;  %v2938_v45 = vld [vmem:[#allocation5 + $0x1f8] sm:$0xf] }
 0x2c9   :  { %v2939_v51 = vor.u32 %v3496_v46, %v2938_v45 }
 0x2ca   :  { %1055 = vmatpush.bf16.msrb.mxu1 %v2943_v44  ;;  %994 = vmatpush.bf16.msra.mxu0 %v2907_v47 }
 0x2ce   :  { %1056 = vmatpush.bf16.msrb.mxu1 %v2939_v51 }
 0x2cf   :  { %855 = vmatmul.bf16.vlgmr.msra.gmra.mxu2 %v845_v49  ;;  %v2902_v49 = vld [vmem:[#allocation5 + $0x1ac] sm:$0xf] }
 0x2d0   :  { %v2903_v55 = vor.u32 %v3503_v50, %v2902_v49 }
 0x2d2   :  { %995 = vmatpush.bf16.msra.mxu0 %v2903_v55  ;;  %1057 = vmatpush.bf16.msrb.mxu1 %v2935_v56 }
 0x342   :  { %v746_v39 = vpop.f32.mrf.mxu3 }
 0x343   :  { %v747_v59 = vadd.f32 %v746_v39, %v3932_v58  ;;  %v3502_v39 = vld [vmem:[#allocation5 + $0x180] sm:$0xf0] }
 0x345   :  { %v752_v0 = vsel %vm751_vm9, %v747_v59, -inf }
 0x346   :  { %753 = vmax.xlane.f32.xlu2 %v752_v0 }
 0x34a   :  { %v748_v2 = vpop.f32.mrf.mxu3 }
 0x34b   :  { %v749_v7 = vadd.f32 %v748_v2, %v3942_v61 }
 0x34d   :  { %v755_v29 = vsel %vm751_vm9, %v749_v7, -inf }
 0x352   :  { %v856_v60 = vpop.f32.mrf.mxu2 }
 0x353   :  { %v857_v28 = vadd.f32 %v856_v60, %v3932_v58  ;;  %v2930_v60 = vld [vmem:[#allocation5 + $0x158] sm:$0xf] }
 0x355   :  { %v861_v30 = vsel %vm751_vm9, %v857_v28, -inf }
 0x356   :  { %862 = vmax.xlane.f32.xlu0 %v861_v30 }
 0x35a   :  { %v858_v62 = vpop.f32.mrf.mxu2 }
 0x35b   :  { %v859_v63 = vadd.f32 %v858_v62, %v3942_v61 }
 0x35d   :  { %v864_v1 = vsel %vm751_vm9, %v859_v63, -inf }
 0x35e   :  { %865 = vmax.xlane.f32.xlu1 %v864_v1 }
 0x366   :  { %756 = vmax.xlane.f32.xlu1 %v755_v29 }
 0x3b9   :  { %v754_v31 = vpop.xlane.xlu2 %753 }
 0x3ba   :  { %v758_v9 = vsub.f32 %v747_v59, %v754_v31  ;;  %v2899_v31 = vor.u32 %v3502_v39, %v2898_v57  ;;  %v2890_v57 = vld [vmem:[#allocation5 + $0xbc] sm:$0xf]  ;;  %v3500_v39 = vld [vmem:[#allocation5 + $0xe0] sm:$0xf0] }
 0x3bc   :  { %v760_v12 = vmul.f32 1.442695, %v758_v9  ;;  %v2894_v9 = vld [vmem:[#allocation5 + $0x10c] sm:$0xf]  ;;  %996 = vmatpush.bf16.msra.mxu0 %v2899_v31  ;;  %v2914_v31 = vld [vmem:[#allocation5 + $0x18] sm:$0xf] }
 0x3c9   :  { %v863_v5 = vpop.xlane.xlu0 %862 }
 0x3ca   :  { %v867_v8 = vsub.f32 %v857_v28, %v863_v5  ;;  %v3494_v28 = vld [vmem:[#allocation5 + $0x17c] sm:$0xf0] }
 0x3cc   :  { %v869_v11 = vmul.f32 1.442695, %v867_v8  ;;  %v2931_v8 = vor.u32 %v3494_v28, %v2930_v60  ;;  %v3492_v60 = vld [vmem:[#allocation5 + $0xdc] sm:$0xf0] }
 0x3ce   :  { %3645 = vpow2.f32 %v869_v11  ;;  %v3501_v11 = vld [vmem:[#allocation5 + $0x130] sm:$0xf0]  ;;  %1058 = vmatpush.bf16.msrb.mxu1 %v2931_v8 }
 0x3cf   :  { %3647 = vpow2.f32 %v760_v12 }
 0x3d1   :  { %v866_v10 = vpop.xlane.xlu1 %865 }
 0x3d2   :  { %v868_v13 = vsub.f32 %v859_v63, %v866_v10 }
 0x3d4   :  { %v3948_v14 = vpop.eup %3645  ;;  %v871_v15 = vmul.f32 1.442695, %v868_v13 }
 0x3d5   :  { %v873_v16 = vsel %vm751_vm9, %v3948_v14, 0.0  ;;  %v3952_v18 = vpop.eup %3647 }
 0x3d6   :  { %3649 = vpow2.f32 %v871_v15  ;;  %874 = vadd.xlane.f32.xlu2 %v873_v16  ;;  %v764_v24 = vsel %vm751_vm9, %v3952_v18, 0.0  ;;  %v2926_v15 = vld [vmem:[#allocation5 + $0x108] sm:$0xf]  ;;  %v3493_v16 = vld [vmem:[#allocation5 + $0x12c] sm:$0xf0] }
 0x3d9   :  { %v757_v17 = vpop.xlane.xlu1 %756 }
 0x3da   :  { %v759_v20 = vsub.f32 %v749_v7, %v757_v17 }
 0x3dc   :  { %v3954_v21 = vpop.eup %3649  ;;  %v762_v22 = vmul.f32 1.442695, %v759_v20 }
 0x3dd   :  { %v876_v23 = vsel %vm751_vm9, %v3954_v21, 0.0 }
 0x3de   :  { %3651 = vpow2.f32 %v762_v22  ;;  %877 = vadd.xlane.f32.xlu1 %v876_v23  ;;  %765 = vadd.xlane.f32.xlu2 %v764_v24  ;;  %v2895_v24 = vor.u32 %v3501_v11, %v2894_v9 }
 0x3e0   :  { %997 = vmatpush.bf16.msra.mxu0 %v2895_v24 }
 0x3e4   :  { %v3960_v25 = vpop.eup %3651 }
 0x3e5   :  { %v767_v26 = vsel %vm751_vm9, %v3960_v25, 0.0 }
 0x3e6   :  { %768 = vadd.xlane.f32.xlu1 %v767_v26 }
 0x449   :  { %v3964_v27 = vpop.xlane.xlu2 %874 }
 0x44a   :  { %3653 = vrcp.f32 %v3964_v27  ;;  %v888_v0 = vand.u32 2147483647, %v3964_v27  ;;  %v890_v63 = vand.u32 2147483648, %v3964_v27  ;;  %vm884_vm13 = vweird.f32 %v3964_v27 }
 0x44c   :  { %v891_v22 = vor.u32 1.1754944e-38, %v890_v63  ;;  %vm889_vm0 = vcmp.eq.f32.partialorder %v888_v0, 8.507059e+37  ;;  %v2922_v0 = vld [vmem:[#allocation5 + $0xb8] sm:$0xf]  ;;  %v2918_v63 = vld [vmem:[#allocation5 + $0x68] sm:$0xf] }
 0x44d   :  { %v2923_v28 = vor.u32 %v3492_v60, %v2922_v0  ;;  %v2950_v0 = vld [vmem:[#allocation5 + $0x70] sm:$0xf]  ;;  %v3507_v60 = vld [vmem:[#allocation5 + $0x94] sm:$0xf0] }
 0x450   :  { %v3967_v35 = vpop.eup %3653 }
 0x451   :  { %v880_v41 = vmul.f32 %v3967_v35, %v3964_v27  ;;  %v3971_v42 = vpop.xlane.xlu1 %877  ;;  %v3973_v43 = vpop.xlane.xlu2 %765  ;;  %vm885_vm12 = vweird.f32 %v3967_v35  ;;  %v2927_v27 = vor.u32 %v3493_v16, %v2926_v15 }
 0x452   :  { %3655 = vrcp.f32 %v3971_v42  ;;  %v903_v7 = vand.u32 2147483647, %v3971_v42  ;;  %vm3994_vm14 = vmor %vm884_vm13, %vm885_vm12  ;;  %v905_v10 = vand.u32 2147483648, %v3971_v42  ;;  %vm899_vm1 = vweird.f32 %v3971_v42 }
 0x453   :  { %v881_v48 = vsub.f32 1.0, %v880_v41  ;;  %3657 = vrcp.f32 %v3973_v43  ;;  %vm775_vm5 = vweird.f32 %v3973_v43  ;;  %v781_v40 = vand.u32 2147483648, %v3973_v43  ;;  %1059 = vmatpush.bf16.msrb.mxu1 %v2927_v27 }
 0x454   :  { %vm904_vm3 = vcmp.eq.f32.partialorder %v903_v7, 8.507059e+37  ;;  %v906_v34 = vor.u32 1.1754944e-38, %v905_v10  ;;  %v779_v44 = vand.u32 2147483647, %v3973_v43 }
 0x455   :  { %v882_v54 = vmul.f32 %v3967_v35, %v881_v48  ;;  %v782_v51 = vor.u32 1.1754944e-38, %v781_v40 }
 0x456   :  { %vm780_vm8 = vcmp.eq.f32.partialorder %v779_v44, 8.507059e+37 }
 0x457   :  { %v883_v62 = vadd.f32 %v3967_v35, %v882_v54  ;;  %1060 = vmatpush.bf16.msrb.mxu1 %v2923_v28  ;;  %v2946_v28 = vld [vmem:[#allocation5 + $0x20] sm:$0xf] }
 0x458   :  { %v3656_v59 = vpop.eup %3655 }
 0x459   :  { %v3979_v30 = vpop.eup %3657  ;;  %v895_v1 = vmul.f32 %v3656_v59, %v3971_v42  ;;  %v3985_v2 = vpop.xlane.xlu1 %768  ;;  %v887_v17 = vsel %vm3994_vm14, %v3967_v35, %v883_v62  ;;  %vm900_vm15 = vweird.f32 %v3656_v59  ;;  %v3499_v62 = vld [vmem:[#allocation5 + $0x90] sm:$0xf0] }
 0x45a   :  { %v771_v29 = vmul.f32 %v3979_v30, %v3973_v43  ;;  %3659 = vrcp.f32 %v3985_v2  ;;  %v892_v33 = vsel %vm889_vm0, %v891_v22, %v887_v17  ;;  %vm901_vm2 = vmor %vm899_vm1, %vm900_vm15  ;;  %vm776_vm4 = vweird.f32 %v3979_v30 }
 0x45b   :  { %v896_v5 = vsub.f32 1.0, %v895_v1  ;;  %v893_v41 = vmul.f32 %v3948_v14, %v892_v33  ;;  %vm777_vm6 = vmor %vm775_vm5, %vm776_vm4  ;;  %v794_v46 = vand.u32 2147483647, %v3985_v2  ;;  %v796_v47 = vand.u32 2147483648, %v3985_v2 }
 0x45c   :  { %v772_v13 = vsub.f32 1.0, %v771_v29  ;;  %vm790_vm10 = vweird.f32 %v3985_v2  ;;  %v1071_v22 = vperm.slane %v3916_v19, 0 }
 0x45d   :  { %v897_v20 = vmul.f32 %v3656_v59, %v896_v5  ;;  %vm795_vm12 = vcmp.eq.f32.partialorder %v794_v46, 8.507059e+37  ;;  %v3490_v5 = vld [vmem:[#allocation5 + $0x3c] sm:$0xf0]  ;;  %v3513_v46 = vld [vmem:[#allocation5 + $0x274] sm:$0xf0] }
 0x45e   :  { %v773_v23 = vmul.f32 %v3979_v30, %v772_v13  ;;  %v2915_v8 = vor.u32 %v3490_v5, %v2914_v31 }
 0x45f   :  { %v898_v26 = vadd.f32 %v3656_v59, %v897_v20 }
 0x460   :  { %v3660_v32 = vpop.eup %3659  ;;  %v774_v35 = vadd.f32 %v3979_v30, %v773_v23 }
 0x461   :  { %v902_v36 = vsel %vm901_vm2, %v3656_v59, %v898_v26  ;;  %v786_v37 = vmul.f32 %v3660_v32, %v3985_v2  ;;  %vm791_vm7 = vweird.f32 %v3660_v32  ;;  %v2891_v59 = vor.u32 %v3500_v39, %v2890_v57  ;;  %v3491_v2 = vld [vmem:[#allocation5 + $0x8c] sm:$0xf0]  ;;  %v2954_v57 = vld [vmem:[#allocation5 + $0xc0] sm:$0xf]  ;;  %v3508_v39 = vld [vmem:[#allocation5 + $0xe4] sm:$0xf0] }
 0x462   :  { %v907_v38 = vsel %vm904_vm3, %v906_v34, %v902_v36  ;;  %v778_v48 = vsel %vm777_vm6, %v3979_v30, %v774_v35  ;;  %vm792_vm11 = vmor %vm790_vm10, %vm791_vm7  ;;  %v2886_v30 = vld [vmem:[#allocation5 + $0x6c] sm:$0xf]  ;;  %v2919_v7 = vor.u32 %v3491_v2, %v2918_v63  ;;  %v3506_v63 = vld [vmem:[#allocation5 + $0x44] sm:$0xf0] }
 0x463   :  { %v908_v42 = vmul.f32 %v3954_v21, %v907_v38  ;;  %v787_v45 = vsub.f32 1.0, %v786_v37  ;;  %v783_v14 = vsel %vm780_vm8, %v782_v51, %v778_v48  ;;  %v797_v21 = vor.u32 1.1754944e-38, %v796_v47  ;;  %998 = vmatpush.bf16.msra.mxu0 %v2891_v59  ;;  %v2970_v48 = vld [vmem:[#allocation5 + $0x200] sm:$0xf]  ;;  %v2966_v51 = vld [vmem:[#allocation5 + $0x1b0] sm:$0xf] }
 0x464   :  { %v784_v54 = vmul.f32 %v3952_v18, %v783_v14  ;;  %v2887_v1 = vor.u32 %v3499_v62, %v2886_v30  ;;  %v2882_v18 = vld [vmem:[#allocation5 + $0x1c] sm:$0xf]  ;;  %1061 = vmatpush.bf16.msrb.mxu1 %v2919_v7  ;;  %v2955_v59 = vor.u32 %v3508_v39, %v2954_v57  ;;  %v2951_v62 = vor.u32 %v3507_v60, %v2950_v0  ;;  %v2978_v39 = vld [vmem:[#allocation5 + $0x24] sm:$0xf] }
 0x465   :  { %v788_v49 = vmul.f32 %v3660_v32, %v787_v45  ;;  %v909_v50 = vpack.c.bf16 %v908_v42, %v893_v41  ;;  %v2974_v45 = vld [vmem:[#allocation5 + $0x250] sm:$0xf]  ;;  %v2947_v2 = vor.u32 %v3506_v63, %v2946_v28 }
 0x466   :  { %v2975_v47 = vor.u32 %v3513_v46, %v2974_v45  ;;  %v3519_v45 = vld [vmem:[#allocation5 + $0x1d8] sm:$0xf0] }
 0x467   :  { %v789_v52 = vadd.f32 %v3660_v32, %v788_v49  ;;  %2879 = vmatmul.msk.bf16.vlgmr.msrb.gmra.mxu3 %vm751_vm9, %v909_v50  ;;  %999 = vmatpush.bf16.msra.mxu0 %v2887_v1  ;;  %v3512_v49 = vld [vmem:[#allocation5 + $0x224] sm:$0xf0] }
 0x468   :  { %1062 = vmatpush.bf16.msrb.mxu1 %v2915_v8  ;;  %1188 = vmatpush.bf16.msrb.mxu2 %v2975_v47  ;;  %v2971_v50 = vor.u32 %v3512_v49, %v2970_v48  ;;  %v2994_v47 = vld [vmem:[#allocation5 + $0x164] sm:$0xf]  ;;  %v3518_v48 = vld [vmem:[#allocation5 + $0x188] sm:$0xf0] }
 0x469   :  { %v793_v43 = vsel %vm792_vm11, %v3660_v32, %v789_v52  ;;  %v3511_v52 = vld [vmem:[#allocation5 + $0x1d4] sm:$0xf0]  ;;  %v2995_v49 = vor.u32 %v3518_v48, %v2994_v47 }
 0x46a   :  { %v798_v53 = vsel %vm795_vm12, %v797_v21, %v793_v43  ;;  %v2967_v14 = vor.u32 %v3511_v52, %v2966_v51  ;;  %v2962_v21 = vld [vmem:[#allocation5 + $0x160] sm:$0xf]  ;;  %v3510_v43 = vld [vmem:[#allocation5 + $0x184] sm:$0xf0]  ;;  %v3517_v51 = vld [vmem:[#allocation5 + $0x138] sm:$0xf0] }
 0x46b   :  { %v799_v55 = vmul.f32 %v3960_v25, %v798_v53  ;;  %v3498_v25 = vld [vmem:[#allocation5 + $0x40] sm:$0xf0]  ;;  %v2963_v53 = vor.u32 %v3510_v43, %v2962_v21  ;;  %v3516_v21 = vld [vmem:[#allocation5 + $0xe8] sm:$0xf0] }
 0x46c   :  { %v2883_v29 = vor.u32 %v3498_v25, %v2882_v18  ;;  %1189 = vmatpush.bf16.msrb.mxu2 %v2971_v50  ;;  %v2990_v50 = vld [vmem:[#allocation5 + $0x114] sm:$0xf] }
 0x46d   :  { %v800_v56 = vpack.c.bf16 %v799_v55, %v784_v54  ;;  %v2958_v54 = vld [vmem:[#allocation5 + $0x110] sm:$0xf]  ;;  %v3509_v55 = vld [vmem:[#allocation5 + $0x134] sm:$0xf0]  ;;  %v2991_v52 = vor.u32 %v3517_v51, %v2990_v50 }
 0x46e   :  { %1000 = vmatpush.bf16.msra.mxu0 %v2883_v29 }
 0x46f   :  { %2878 = vmatmul.msk.bf16.vlgmr.msra.gmra.mxu1 %vm751_vm9, %v800_v56  ;;  %v2959_v56 = vor.u32 %v3509_v55, %v2958_v54  ;;  %v3515_v54 = vld [vmem:[#allocation5 + $0x98] sm:$0xf0]  ;;  %v1139_v55 = vperm.slane %v3916_v19, 3 }
 0x470   :  { %1190 = vmatpush.bf16.msrb.mxu2 %v2967_v14  ;;  %v2986_v14 = vld [vmem:[#allocation5 + $0xc4] sm:$0xf] }
 0x471   :  { %v2987_v43 = vor.u32 %v3516_v21, %v2986_v14  ;;  %v3130_v21 = vld [vmem:[#allocation5 + $0x410] sm:$0xf] }
 0x474   :  { %1191 = vmatpush.bf16.msrb.mxu2 %v2963_v53  ;;  %v2982_v53 = vld [vmem:[#allocation5 + $0x74] sm:$0xf] }
 0x478   :  { %1192 = vmatpush.bf16.msrb.mxu2 %v2959_v56  ;;  %v2983_v56 = vor.u32 %v3515_v54, %v2982_v53  ;;  %v3552_v53 = vld [vmem:[#allocation5 + $0x414] sm:$0xf] }
 0x47c   :  { %1193 = vmatpush.bf16.msrb.mxu2 %v2955_v59  ;;  %v3514_v59 = vld [vmem:[#allocation5 + $0x48] sm:$0xf0] }
 0x47d   :  { %v2979_v60 = vor.u32 %v3514_v59, %v2978_v39  ;;  %v3549_v39 = vld [vmem:[#allocation5 + $0x3e4] sm:$0xf0]  ;;  %v3546_v59 = vld [vmem:[#allocation5 + $0x3c4] sm:$0xf] }
 0x480   :  { %1194 = vmatpush.bf16.msrb.mxu2 %v2951_v62 }
 0x484   :  { %1195 = vmatpush.bf16.msrb.mxu2 %v2947_v2 }
 0x4ea   :  { %v923_v9 = vpop.f32.mrf.mxu3 }
 0x4ec   :  { %v814_v11 = vpop.f32.mrf.mxu1 }
 0x4f2   :  { %v925_v12 = vpop.f32.mrf.mxu3 }
 0x4f3   :  { %v928_v10 = vpack.c.bf16 %v925_v12, %v923_v9 }
 0x4f4   :  { %v816_v13 = vpop.f32.mrf.mxu1 }
 0x4f5   :  { %v819_v15 = vpack.c.bf16 %v816_v13, %v814_v11  ;;  %1001 = vmatmul.bf16.vlgmr.msra.gmra.mxu0 %v928_v10 }
 0x4f7   :  { %1063 = vmatmul.bf16.vlgmr.msrb.gmra.mxu1 %v819_v15 }
 0x572   :  { %v1002_v16 = vpop.f32.mrf.mxu0 }
 0x574   :  { %v1064_v17 = vpop.f32.mrf.mxu1 }
 0x575   :  { %v1065_v20 = vadd.f32 %v1064_v17, %v1002_v16 }
 0x577   :  { %v1069_v23 = vadd.f32 %v1065_v20, %v3910_v4 }
 0x579   :  { %v1072_v24 = vadd.f32 %v1071_v22, %v1069_v23  ;;  %v1116_v23 = vperm.slane %v3916_v19, 1 }
 0x57a   :  { %v1004_v26 = vpop.f32.mrf.mxu0 }
 0x57b   :  { %1074 = vadd.xlane.f32.xlu2 %v1072_v24 }
 0x57c   :  { %v1066_v27 = vpop.f32.mrf.mxu1 }
 0x57d   :  { %v1067_v32 = vadd.f32 %v1066_v27, %v1004_v26 }
 0x57f   :  { %v1070_v33 = vadd.f32 %v1067_v32, %v3912_v6 }
 0x581   :  { %v1073_v34 = vadd.f32 %v1071_v22, %v1070_v33  ;;  %v1119_v33 = vperm.slane %v3916_v19, 2 }
 0x583   :  { %1076 = vadd.xlane.f32.xlu1 %v1073_v34 }
 0x5ee   :  { %v1075_v36 = vpop.xlane.xlu2 %1074 }
 0x5ef   :  { %v1078_v35 = vmul.f32 0.03125, %v1075_v36 }
 0x5f1   :  { %v1080_v37 = vsub.f32 %v1072_v24, %v1078_v35 }
 0x5f3   :  { %v4024_v38 = vmul.f32 %v3893_v3, %v1080_v37 }
 0x5f5   :  { %v1084_v40 = vmul.f32 %v4024_v38, %v4024_v38 }
 0x5f6   :  { %v1077_v41 = vpop.xlane.xlu1 %1076 }
 0x5f7   :  { %v1079_v4 = vmul.f32 0.03125, %v1077_v41  ;;  %1086 = vadd.xlane.f32.xlu2 %v1084_v40  ;;  %v3521_v40 = vld [vmem:[#allocation5 + $0x278] sm:$0xf0] }
 0x5f9   :  { %v1081_v42 = vsub.f32 %v1073_v34, %v1079_v4  ;;  %v3002_v4 = vld [vmem:[#allocation5 + $0x204] sm:$0xf] }
 0x5fb   :  { %v4029_v44 = vmul.f32 %v3893_v3, %v1081_v42  ;;  %v3520_v42 = vld [vmem:[#allocation5 + $0x228] sm:$0xf0] }
 0x5fd   :  { %v1085_v6 = vmul.f32 %v4029_v44, %v4029_v44 }
 0x5ff   :  { %1088 = vadd.xlane.f32.xlu1 %v1085_v6  ;;  %v3003_v6 = vor.u32 %v3520_v42, %v3002_v4  ;;  %v3561_v4 = vld [vmem:[#allocation5 + $0x484] sm:$0xf0] }
 0x66a   :  { %v1087_v30 = vpop.xlane.xlu2 %1086 }
 0x66b   :  { %v1090_v1 = vmul.f32 0.03125, %v1087_v30 }
 0x66d   :  { %v1092_v7 = vadd.f32 1e-12, %v1090_v1 }
 0x66f   :  { %3661 = vrsqrt.f32 %v1092_v7  ;;  %vm1100_vm14 = vweird.f32 %v1092_v7 }
 0x672   :  { %v1089_v18 = vpop.xlane.xlu1 %1088 }
 0x673   :  { %v1091_v25 = vmul.f32 0.03125, %v1089_v18 }
 0x675   :  { %v3662_v29 = vpop.eup %3661  ;;  %v1093_v31 = vadd.f32 1e-12, %v1091_v25 }
 0x676   :  { %v1095_v5 = vmul.f32 %v3662_v29, %v1092_v7  ;;  %vm1101_vm13 = vweird.f32 %v3662_v29 }
 0x677   :  { %3663 = vrsqrt.f32 %v1093_v31  ;;  %vm1102_vm15 = vmor %vm1100_vm14, %vm1101_vm13  ;;  %vm1110_vm1 = vweird.f32 %v1093_v31 }
 0x678   :  { %v1096_v8 = vmul.f32 %v3662_v29, %v1095_v5 }
 0x67a   :  { %v1097_v9 = vmul.f32 0.5, %v1096_v8 }
 0x67c   :  { %v1098_v11 = vsub.f32 1.5, %v1097_v9 }
 0x67d   :  { %v3664_v12 = vpop.eup %3663 }
 0x67e   :  { %v1099_v10 = vmul.f32 %v3662_v29, %v1098_v11  ;;  %v1105_v13 = vmul.f32 %v3664_v12, %v1093_v31  ;;  %vm1111_vm0 = vweird.f32 %v3664_v12 }
 0x67f   :  { %vm1112_vm2 = vmor %vm1110_vm1, %vm1111_vm0 }
 0x680   :  { %v1106_v15 = vmul.f32 %v3664_v12, %v1105_v13  ;;  %v1103_v16 = vsel %vm1102_vm15, %v3662_v29, %v1099_v10 }
 0x681   :  { %v1114_v22 = vmul.f32 %v1103_v16, %v4024_v38  ;;  %v3006_v38 = vld [vmem:[#allocation5 + $0x254] sm:$0xf] }
 0x682   :  { %v1107_v17 = vmul.f32 0.5, %v1106_v15  ;;  %v3007_v41 = vor.u32 %v3521_v40, %v3006_v38  ;;  %v3180_v40 = vld [vmem:[#allocation5 + $0x4d8] sm:$0xf0] }
 0x683   :  { %v1117_v32 = vmul.f32 %v1116_v23, %v1114_v22 }
 0x684   :  { %v1108_v20 = vsub.f32 1.5, %v1107_v17  ;;  %1286 = vmatpush.bf16.msra.mxu3 %v3007_v41  ;;  %v3154_v41 = vld [vmem:[#allocation5 + $0x460] sm:$0xf] }
 0x685   :  { %v4037_v36 = vadd.f32 %v1119_v33, %v1117_v32 }
 0x686   :  { %v1109_v24 = vmul.f32 %v3664_v12, %v1108_v20  ;;  %v1237_v20 = vperm.slane %v3916_v19, 4  ;;  %v3156_v19 = vld [vmem:[#allocation5 + $0x488] sm:$0xf0] }
 0x688   :  { %v1113_v26 = vsel %vm1112_vm2, %v3664_v12, %v1109_v24  ;;  %1287 = vmatpush.bf16.msra.mxu3 %v3003_v6  ;;  %v3558_v6 = vld [vmem:[#allocation5 + $0x464] sm:$0xf] }
 0x689   :  { %v1115_v27 = vmul.f32 %v1113_v26, %v4029_v44  ;;  %v2998_v44 = vld [vmem:[#allocation5 + $0x1b4] sm:$0xf] }
 0x68a   :  { %v2999_v46 = vor.u32 %v3519_v45, %v2998_v44  ;;  %v3155_v44 = vor.u32 %v3561_v4, %v3154_v41  ;;  %v3528_v41 = vld [vmem:[#allocation5 + $0x2d4] sm:$0xf] }
 0x68b   :  { %v1118_v34 = vmul.f32 %v1116_v23, %v1115_v27 }
 0x68c   :  { %1288 = vmatpush.bf16.msra.mxu3 %v2999_v46 }
 0x68d   :  { %v4039_v35 = vadd.f32 %v1119_v33, %v1118_v34  ;;  %v3178_v33 = vld [vmem:[#allocation5 + $0x4b0] sm:$0xf]  ;;  %v3567_v34 = vld [vmem:[#allocation5 + $0x4d4] sm:$0xf0] }
 0x68e   :  { %v3179_v38 = vor.u32 %v3567_v34, %v3178_v33  ;;  %v3553_v33 = vld [vmem:[#allocation5 + $0x41c] sm:$0xf]  ;;  %v3140_v34 = vld [vmem:[#allocation5 + $0x440] sm:$0xf0] }
 0x68f   :  { %v1122_v37 = vpack.c.bf16 %v4039_v35, %v4037_v36 }
 0x690   :  { %1289 = vmatpush.bf16.msra.mxu3 %v2995_v49  ;;  %1643 = vmatpush.bf16.msrb.mxu0 %v3179_v38  ;;  %v3034_v38 = vld [vmem:[#allocation5 + $0x2d0] sm:$0xf] }
 0x691   :  { %1196 = vmatmul.bf16.vlgmr.msrb.gmra.mxu2 %v1122_v37  ;;  %v3564_v37 = vld [vmem:[#allocation5 + $0x4b4] sm:$0xf] }
 0x692   :  { %v3183_v42 = vor.u32 %v3564_v37, %v3180_v40  ;;  %v3143_v37 = vor.u32 %v3553_v33, %v3140_v34  ;;  %v3531_v40 = vld [vmem:[#allocation5 + $0x2f4] sm:$0xf0]  ;;  %v3018_v34 = vld [vmem:[#allocation5 + $0x288] sm:$0xf] }
 0x693   :  { %v3035_v4 = vor.u32 %v3531_v40, %v3034_v38  ;;  %v3523_v40 = vld [vmem:[#allocation5 + $0x28c] sm:$0xf] }
 0x694   :  { %1290 = vmatpush.bf16.msra.mxu3 %v2991_v52  ;;  %1657 = vmatpush.bf16.msra.mxu1 %v3183_v42  ;;  %v3036_v42 = vld [vmem:[#allocation5 + $0x2f8] sm:$0xf0] }
 0x695   :  { %1644 = vmatpush.bf16.msrb.mxu0 %v3155_v44  ;;  %v3039_v44 = vor.u32 %v3528_v41, %v3036_v42  ;;  %v3020_v41 = vld [vmem:[#allocation5 + $0x2b0] sm:$0xf0] }
 0x696   :  { %v3023_v42 = vor.u32 %v3523_v40, %v3020_v41 }
 0x698   :  { %1291 = vmatpush.bf16.msra.mxu3 %v2987_v43  ;;  %v3555_v43 = vld [vmem:[#allocation5 + $0x434] sm:$0xf0] }
 0x699   :  { %v3131_v54 = vor.u32 %v3555_v43, %v3130_v21  ;;  %v3090_v21 = vld [vmem:[#allocation5 + $0x378] sm:$0xf]  ;;  %v3544_v43 = vld [vmem:[#allocation5 + $0x39c] sm:$0xf0] }
 0x69b   :  { %1645 = vmatpush.bf16.msrb.mxu0 %v3131_v54  ;;  %v3091_v54 = vor.u32 %v3544_v43, %v3090_v21  ;;  %v3539_v21 = vld [vmem:[#allocation5 + $0x354] sm:$0xf0] }
 0x69c   :  { %1292 = vmatpush.bf16.msra.mxu3 %v2983_v56 }
 0x6a0   :  { %1293 = vmatpush.bf16.msra.mxu3 %v2979_v60  ;;  %v3108_v60 = vld [vmem:[#allocation5 + $0x3e8] sm:$0xf0] }
 0x714   :  { %v1197_v57 = vpop.f32.mrf.mxu2 }
 0x715   :  { %v1198_v0 = vadd.f32 %v1197_v57, %v1139_v55  ;;  %v3106_v57 = vld [vmem:[#allocation5 + $0x3c0] sm:$0xf] }
 0x717   :  { %v1202_v28 = vmul.f32 %v1198_v0, %v1198_v0 }
 0x719   :  { %v1204_v30 = vmul.f32 %v1202_v28, %v1198_v0  ;;  %v3186_v28 = vld [vmem:[#allocation5 + $0x4b8] sm:$0xf] }
 0x71b   :  { %v1206_v62 = vmul.f32 0.044715, %v1204_v30  ;;  %v3568_v30 = vld [vmem:[#allocation5 + $0x4dc] sm:$0xf0] }
 0x71c   :  { %v1199_v63 = vpop.f32.mrf.mxu2 }
 0x71d   :  { %v1208_v1 = vadd.f32 %v1206_v62, %v1198_v0  ;;  %v1200_v2 = vadd.f32 %v1199_v63, %v1139_v55  ;;  %v3132_v55 = vld [vmem:[#allocation5 + $0x438] sm:$0xf0]  ;;  %v3111_v62 = vor.u32 %v3546_v59, %v3108_v60  ;;  %v3187_v63 = vor.u32 %v3568_v30, %v3186_v28  ;;  %v3569_v59 = vld [vmem:[#allocation5 + $0x4e4] sm:$0xf0]  ;;  %v3196_v60 = vld [vmem:[#allocation5 + $0x4e8] sm:$0xf0] }
 0x71e   :  { %v3135_v56 = vor.u32 %v3552_v53, %v3132_v55  ;;  %v3541_v55 = vld [vmem:[#allocation5 + $0x37c] sm:$0xf] }
 0x71f   :  { %v1210_v7 = vmul.f32 0.7978846, %v1208_v1  ;;  %v1203_v18 = vmul.f32 %v1200_v2, %v1200_v2  ;;  %v3565_v1 = vld [vmem:[#allocation5 + $0x4bc] sm:$0xf]  ;;  %1671 = vmatpush.bf16.msra.mxu2 %v3187_v63  ;;  %v3538_v63 = vld [vmem:[#allocation5 + $0x34c] sm:$0xf0] }
 0x721   :  { %v1205_v25 = vmul.f32 %v1203_v18, %v1200_v2  ;;  %3665 = vtanh.f32 %v1210_v7  ;;  %v3082_v18 = vld [vmem:[#allocation5 + $0x370] sm:$0xf] }
 0x723   :  { %v1207_v29 = vmul.f32 0.044715, %v1205_v25  ;;  %v3543_v25 = vld [vmem:[#allocation5 + $0x394] sm:$0xf0] }
 0x725   :  { %v1209_v31 = vadd.f32 %v1207_v29, %v1200_v2  ;;  %v3540_v29 = vld [vmem:[#allocation5 + $0x374] sm:$0xf] }
 0x727   :  { %v1211_v5 = vmul.f32 0.7978846, %v1209_v31  ;;  %v3666_v8 = vpop.eup %3665  ;;  %v3083_v31 = vor.u32 %v3543_v25, %v3082_v18  ;;  %v3170_v18 = vld [vmem:[#allocation5 + $0x470] sm:$0xf]  ;;  %v3563_v25 = vld [vmem:[#allocation5 + $0x494] sm:$0xf0] }
 0x728   :  { %v1214_v9 = vadd.f32 1.0, %v3666_v8  ;;  %v3162_v8 = vld [vmem:[#allocation5 + $0x468] sm:$0xf] }
 0x729   :  { %3667 = vtanh.f32 %v1211_v5  ;;  %v3084_v5 = vld [vmem:[#allocation5 + $0x398] sm:$0xf0] }
 0x72a   :  { %v1216_v12 = vmul.f32 0.5, %v1214_v9  ;;  %v3562_v9 = vld [vmem:[#allocation5 + $0x48c] sm:$0xf0] }
 0x72c   :  { %v1218_v15 = vmul.f32 %v1216_v12, %v1198_v0  ;;  %v3107_v0 = vor.u32 %v3549_v39, %v3106_v57  ;;  %v3163_v12 = vor.u32 %v3562_v9, %v3162_v8  ;;  %v3194_v57 = vld [vmem:[#allocation5 + $0x4c0] sm:$0xf]  ;;  %v3172_v8 = vld [vmem:[#allocation5 + $0x498] sm:$0xf0] }
 0x72d   :  { %v3195_v28 = vor.u32 %v3569_v59, %v3194_v57 }
 0x72e   :  { %1646 = vmatpush.bf16.msrb.mxu0 %v3107_v0  ;;  %1672 = vmatpush.bf16.msra.mxu2 %v3163_v12  ;;  %v3566_v0 = vld [vmem:[#allocation5 + $0x4c4] sm:$0xf]  ;;  %v3532_v12 = vld [vmem:[#allocation5 + $0x2fc] sm:$0xf0] }
 0x72f   :  { %v3668_v11 = vpop.eup %3667  ;;  %v3199_v30 = vor.u32 %v3566_v0, %v3196_v60  ;;  %v3050_v60 = vld [vmem:[#allocation5 + $0x2e0] sm:$0xf] }
 0x730   :  { %v1215_v10 = vadd.f32 1.0, %v3668_v11  ;;  %v3087_v11 = vor.u32 %v3540_v29, %v3084_v5  ;;  %v3560_v5 = vld [vmem:[#allocation5 + $0x474] sm:$0xf] }
 0x731   :  { %v3175_v9 = vor.u32 %v3560_v5, %v3172_v8 }
 0x732   :  { %v1217_v13 = vmul.f32 0.5, %v1215_v10  ;;  %v3559_v10 = vld [vmem:[#allocation5 + $0x46c] sm:$0xf]  ;;  %1647 = vmatpush.bf16.msrb.mxu0 %v3083_v31  ;;  %v3171_v31 = vor.u32 %v3563_v25, %v3170_v18  ;;  %v3026_v18 = vld [vmem:[#allocation5 + $0x290] sm:$0xf] }
 0x733   :  { %v3527_v25 = vld [vmem:[#allocation5 + $0x2b4] sm:$0xf0] }
 0x734   :  { %v1219_v16 = vmul.f32 %v1217_v13, %v1200_v2  ;;  %v3188_v2 = vld [vmem:[#allocation5 + $0x4e0] sm:$0xf0]  ;;  %v3164_v13 = vld [vmem:[#allocation5 + $0x490] sm:$0xf0] }
 0x735   :  { %v3191_v7 = vor.u32 %v3565_v1, %v3188_v2  ;;  %v3535_v1 = vld [vmem:[#allocation5 + $0x32c] sm:$0xf] }
 0x736   :  { %v1220_v17 = vpack.c.bf16 %v1219_v16, %v1218_v15  ;;  %v3167_v15 = vor.u32 %v3559_v10, %v3164_v13  ;;  %v3058_v16 = vld [vmem:[#allocation5 + $0x320] sm:$0xf]  ;;  %v3529_v10 = vld [vmem:[#allocation5 + $0x2dc] sm:$0xf] }
 0x737   :  { %1685 = vmatpush.bf16.msrb.mxu3 %v3191_v7  ;;  %v3068_v7 = vld [vmem:[#allocation5 + $0x350] sm:$0xf0] }
 0x738   :  { %1294 = vmatmul.bf16.vlgmr.msra.gmra.mxu3 %v1220_v17  ;;  %v3537_v17 = vld [vmem:[#allocation5 + $0x344] sm:$0xf0]  ;;  %v3071_v29 = vor.u32 %v3535_v1, %v3068_v7 }
 0x73b   :  { %1686 = vmatpush.bf16.msrb.mxu3 %v3167_v15 }
 0x73f   :  { %1687 = vmatpush.bf16.msrb.mxu3 %v3143_v37  ;;  %v3526_v37 = vld [vmem:[#allocation5 + $0x2ac] sm:$0xf0] }
 0x740   :  { %v3019_v38 = vor.u32 %v3526_v37, %v3018_v34 }
 0x7bb   :  { %v1295_v22 = vpop.f32.mrf.mxu3 }
 0x7bc   :  { %v1296_v23 = vadd.f32 %v1295_v22, %v1237_v20  ;;  %v3059_v22 = vor.u32 %v3537_v17, %v3058_v16  ;;  %v3044_v16 = vld [vmem:[#allocation5 + $0x300] sm:$0xf0]  ;;  %v3146_v17 = vld [vmem:[#allocation5 + $0x420] sm:$0xf] }
 0x7be   :  { %v1300_v24 = vadd.f32 %v1296_v23, %v4037_v36  ;;  %v3159_v36 = vor.u32 %v3558_v6, %v3156_v19  ;;  %v3060_v23 = vld [vmem:[#allocation5 + $0x348] sm:$0xf0]  ;;  %1648 = vmatpush.bf16.msrb.mxu0 %v3059_v22  ;;  %v3114_v6 = vld [vmem:[#allocation5 + $0x3c8] sm:$0xf]  ;;  %v3550_v19 = vld [vmem:[#allocation5 + $0x3ec] sm:$0xf0] }
 0x7c0   :  { %1302 = vadd.xlane.f32.xlu2 %v1300_v24  ;;  %1658 = vmatpush.bf16.msra.mxu1 %v3159_v36  ;;  %v3115_v36 = vor.u32 %v3550_v19, %v3114_v6  ;;  %v3551_v6 = vld [vmem:[#allocation5 + $0x3f4] sm:$0xf0]  ;;  %v3548_v19 = vld [vmem:[#allocation5 + $0x3d4] sm:$0xf] }
 0x7c2   :  { %1649 = vmatpush.bf16.msrb.mxu0 %v3035_v4  ;;  %v3122_v4 = vld [vmem:[#allocation5 + $0x3d0] sm:$0xf] }
 0x7c3   :  { %v1297_v26 = vpop.f32.mrf.mxu3 }
 0x7c4   :  { %v1298_v27 = vadd.f32 %v1297_v26, %v1237_v20  ;;  %1659 = vmatpush.bf16.msra.mxu1 %v3135_v56  ;;  %v3534_v20 = vld [vmem:[#allocation5 + $0x324] sm:$0xf]  ;;  %v3556_v26 = vld [vmem:[#allocation5 + $0x43c] sm:$0xf0] }
 0x7c5   :  { %v3092_v56 = vld [vmem:[#allocation5 + $0x3a0] sm:$0xf0] }
 0x7c6   :  { %v1301_v32 = vadd.f32 %v1298_v27, %v4039_v35  ;;  %v3063_v27 = vor.u32 %v3534_v20, %v3060_v23  ;;  %v3095_v39 = vor.u32 %v3541_v55, %v3092_v56  ;;  %v3557_v20 = vld [vmem:[#allocation5 + $0x444] sm:$0xf0]  ;;  %v3047_v23 = vor.u32 %v3529_v10, %v3044_v16  ;;  %v3076_v55 = vld [vmem:[#allocation5 + $0x358] sm:$0xf0] }
 0x7c8   :  { %1304 = vadd.xlane.f32.xlu0 %v1301_v32  ;;  %1660 = vmatpush.bf16.msra.mxu1 %v3111_v62  ;;  %v3066_v62 = vld [vmem:[#allocation5 + $0x328] sm:$0xf] }
 0x7c9   :  { %v3067_v2 = vor.u32 %v3538_v63, %v3066_v62  ;;  %v3052_v62 = vld [vmem:[#allocation5 + $0x308] sm:$0xf0] }
 0x7cc   :  { %1661 = vmatpush.bf16.msra.mxu1 %v3087_v11  ;;  %v3042_v11 = vld [vmem:[#allocation5 + $0x2d8] sm:$0xf] }
 0x7cd   :  { %v3043_v15 = vor.u32 %v3532_v12, %v3042_v11 }
 0x7d0   :  { %1662 = vmatpush.bf16.msra.mxu1 %v3063_v27  ;;  %v3148_v27 = vld [vmem:[#allocation5 + $0x448] sm:$0xf0] }
 0x7d4   :  { %1663 = vmatpush.bf16.msra.mxu1 %v3039_v44  ;;  %v3124_v44 = vld [vmem:[#allocation5 + $0x3f8] sm:$0xf0] }
 0x833   :  { %v1303_v45 = vpop.xlane.xlu2 %1302 }
 0x834   :  { %v1306_v46 = vmul.f32 0.03125, %v1303_v45  ;;  %v3547_v45 = vld [vmem:[#allocation5 + $0x3cc] sm:$0xf] }
 0x836   :  { %v1308_v35 = vsub.f32 %v1300_v24, %v1306_v46  ;;  %v3138_v24 = vld [vmem:[#allocation5 + $0x418] sm:$0xf]  ;;  %v3116_v46 = vld [vmem:[#allocation5 + $0x3f0] sm:$0xf0] }
 0x838   :  { %v4048_v47 = vmul.f32 %v3893_v3, %v1308_v35  ;;  %v3119_v35 = vor.u32 %v3547_v45, %v3116_v46  ;;  %v3127_v45 = vor.u32 %v3548_v19, %v3124_v44  ;;  %v3098_v46 = vld [vmem:[#allocation5 + $0x380] sm:$0xf]  ;;  %v4070_v44 = vld [vmem:[#allocation7 + $0x10] sm:$0xff] }
 0x83a   :  { %v1312_v48 = vmul.f32 %v4048_v47, %v4048_v47  ;;  %1688 = vmatpush.bf16.msrb.mxu3 %v3119_v35  ;;  %v3545_v35 = vld [vmem:[#allocation5 + $0x3a4] sm:$0xf0] }
 0x83b   :  { %v1305_v49 = vpop.xlane.xlu0 %1304 }
 0x83c   :  { %v1307_v50 = vmul.f32 0.03125, %v1305_v49  ;;  %1314 = vadd.xlane.f32.xlu1 %v1312_v48  ;;  %v3010_v48 = vld [vmem:[#allocation5 + $0x280] sm:$0xf]  ;;  %v3525_v49 = vld [vmem:[#allocation5 + $0x2a4] sm:$0xf0] }
 0x83e   :  { %v1309_v51 = vsub.f32 %v1301_v32, %v1307_v50  ;;  %v3139_v32 = vor.u32 %v3556_v26, %v3138_v24  ;;  %v3522_v50 = vld [vmem:[#allocation5 + $0x284] sm:$0xf]  ;;  %1689 = vmatpush.bf16.msrb.mxu3 %v3095_v39  ;;  %v3147_v24 = vor.u32 %v3557_v20, %v3146_v17 }
 0x83f   :  { %v3554_v26 = vld [vmem:[#allocation5 + $0x424] sm:$0xf] }
 0x840   :  { %v4053_v52 = vmul.f32 %v3893_v3, %v1309_v51  ;;  %1673 = vmatpush.bf16.msra.mxu2 %v3139_v32  ;;  %v3011_v51 = vor.u32 %v3525_v49, %v3010_v48  ;;  %v3151_v32 = vor.u32 %v3554_v26, %v3148_v27  ;;  %v3542_v48 = vld [vmem:[#allocation5 + $0x384] sm:$0xf] }
 0x841   :  { %v3703_v20 = vld [vmem:[#allocation7] sm:$0xff] }
 0x842   :  { %v1313_v14 = vmul.f32 %v4053_v52, %v4053_v52  ;;  %1650 = vmatpush.bf16.msrb.mxu0 %v3011_v51  ;;  %1690 = vmatpush.bf16.msrb.mxu3 %v3071_v29  ;;  %v3100_v51 = vld [vmem:[#allocation5 + $0x3a8] sm:$0xf0]  ;;  %v3524_v29 = vld [vmem:[#allocation5 + $0x294] sm:$0xf]  ;;  %v1347_v27 = vperm.slane %v3703_v20, 6 }
 0x844   :  { %1316 = vadd.xlane.f32.xlu2 %v1313_v14  ;;  %1674 = vmatpush.bf16.msra.mxu2 %v3115_v36  ;;  %v3012_v14 = vld [vmem:[#allocation5 + $0x2a8] sm:$0xf0]  ;;  %v3123_v36 = vor.u32 %v3551_v6, %v3122_v4  ;;  %v1352_v4 = vld [vmem:[#allocation7 + $0x18] sm:$0xff] }
 0x845   :  { %v3015_v53 = vor.u32 %v3522_v50, %v3012_v14  ;;  %v3099_v50 = vor.u32 %v3545_v35, %v3098_v46  ;;  %v3074_v14 = vld [vmem:[#allocation5 + $0x330] sm:$0xf]  ;;  %v1727_v35 = vperm.slane %v4070_v44, 7 }
 0x846   :  { %1699 = vmatpush.bf16.msra.mxu0 %v3195_v28  ;;  %1691 = vmatpush.bf16.msrb.mxu3 %v3047_v23  ;;  %v3075_v59 = vor.u32 %v3539_v21, %v3074_v14  ;;  %v3533_v28 = vld [vmem:[#allocation5 + $0x304] sm:$0xf0] }
 0x847   :  { %1664 = vmatpush.bf16.msra.mxu1 %v3015_v53  ;;  %v3103_v53 = vor.u32 %v3542_v48, %v3100_v51  ;;  %v1733_v48 = vperm.slane %v1352_v4, 1 }
 0x848   :  { %1675 = vmatpush.bf16.msra.mxu2 %v3091_v54  ;;  %v3536_v54 = vld [vmem:[#allocation5 + $0x334] sm:$0xf] }
 0x849   :  { %v3079_v0 = vor.u32 %v3536_v54, %v3076_v55 }
 0x84a   :  { %1700 = vmatpush.bf16.msra.mxu0 %v3171_v31  ;;  %1692 = vmatpush.bf16.msrb.mxu3 %v3023_v42  ;;  %v3028_v31 = vld [vmem:[#allocation5 + $0x2b8] sm:$0xf0]  ;;  %v1730_v42 = vperm.slane %v1352_v4, 0 }
 0x84b   :  { %1713 = vmatpush.bf16.msrb.mxu1 %v3199_v30  ;;  %v3530_v30 = vld [vmem:[#allocation5 + $0x2e4] sm:$0xf]  ;;  %v3031_v10 = vor.u32 %v3524_v29, %v3028_v31 }
 0x84c   :  { %1676 = vmatpush.bf16.msra.mxu2 %v3067_v2  ;;  %v3051_v2 = vor.u32 %v3533_v28, %v3050_v60  ;;  %v3055_v7 = vor.u32 %v3530_v30, %v3052_v62 }
 0x84e   :  { %1701 = vmatpush.bf16.msra.mxu0 %v3147_v24 }
 0x84f   :  { %1714 = vmatpush.bf16.msrb.mxu1 %v3175_v9  ;;  %v3027_v9 = vor.u32 %v3527_v25, %v3026_v18 }
 0x850   :  { %1677 = vmatpush.bf16.msra.mxu2 %v3043_v15 }
 0x852   :  { %1702 = vmatpush.bf16.msra.mxu0 %v3123_v36 }
 0x853   :  { %1715 = vmatpush.bf16.msrb.mxu1 %v3151_v32 }
 0x854   :  { %1678 = vmatpush.bf16.msra.mxu2 %v3019_v38 }
 0x856   :  { %1703 = vmatpush.bf16.msra.mxu0 %v3099_v50 }
 0x857   :  { %1716 = vmatpush.bf16.msrb.mxu1 %v3127_v45 }
 0x85a   :  { %1704 = vmatpush.bf16.msra.mxu0 %v3075_v59 }
 0x85b   :  { %1717 = vmatpush.bf16.msrb.mxu1 %v3103_v53 }
 0x85e   :  { %1705 = vmatpush.bf16.msra.mxu0 %v3051_v2 }
 0x85f   :  { %1718 = vmatpush.bf16.msrb.mxu1 %v3079_v0 }
 0x862   :  { %1706 = vmatpush.bf16.msra.mxu0 %v3027_v9 }
 0x863   :  { %1719 = vmatpush.bf16.msrb.mxu1 %v3055_v7  ;;  %v1836_v7 = vperm.slane %v1352_v4, 2 }
 0x867   :  { %1720 = vmatpush.bf16.msrb.mxu1 %v3031_v10 }
 0x8af   :  { %v1315_v13 = vpop.xlane.xlu1 %1314 }
 0x8b0   :  { %v1318_v22 = vmul.f32 0.03125, %v1315_v13 }
 0x8b2   :  { %v4057_v33 = vadd.f32 1e-12, %v1318_v22  ;;  %v1344_v22 = vperm.slane %v3703_v20, 5 }
 0x8b4   :  { %3669 = vrsqrt.f32 %v4057_v33  ;;  %vm1328_vm4 = vweird.f32 %v4057_v33 }
 0x8b7   :  { %v1317_v49 = vpop.xlane.xlu2 %1316 }
 0x8b8   :  { %v1319_v43 = vmul.f32 0.03125, %v1317_v49 }
 0x8ba   :  { %v3670_v56 = vpop.eup %3669  ;;  %v1321_v57 = vadd.f32 1e-12, %v1319_v43 }
 0x8bb   :  { %v1323_v39 = vmul.f32 %v3670_v56, %v4057_v33  ;;  %vm1329_vm3 = vweird.f32 %v3670_v56 }
 0x8bc   :  { %3671 = vrsqrt.f32 %v1321_v57  ;;  %vm1330_vm5 = vmor %vm1328_vm4, %vm1329_vm3  ;;  %vm1338_vm7 = vweird.f32 %v1321_v57 }
 0x8bd   :  { %v1324_v63 = vmul.f32 %v3670_v56, %v1323_v39  ;;  %v1842_v39 = vperm.slane %v1352_v4, 4 }
 0x8bf   :  { %v1325_v1 = vmul.f32 0.5, %v1324_v63 }
 0x8c1   :  { %v1326_v5 = vsub.f32 1.5, %v1325_v1 }
 0x8c2   :  { %v3672_v8 = vpop.eup %3671 }
 0x8c3   :  { %v1327_v11 = vmul.f32 %v3670_v56, %v1326_v5  ;;  %v1333_v12 = vmul.f32 %v3672_v8, %v1321_v57  ;;  %vm1339_vm6 = vweird.f32 %v3672_v8  ;;  %v1839_v57 = vperm.slane %v1352_v4, 3 }
 0x8c4   :  { %vm1340_vm8 = vmor %vm1338_vm7, %vm1339_vm6 }
 0x8c5   :  { %v1334_v13 = vmul.f32 %v3672_v8, %v1333_v12  ;;  %v1331_v15 = vsel %vm1330_vm5, %v3670_v56, %v1327_v11 }
 0x8c6   :  { %v1342_v23 = vmul.f32 %v1331_v15, %v4048_v47 }
 0x8c7   :  { %v1335_v16 = vmul.f32 0.5, %v1334_v13 }
 0x8c8   :  { %v1345_v32 = vmul.f32 %v1344_v22, %v1342_v23 }
 0x8c9   :  { %v1336_v17 = vsub.f32 1.5, %v1335_v16 }
 0x8ca   :  { %v4064_v37 = vadd.f32 %v1347_v27, %v1345_v32 }
 0x8cb   :  { %v1337_v24 = vmul.f32 %v3672_v8, %v1336_v17 }
 0x8cd   :  { %v1341_v26 = vsel %vm1340_vm8, %v3672_v8, %v1337_v24 }
 0x8ce   :  { %v1343_v33 = vmul.f32 %v1341_v26, %v4053_v52 }
 0x8d0   :  { %v1346_v34 = vmul.f32 %v1344_v22, %v1343_v33 }
 0x8d2   :  { %v4066_v38 = vadd.f32 %v1347_v27, %v1346_v34 }
 0x8d4   :  { %v1353_v40 = vpack.c.bf16 %v4066_v38, %v4064_v37 }
 0x8d6   :  { %1651 = vmatmul.bf16.vlgmr.msrb.gmra.mxu0 %v1353_v40  ;;  %1665 = vmatmul.bf16.vlgmr.msra.gmra.mxu1 %v1353_v40 }
 0x8d7   :  { %1679 = vmatmul.bf16.vlgmr.msra.gmra.mxu2 %v1353_v40  ;;  %1693 = vmatmul.bf16.vlgmr.msrb.gmra.mxu3 %v1353_v40 }
 0x8e6   :  { %1707 = vmatmul.bf16.vlgmr.msra.gmra.mxu0 %v1353_v40  ;;  %1721 = vmatmul.bf16.vlgmr.msrb.gmra.mxu1 %v1353_v40 }
 0x953   :  { %v1652_v47 = vpop.f32.mrf.mxu0  ;;  %v1666_v41 = vpop.f32.mrf.mxu1 }
 0x954   :  { %v1731_v36 = vadd.f32 %v1730_v42, %v1666_v41  ;;  %v1728_v51 = vadd.f32 %v1727_v35, %v1652_v47 }
 0x95a   :  { %v1680_v6 = vpop.f32.mrf.mxu2  ;;  %v1694_v54 = vpop.f32.mrf.mxu3 }
 0x95b   :  { %v1654_v52 = vpop.f32.mrf.mxu0  ;;  %v1668_v19 = vpop.f32.mrf.mxu1  ;;  %v1734_v14 = vadd.f32 %v1733_v48, %v1680_v6  ;;  %v1837_v25 = vadd.f32 %v1836_v7, %v1694_v54 }
 0x95c   :  { %v1732_v45 = vadd.f32 %v1730_v42, %v1668_v19  ;;  %v1729_v49 = vadd.f32 %v1727_v35, %v1654_v52 }
 0x95e   :  { %v1737_v46 = vpack.c.bf16 %v1732_v45, %v1731_v36  ;;  %v1736_v55 = vpack.c.bf16 %v1729_v49, %v1728_v51 }
 0x960   :  { %1745 = vmatpush.bf16.xpose.msrb.mxu2 %v1737_v46 }
 0x962   :  { %v1682_v50 = vpop.f32.mrf.mxu2  ;;  %v1696_v63 = vpop.f32.mrf.mxu3 }
 0x963   :  { %v1735_v21 = vadd.f32 %v1733_v48, %v1682_v50  ;;  %v1708_v43 = vpop.f32.mrf.mxu0  ;;  %v1722_v53 = vpop.f32.mrf.mxu1  ;;  %v1838_v18 = vadd.f32 %v1836_v7, %v1696_v63  ;;  %v3256_v63 = vld [vmem:[#allocation5 + $0x428] sm:$0xf] }
 0x964   :  { %v1840_v60 = vadd.f32 %v1839_v57, %v1708_v43  ;;  %v1843_v28 = vadd.f32 %v1842_v39, %v1722_v53  ;;  %v3260_v43 = vld [vmem:[#allocation5 + $0x478] sm:$0xf] }
 0x965   :  { %v1801_v56 = vpack.c.bf16 %v1735_v21, %v1734_v14  ;;  %v1845_v29 = vpack.c.bf16 %v1838_v18, %v1837_v25  ;;  %v3264_v14 = vld [vmem:[#allocation5 + $0x4c8] sm:$0xf]  ;;  %v3577_v21 = vld [vmem:[#allocation5 + $0x4ec] sm:$0xf0] }
 0x966   :  { %v3265_v54 = vor.u32 %v3577_v21, %v3264_v14 }
 0x967   :  { %1812 = vmatpush.bf16.msra.mxu3 %v1801_v56  ;;  %1746 = vmatmul.bf16.vlgmr.msrb.gmra.mxu2 %v1736_v55  ;;  %v3576_v55 = vld [vmem:[#allocation5 + $0x49c] sm:$0xf0] }
 0x968   :  { %2055 = vmatpush.bf16.msra.mxu1 %v3265_v54 }
 0x96b   :  { %v1710_v59 = vpop.f32.mrf.mxu0  ;;  %v1724_v0 = vpop.f32.mrf.mxu1 }
 0x96c   :  { %v1841_v30 = vadd.f32 %v1839_v57, %v1710_v59  ;;  %v1844_v62 = vadd.f32 %v1842_v39, %v1724_v0  ;;  %v3232_v59 = vld [vmem:[#allocation5 + $0x4cc] sm:$0xf] }
 0x96e   :  { %v1846_v1 = vpack.c.bf16 %v1841_v30, %v1840_v60  ;;  %v1910_v2 = vpack.c.bf16 %v1844_v62, %v1843_v28  ;;  %v3261_v28 = vor.u32 %v3576_v55, %v3260_v43  ;;  %v3585_v30 = vld [vmem:[#allocation5 + $0x4f0] sm:$0xf0]  ;;  %v3228_v55 = vld [vmem:[#allocation5 + $0x47c] sm:$0xf] }
 0x96f   :  { %v3233_v18 = vor.u32 %v3585_v30, %v3232_v59  ;;  %v3572_v59 = vld [vmem:[#allocation5 + $0x35c] sm:$0xf0]  ;;  %v3240_v30 = vld [vmem:[#allocation5 + $0x2e8] sm:$0xf] }
 0x970   :  { %1854 = vmatpush.bf16.xpose.msra.mxu2 %v1846_v1  ;;  %1921 = vmatpush.bf16.msrb.mxu3 %v1910_v2  ;;  %v3575_v1 = vld [vmem:[#allocation5 + $0x44c] sm:$0xf0]  ;;  %v3236_v2 = vld [vmem:[#allocation5 + $0x298] sm:$0xf] }
 0x971   :  { %2056 = vmatpush.bf16.msra.mxu1 %v3261_v28  ;;  %1993 = vmatpush.bf16.msrb.mxu0 %v3233_v18  ;;  %v3570_v18 = vld [vmem:[#allocation5 + $0x2bc] sm:$0xf0] }
 0x977   :  { %1855 = vmatmul.bf16.vlgmr.msra.gmra.mxu2 %v1845_v29 }
 0x9ea   :  { %v1747_v31 = vpop.f32.mrf.mxu2 }
 0x9eb   :  { %v1748_v5 = vadd.f32 %v1747_v31, %v3932_v58 }
 0x9ed   :  { %v1752_v8 = vsel %vm751_vm9, %v1748_v5, -inf }
 0x9ee   :  { %1753 = vmax.xlane.f32.xlu0 %v1752_v8  ;;  %v3257_v8 = vor.u32 %v3575_v1, %v3256_v63 }
 0x9f0   :  { %2057 = vmatpush.bf16.msra.mxu1 %v3257_v8  ;;  %v3212_v8 = vld [vmem:[#allocation5 + $0x33c] sm:$0xf] }
 0x9f2   :  { %v1749_v9 = vpop.f32.mrf.mxu2 }
 0x9f3   :  { %v1750_v11 = vadd.f32 %v1749_v9, %v3942_v61 }
 0x9f5   :  { %v1755_v12 = vsel %vm751_vm9, %v1750_v11, -inf }
 0x9f6   :  { %1756 = vmax.xlane.f32.xlu1 %v1755_v12  ;;  %v3574_v12 = vld [vmem:[#allocation5 + $0x3fc] sm:$0xf0] }
 0x9fa   :  { %v1856_v10 = vpop.f32.mrf.mxu2 }
 0x9fb   :  { %v1857_v13 = vadd.f32 %v1856_v10, %v3932_v58 }
 0x9fd   :  { %v1861_v15 = vsel %vm751_vm9, %v1857_v13, -inf }
 0x9fe   :  { %1862 = vmax.xlane.f32.xlu2 %v1861_v15 }
 0xa02   :  { %v1858_v16 = vpop.f32.mrf.mxu2 }
 0xa03   :  { %v1859_v17 = vadd.f32 %v1858_v16, %v3942_v61 }
 0xa05   :  { %v1864_v20 = vsel %vm751_vm9, %v1859_v17, -inf }
 0xa06   :  { %1865 = vmax.xlane.f32.xlu0 %v1864_v20 }
 0xa61   :  { %v1754_v22 = vpop.xlane.xlu0 %1753 }
 0xa62   :  { %v1758_v23 = vsub.f32 %v1748_v5, %v1754_v22 }
 0xa64   :  { %v1760_v24 = vmul.f32 1.442695, %v1758_v23 }
 0xa66   :  { %3673 = vpow2.f32 %v1760_v24 }
 0xa69   :  { %v1757_v26 = vpop.xlane.xlu1 %1756 }
 0xa6a   :  { %v1759_v27 = vsub.f32 %v1750_v11, %v1757_v26  ;;  %v3252_v11 = vld [vmem:[#allocation5 + $0x3d8] sm:$0xf] }
 0xa6b   :  { %v3253_v23 = vor.u32 %v3574_v12, %v3252_v11  ;;  %v3208_v12 = vld [vmem:[#allocation5 + $0x2ec] sm:$0xf] }
 0xa6c   :  { %v4081_v32 = vpop.eup %3673  ;;  %v1762_v33 = vmul.f32 1.442695, %v1759_v27 }
 0xa6d   :  { %v1764_v58 = vsel %vm751_vm9, %v4081_v32, 0.0  ;;  %2058 = vmatpush.bf16.msra.mxu1 %v3253_v23 }
 0xa6e   :  { %3675 = vpow2.f32 %v1762_v33  ;;  %1765 = vadd.xlane.f32.xlu1 %v1764_v58  ;;  %v3248_v33 = vld [vmem:[#allocation5 + $0x388] sm:$0xf]  ;;  %v3573_v58 = vld [vmem:[#allocation5 + $0x3ac] sm:$0xf0] }
 0xa71   :  { %v1863_v34 = vpop.xlane.xlu2 %1862 }
 0xa72   :  { %v1867_v40 = vsub.f32 %v1857_v13, %v1863_v34 }
 0xa74   :  { %v4085_v61 = vpop.eup %3675  ;;  %v1869_v47 = vmul.f32 1.442695, %v1867_v40 }
 0xa75   :  { %v1767_v41 = vsel %vm751_vm9, %v4085_v61, 0.0 }
 0xa76   :  { %3677 = vpow2.f32 %v1869_v47  ;;  %1768 = vadd.xlane.f32.xlu2 %v1767_v41  ;;  %v3249_v47 = vor.u32 %v3573_v58, %v3248_v33 }
 0xa78   :  { %2059 = vmatpush.bf16.msra.mxu1 %v3249_v47 }
 0xa79   :  { %v1866_v4 = vpop.xlane.xlu0 %1865 }
 0xa7a   :  { %v1868_v42 = vsub.f32 %v1859_v17, %v1866_v4 }
 0xa7c   :  { %v4089_v6 = vpop.eup %3677  ;;  %v1871_v52 = vmul.f32 1.442695, %v1868_v42 }
 0xa7d   :  { %v1873_v19 = vsel %vm751_vm9, %v4089_v6, 0.0 }
 0xa7e   :  { %3679 = vpow2.f32 %v1871_v52  ;;  %1874 = vadd.xlane.f32.xlu0 %v1873_v19 }
 0xa84   :  { %v4093_v36 = vpop.eup %3679 }
 0xa85   :  { %v1876_v45 = vsel %vm751_vm9, %v4093_v36, 0.0 }
 0xa86   :  { %1877 = vadd.xlane.f32.xlu1 %v1876_v45 }
 0xae1   :  { %v1766_v46 = vpop.xlane.xlu1 %1765 }
 0xae2   :  { %3681 = vrcp.f32 %v1766_v46  ;;  %v1779_v0 = vand.u32 2147483647, %v1766_v46  ;;  %v1781_v60 = vand.u32 2147483648, %v1766_v46  ;;  %vm1775_vm11 = vweird.f32 %v1766_v46 }
 0xae4   :  { %v1782_v5 = vor.u32 1.1754944e-38, %v1781_v60  ;;  %vm1780_vm14 = vcmp.eq.f32.partialorder %v1779_v0, 8.507059e+37  ;;  %v3224_v0 = vld [vmem:[#allocation5 + $0x42c] sm:$0xf]  ;;  %v3583_v60 = vld [vmem:[#allocation5 + $0x450] sm:$0xf0] }
 0xae5   :  { %v3225_v63 = vor.u32 %v3583_v60, %v3224_v0  ;;  %v3590_v0 = vld [vmem:[#allocation5 + $0x404] sm:$0xf0] }
 0xae8   :  { %v3682_v35 = vpop.eup %3681 }
 0xae9   :  { %v1771_v48 = vmul.f32 %v3682_v35, %v1766_v46  ;;  %v1769_v49 = vpop.xlane.xlu2 %1768  ;;  %vm1776_vm10 = vweird.f32 %v3682_v35 }
 0xaea   :  { %3683 = vrcp.f32 %v1769_v49  ;;  %vm4100_vm12 = vmor %vm1775_vm11, %vm1776_vm10  ;;  %v1796_v7 = vand.u32 2147483648, %v1769_v49  ;;  %v1794_v31 = vand.u32 2147483647, %v1769_v49  ;;  %vm1790_vm15 = vweird.f32 %v1769_v49 }
 0xaeb   :  { %v1772_v50 = vsub.f32 1.0, %v1771_v48 }
 0xaec   :  { %v1797_v15 = vor.u32 1.1754944e-38, %v1796_v7  ;;  %vm1795_vm1 = vcmp.eq.f32.partialorder %v1794_v31, 8.507059e+37  ;;  %v3581_v31 = vld [vmem:[#allocation5 + $0x3b0] sm:$0xf0] }
 0xaed   :  { %v1773_v51 = vmul.f32 %v3682_v35, %v1772_v50 }
 0xaef   :  { %v1774_v56 = vadd.f32 %v3682_v35, %v1773_v51 }
 0xaf0   :  { %v3684_v53 = vpop.eup %3683 }
 0xaf1   :  { %v1786_v57 = vmul.f32 %v3684_v53, %v1769_v49  ;;  %v4097_v39 = vpop.xlane.xlu0 %1874  ;;  %v1778_v25 = vsel %vm4100_vm12, %v3682_v35, %v1774_v56  ;;  %vm1791_vm13 = vweird.f32 %v3684_v53  ;;  %v3584_v56 = vld [vmem:[#allocation5 + $0x4a0] sm:$0xf0] }
 0xaf2   :  { %3685 = vrcp.f32 %v4097_v39  ;;  %v1783_v13 = vsel %vm1780_vm14, %v1782_v5, %v1778_v25  ;;  %vm1792_vm0 = vmor %vm1790_vm15, %vm1791_vm13  ;;  %v1890_v52 = vand.u32 2147483648, %v4097_v39  ;;  %vm1884_vm3 = vweird.f32 %v4097_v39 }
 0xaf3   :  { %v1787_v62 = vsub.f32 1.0, %v1786_v57  ;;  %v1784_v24 = vmul.f32 %v4081_v32, %v1783_v13  ;;  %v1888_v32 = vand.u32 2147483647, %v4097_v39  ;;  %v3244_v57 = vld [vmem:[#allocation5 + $0x338] sm:$0xf]  ;;  %v3237_v25 = vor.u32 %v3570_v18, %v3236_v2 }
 0xaf4   :  { %v1891_v48 = vor.u32 1.1754944e-38, %v1890_v52  ;;  %v3245_v28 = vor.u32 %v3572_v59, %v3244_v57  ;;  %v3591_v57 = vld [vmem:[#allocation5 + $0x454] sm:$0xf0]  ;;  %v3284_v59 = vld [vmem:[#allocation5 + $0x3e0] sm:$0xf] }
 0xaf5   :  { %v1788_v29 = vmul.f32 %v3684_v53, %v1787_v62  ;;  %vm1889_vm6 = vcmp.eq.f32.partialorder %v1888_v32, 8.507059e+37  ;;  %v3571_v62 = vld [vmem:[#allocation5 + $0x30c] sm:$0xf0]  ;;  %v3285_v60 = vor.u32 %v3590_v0, %v3284_v59  ;;  %v3587_v2 = vld [vmem:[#allocation5 + $0x314] sm:$0xf0] }
 0xaf6   :  { %2060 = vmatpush.bf16.msra.mxu1 %v3245_v28  ;;  %v3241_v1 = vor.u32 %v3571_v62, %v3240_v30  ;;  %v3280_v28 = vld [vmem:[#allocation5 + $0x390] sm:$0xf]  ;;  %v3589_v30 = vld [vmem:[#allocation5 + $0x3b4] sm:$0xf0]  ;;  %v3304_v59 = vld [vmem:[#allocation5 + $0x2f4] sm:$0xf] }
 0xaf7   :  { %v1789_v9 = vadd.f32 %v3684_v53, %v1788_v29  ;;  %v3216_v29 = vld [vmem:[#allocation5 + $0x38c] sm:$0xf]  ;;  %v3281_v62 = vor.u32 %v3589_v30, %v3280_v28  ;;  %v3595_v0 = vld [vmem:[#allocation5 + $0x318] sm:$0xf0] }
 0xaf8   :  { %v3686_v10 = vpop.eup %3685  ;;  %v3217_v5 = vor.u32 %v3581_v31, %v3216_v29  ;;  %v3586_v29 = vld [vmem:[#allocation5 + $0x2c4] sm:$0xf0]  ;;  %v3305_v28 = vor.u32 %v3595_v0, %v3304_v59  ;;  %v3616_v0 = vld [vmem:[#allocation2 + $0xf0] sm:$0xff] }
 0xaf9   :  { %v1793_v16 = vsel %vm1792_vm0, %v3684_v53, %v1789_v9  ;;  %v1880_v17 = vmul.f32 %v3686_v10, %v4097_v39  ;;  %v1878_v20 = vpop.xlane.xlu1 %1877  ;;  %vm1885_vm2 = vweird.f32 %v3686_v10  ;;  %v3229_v39 = vor.u32 %v3584_v56, %v3228_v55  ;;  %v3580_v9 = vld [vmem:[#allocation5 + $0x360] sm:$0xf0]  ;;  %v3288_v56 = vld [vmem:[#allocation5 + $0x430] sm:$0xf] }
 0xafa   :  { %v1798_v22 = vsel %vm1795_vm1, %v1797_v15, %v1793_v16  ;;  %3687 = vrcp.f32 %v1878_v20  ;;  %vm1886_vm4 = vmor %vm1884_vm3, %vm1885_vm2  ;;  %v1905_v19 = vand.u32 2147483648, %v1878_v20  ;;  %v1903_v35 = vand.u32 2147483647, %v1878_v20  ;;  %2061 = vmatpush.bf16.msra.mxu1 %v3241_v1  ;;  %v3204_v15 = vld [vmem:[#allocation5 + $0x29c] sm:$0xf] }
 0xafb   :  { %v1799_v26 = vmul.f32 %v4085_v61, %v1798_v22  ;;  %v1881_v27 = vsub.f32 1.0, %v1880_v17  ;;  %vm1899_vm7 = vweird.f32 %v1878_v20  ;;  %1994 = vmatpush.bf16.msrb.mxu0 %v3229_v39  ;;  %v3213_v11 = vor.u32 %v3580_v9, %v3212_v8  ;;  %v3578_v16 = vld [vmem:[#allocation5 + $0x2c0] sm:$0xf0]  ;;  %v3588_v1 = vld [vmem:[#allocation5 + $0x364] sm:$0xf0] }
 0xafc   :  { %v1906_v51 = vor.u32 1.1754944e-38, %v1905_v19  ;;  %vm1904_vm10 = vcmp.eq.f32.partialorder %v1903_v35, 8.507059e+37  ;;  %v3205_v17 = vor.u32 %v3578_v16, %v3204_v15  ;;  %v3289_v39 = vor.u32 %v3591_v57, %v3288_v56  ;;  %v3308_v56 = vld [vmem:[#allocation5 + $0x344] sm:$0xf]  ;;  %v3596_v57 = vld [vmem:[#allocation5 + $0x368] sm:$0xf0] }
 0xafd   :  { %v1882_v34 = vmul.f32 %v3686_v10, %v1881_v27  ;;  %v1800_v40 = vpack.c.bf16 %v1799_v26, %v1784_v24 }
 0xafe   :  { %2062 = vmatpush.bf16.msra.mxu1 %v3237_v25 }
 0xaff   :  { %3200 = vmatmul.msk.bf16.vlgmr.msra.gmra.mxu3 %vm751_vm9, %v1800_v40  ;;  %v1883_v4 = vadd.f32 %v3686_v10, %v1882_v34  ;;  %1995 = vmatpush.bf16.msrb.mxu0 %v3225_v63  ;;  %v2071_v40 = vperm.slane %v4070_v44, 0  ;;  %v3276_v63 = vld [vmem:[#allocation5 + $0x340] sm:$0xf] }
 0xb00   :  { %v3688_v41 = vpop.eup %3687 }
 0xb01   :  { %v1895_v42 = vmul.f32 %v3688_v41, %v1878_v20  ;;  %v1887_v45 = vsel %vm1886_vm4, %v3686_v10, %v1883_v4  ;;  %vm1900_vm5 = vweird.f32 %v3688_v41  ;;  %v3579_v10 = vld [vmem:[#allocation5 + $0x310] sm:$0xf0] }
 0xb02   :  { %v1892_v50 = vsel %vm1889_vm6, %v1891_v48, %v1887_v45  ;;  %vm1901_vm8 = vmor %vm1899_vm7, %vm1900_vm5  ;;  %v3209_v13 = vor.u32 %v3579_v10, %v3208_v12  ;;  %vm2353_vm6 = vcmask 1040384  }
 0xb03   :  { %v1896_v61 = vsub.f32 1.0, %v1895_v42  ;;  %v1893_v43 = vmul.f32 %v4089_v6, %v1892_v50  ;;  %v3220_v6 = vld [vmem:[#allocation5 + $0x3dc] sm:$0xf] }
 0xb05   :  { %v1897_v46 = vmul.f32 %v3688_v41, %v1896_v61 }
 0xb07   :  { %v1898_v49 = vadd.f32 %v3688_v41, %v1897_v46 }
 0xb09   :  { %v1902_v14 = vsel %vm1901_vm8, %v3688_v41, %v1898_v49  ;;  %vm2597_vm8 = vcmask 205824  }
 0xb0a   :  { %v1907_v21 = vsel %vm1904_vm10, %v1906_v51, %v1902_v14  ;;  %v3296_v14 = vld [vmem:[#allocation5 + $0x4d0] sm:$0xf] }
 0xb0b   :  { %v1908_v53 = vmul.f32 %v4093_v36, %v1907_v21  ;;  %v3582_v36 = vld [vmem:[#allocation5 + $0x400] sm:$0xf0]  ;;  %v3593_v21 = vld [vmem:[#allocation5 + $0x4f4] sm:$0xf0] }
 0xb0c   :  { %v3221_v7 = vor.u32 %v3582_v36, %v3220_v6  ;;  %v3277_v6 = vor.u32 %v3588_v1, %v3276_v63  ;;  %v3272_v36 = vld [vmem:[#allocation5 + $0x2f0] sm:$0xf]  ;;  %v3594_v63 = vld [vmem:[#allocation5 + $0x2c8] sm:$0xf0] }
 0xb0d   :  { %v1909_v54 = vpack.c.bf16 %v1908_v53, %v1893_v43  ;;  %v3297_v43 = vor.u32 %v3593_v21, %v3296_v14  ;;  %v3292_v53 = vld [vmem:[#allocation5 + $0x480] sm:$0xf]  ;;  %v3273_v25 = vor.u32 %v3587_v2, %v3272_v36  ;;  %v3316_v14 = vld [vmem:[#allocation5 + $0x3e4] sm:$0xf]  ;;  %v3598_v21 = vld [vmem:[#allocation5 + $0x408] sm:$0xf0] }
 0xb0e   :  { %1996 = vmatpush.bf16.msrb.mxu0 %v3221_v7  ;;  %v3268_v7 = vld [vmem:[#allocation5 + $0x2a0] sm:$0xf] }
 0xb0f   :  { %3201 = vmatmul.msk.bf16.vlgmr.msrb.gmra.mxu3 %vm751_vm9, %v1909_v54  ;;  %2188 = vmatpush.bf16.msrb.mxu2 %v3297_v43  ;;  %v3592_v54 = vld [vmem:[#allocation5 + $0x4a4] sm:$0xf0]  ;;  %v3317_v43 = vor.u32 %v3598_v21, %v3316_v14 }
 0xb10   :  { %v3293_v55 = vor.u32 %v3592_v54, %v3292_v53  ;;  %v3312_v53 = vld [vmem:[#allocation5 + $0x394] sm:$0xf]  ;;  %v3597_v54 = vld [vmem:[#allocation5 + $0x3b8] sm:$0xf0] }
 0xb12   :  { %1997 = vmatpush.bf16.msrb.mxu0 %v3217_v5  ;;  %v3269_v5 = vor.u32 %v3586_v29, %v3268_v7 }
 0xb13   :  { %2189 = vmatpush.bf16.msrb.mxu2 %v3293_v55  ;;  %v3313_v55 = vor.u32 %v3597_v54, %v3312_v53 }
 0xb16   :  { %1998 = vmatpush.bf16.msrb.mxu0 %v3213_v11 }
 0xb17   :  { %2190 = vmatpush.bf16.msrb.mxu2 %v3289_v39  ;;  %v3309_v39 = vor.u32 %v3596_v57, %v3308_v56  ;;  %v3617_v56 = vld [vmem:[#allocation2 + $0xf8] sm:$0xff] }
 0xb18   :  { %2501 = vmatpush.bf16.msrb.mxu1 %v3617_v56 }
 0xb1a   :  { %1999 = vmatpush.bf16.msrb.mxu0 %v3209_v13 }
 0xb1b   :  { %2191 = vmatpush.bf16.msrb.mxu2 %v3285_v60  ;;  %v2139_v60 = vperm.slane %v4070_v44, 3 }
 0xb1c   :  { %2502 = vmatpush.bf16.msrb.mxu1 %v3616_v0 }
 0xb1e   :  { %2000 = vmatpush.bf16.msrb.mxu0 %v3205_v17 }
 0xb1f   :  { %2192 = vmatpush.bf16.msrb.mxu2 %v3281_v62  ;;  %v3300_v62 = vld [vmem:[#allocation5 + $0x2a4] sm:$0xf] }
 0xb23   :  { %2193 = vmatpush.bf16.msrb.mxu2 %v3277_v6  ;;  %v3301_v6 = vor.u32 %v3594_v63, %v3300_v62 }
 0xb27   :  { %2194 = vmatpush.bf16.msrb.mxu2 %v3273_v25 }
 0xb2b   :  { %2195 = vmatpush.bf16.msrb.mxu2 %v3269_v5 }
 0xb82   :  { %v1814_v20 = vpop.f32.mrf.mxu3 }
 0xb8a   :  { %v1816_v22 = vpop.f32.mrf.mxu3 }
 0xb8b   :  { %v1819_v23 = vpack.c.bf16 %v1816_v22, %v1814_v20 }
 0xb8d   :  { %2063 = vmatmul.bf16.vlgmr.msra.gmra.mxu1 %v1819_v23 }
 0xb92   :  { %v1923_v24 = vpop.f32.mrf.mxu3 }
 0xb9a   :  { %v1925_v26 = vpop.f32.mrf.mxu3 }
 0xb9b   :  { %v1928_v27 = vpack.c.bf16 %v1925_v26, %v1923_v24 }
 0xb9d   :  { %2001 = vmatmul.bf16.vlgmr.msrb.gmra.mxu0 %v1928_v27 }
 0xc0a   :  { %v2064_v33 = vpop.f32.mrf.mxu1 }
 0xc12   :  { %v2066_v4 = vpop.f32.mrf.mxu1 }
 0xc1a   :  { %v2002_v58 = vpop.f32.mrf.mxu0 }
 0xc1b   :  { %v2065_v34 = vadd.f32 %v2064_v33, %v2002_v58 }
 0xc1d   :  { %v2069_v47 = vadd.f32 %v2065_v34, %v4064_v37  ;;  %v2116_v34 = vperm.slane %v4070_v44, 1 }
 0xc1f   :  { %v2072_v41 = vadd.f32 %v2071_v40, %v2069_v47 }
 0xc21   :  { %2074 = vadd.xlane.f32.xlu2 %v2072_v41 }
 0xc22   :  { %v2004_v42 = vpop.f32.mrf.mxu0 }
 0xc23   :  { %v2067_v52 = vadd.f32 %v2066_v4, %v2004_v42  ;;  %v2119_v42 = vperm.slane %v4070_v44, 2 }
 0xc25   :  { %v2070_v32 = vadd.f32 %v2067_v52, %v4066_v38 }
 0xc27   :  { %v2073_v61 = vadd.f32 %v2071_v40, %v2070_v32 }
 0xc29   :  { %2076 = vadd.xlane.f32.xlu0 %v2073_v61 }
 0xc94   :  { %v2075_v19 = vpop.xlane.xlu2 %2074 }
 0xc95   :  { %v2078_v45 = vmul.f32 0.03125, %v2075_v19 }
 0xc97   :  { %v2080_v46 = vsub.f32 %v2072_v41, %v2078_v45  ;;  %v3328_v45 = vld [vmem:[#allocation5 + $0x4d4] sm:$0xf] }
 0xc99   :  { %v4120_v35 = vmul.f32 %v3893_v3, %v2080_v46  ;;  %v3601_v46 = vld [vmem:[#allocation5 + $0x4f8] sm:$0xf0] }
 0xc9b   :  { %v2084_v48 = vmul.f32 %v4120_v35, %v4120_v35 }
 0xc9c   :  { %v2077_v49 = vpop.xlane.xlu0 %2076 }
 0xc9d   :  { %v2079_v37 = vmul.f32 0.03125, %v2077_v49  ;;  %2086 = vadd.xlane.f32.xlu1 %v2084_v48  ;;  %v3324_v48 = vld [vmem:[#allocation5 + $0x484] sm:$0xf]  ;;  %v3600_v49 = vld [vmem:[#allocation5 + $0x4a8] sm:$0xf0] }
 0xc9f   :  { %v2081_v50 = vsub.f32 %v2073_v61, %v2079_v37  ;;  %v3325_v37 = vor.u32 %v3600_v49, %v3324_v48 }
 0xca1   :  { %v4125_v51 = vmul.f32 %v3893_v3, %v2081_v50  ;;  %v3320_v50 = vld [vmem:[#allocation5 + $0x434] sm:$0xf] }
 0xca3   :  { %v2085_v38 = vmul.f32 %v4125_v51, %v4125_v51 }
 0xca5   :  { %2088 = vadd.xlane.f32.xlu2 %v2085_v38 }
 0xd10   :  { %v2087_v18 = vpop.xlane.xlu1 %2086 }
 0xd11   :  { %v2090_v31 = vmul.f32 0.03125, %v2087_v18 }
 0xd13   :  { %v2092_v8 = vadd.f32 1e-12, %v2090_v31 }
 0xd15   :  { %3689 = vrsqrt.f32 %v2092_v8  ;;  %vm2100_vm11 = vweird.f32 %v2092_v8 }
 0xd18   :  { %v2089_v9 = vpop.xlane.xlu2 %2088 }
 0xd19   :  { %v2091_v11 = vmul.f32 0.03125, %v2089_v9 }
 0xd1b   :  { %v3690_v12 = vpop.eup %3689  ;;  %v2093_v10 = vadd.f32 1e-12, %v2091_v11 }
 0xd1c   :  { %v2095_v13 = vmul.f32 %v3690_v12, %v2092_v8  ;;  %vm2101_vm9 = vweird.f32 %v3690_v12 }
 0xd1d   :  { %3691 = vrsqrt.f32 %v2093_v10  ;;  %vm2102_vm12 = vmor %vm2100_vm11, %vm2101_vm9  ;;  %vm2110_vm14 = vweird.f32 %v2093_v10 }
 0xd1e   :  { %v2096_v15 = vmul.f32 %v3690_v12, %v2095_v13 }
 0xd20   :  { %v2097_v16 = vmul.f32 0.5, %v2096_v15 }
 0xd22   :  { %v2098_v17 = vsub.f32 1.5, %v2097_v16 }
 0xd23   :  { %v3692_v20 = vpop.eup %3691 }
 0xd24   :  { %v2099_v22 = vmul.f32 %v3690_v12, %v2098_v17  ;;  %v2105_v23 = vmul.f32 %v3692_v20, %v2093_v10  ;;  %vm2111_vm13 = vweird.f32 %v3692_v20 }
 0xd25   :  { %vm2112_vm15 = vmor %vm2110_vm14, %vm2111_vm13 }
 0xd26   :  { %v2106_v24 = vmul.f32 %v3692_v20, %v2105_v23  ;;  %v2103_v26 = vsel %vm2102_vm12, %v3690_v12, %v2099_v22 }
 0xd27   :  { %v2114_v58 = vmul.f32 %v2103_v26, %v4120_v35  ;;  %v3329_v35 = vor.u32 %v3601_v46, %v3328_v45  ;;  %v2237_v26 = vperm.slane %v4070_v44, 4 }
 0xd28   :  { %v2107_v27 = vmul.f32 0.5, %v2106_v24 }
 0xd29   :  { %v2117_v4 = vmul.f32 %v2116_v34, %v2114_v58  ;;  %2286 = vmatpush.bf16.msra.mxu3 %v3329_v35 }
 0xd2a   :  { %v2108_v33 = vsub.f32 1.5, %v2107_v27 }
 0xd2b   :  { %v4133_v32 = vadd.f32 %v2119_v42, %v2117_v4 }
 0xd2c   :  { %v2109_v40 = vmul.f32 %v3692_v20, %v2108_v33 }
 0xd2d   :  { %2287 = vmatpush.bf16.msra.mxu3 %v3325_v37  ;;  %v3608_v37 = vld [vmem:[#allocation2 + $0xb0] sm:$0xff] }
 0xd2e   :  { %v2113_v47 = vsel %vm2112_vm15, %v3692_v20, %v2109_v40 }
 0xd2f   :  { %v2115_v41 = vmul.f32 %v2113_v47, %v4125_v51  ;;  %v3599_v51 = vld [vmem:[#allocation5 + $0x458] sm:$0xf0] }
 0xd30   :  { %v3321_v38 = vor.u32 %v3599_v51, %v3320_v50  ;;  %v3606_v50 = vld [vmem:[#allocation2 + $0xa0] sm:$0xff]  ;;  %v3605_v51 = vld [vmem:[#allocation2 + $0x98] sm:$0xff] }
 0xd31   :  { %v2118_v52 = vmul.f32 %v2116_v34, %v2115_v41 }
 0xd32   :  { %2288 = vmatpush.bf16.msra.mxu3 %v3321_v38  ;;  %v3604_v38 = vld [vmem:[#allocation2 + $0x90] sm:$0xff] }
 0xd33   :  { %v4135_v61 = vadd.f32 %v2119_v42, %v2118_v52 }
 0xd35   :  { %v2122_v19 = vpack.c.bf16 %v4135_v61, %v4133_v32 }
 0xd36   :  { %2289 = vmatpush.bf16.msra.mxu3 %v3317_v43  ;;  %v3603_v43 = vld [vmem:[#allocation2 + $0x88] sm:$0xff] }
 0xd37   :  { %2196 = vmatmul.bf16.vlgmr.msrb.gmra.mxu2 %v2122_v19 }
 0xd3a   :  { %2290 = vmatpush.bf16.msra.mxu3 %v3313_v55 }
 0xd3e   :  { %2291 = vmatpush.bf16.msra.mxu3 %v3309_v39 }
 0xd42   :  { %2292 = vmatpush.bf16.msra.mxu3 %v3305_v28 }
 0xd46   :  { %2293 = vmatpush.bf16.msra.mxu3 %v3301_v6  ;;  %v3614_v6 = vld [vmem:[#allocation2 + $0xe0] sm:$0xff] }
 0xdba   :  { %v2197_v30 = vpop.f32.mrf.mxu2 }
 0xdbb   :  { %v2198_v1 = vadd.f32 %v2197_v30, %v2139_v60  ;;  %v3615_v30 = vld [vmem:[#allocation2 + $0xe8] sm:$0xff] }
 0xdbc   :  { %2503 = vmatpush.bf16.msrb.mxu1 %v3615_v30 }
 0xdbd   :  { %v2202_v36 = vmul.f32 %v2198_v1, %v2198_v1 }
 0xdbf   :  { %v2204_v2 = vmul.f32 %v2202_v36, %v2198_v1 }
 0xdc0   :  { %2504 = vmatpush.bf16.msrb.mxu1 %v3614_v6 }
 0xdc1   :  { %v2206_v7 = vmul.f32 0.044715, %v2204_v2 }
 0xdc2   :  { %v2199_v18 = vpop.f32.mrf.mxu2 }
 0xdc3   :  { %v2208_v25 = vadd.f32 %v2206_v7, %v2198_v1  ;;  %v2200_v29 = vadd.f32 %v2199_v18, %v2139_v60  ;;  %v3613_v18 = vld [vmem:[#allocation2 + $0xd8] sm:$0xff] }
 0xdc4   :  { %2505 = vmatpush.bf16.msrb.mxu1 %v3613_v18 }
 0xdc5   :  { %v2210_v31 = vmul.f32 0.7978846, %v2208_v25  ;;  %v2203_v5 = vmul.f32 %v2200_v29, %v2200_v29 }
 0xdc7   :  { %v2205_v8 = vmul.f32 %v2203_v5, %v2200_v29  ;;  %3693 = vtanh.f32 %v2210_v31  ;;  %v2344_v5 = vperm.slane %v4070_v44, 5 }
 0xdc9   :  { %v2207_v9 = vmul.f32 0.044715, %v2205_v8 }
 0xdcb   :  { %v2209_v11 = vadd.f32 %v2207_v9, %v2200_v29 }
 0xdcd   :  { %v2211_v12 = vmul.f32 0.7978846, %v2209_v11  ;;  %v3694_v10 = vpop.eup %3693 }
 0xdce   :  { %v2214_v13 = vadd.f32 1.0, %v3694_v10 }
 0xdcf   :  { %3695 = vtanh.f32 %v2211_v12 }
 0xdd0   :  { %v2216_v16 = vmul.f32 0.5, %v2214_v13  ;;  %v2347_v13 = vperm.slane %v4070_v44, 6  ;;  %v3622_v44 = vld [vmem:[#allocation2 + $0x120] sm:$0xff] }
 0xdd2   :  { %v2218_v22 = vmul.f32 %v2216_v16, %v2198_v1 }
 0xdd5   :  { %v3696_v15 = vpop.eup %3695 }
 0xdd6   :  { %v2215_v17 = vadd.f32 1.0, %v3696_v15 }
 0xdd8   :  { %v2217_v20 = vmul.f32 0.5, %v2215_v17 }
 0xdda   :  { %v2219_v23 = vmul.f32 %v2217_v20, %v2200_v29 }
 0xddc   :  { %v2220_v24 = vpack.c.bf16 %v2219_v23, %v2218_v22  ;;  %v3612_v23 = vld [vmem:[#allocation2 + $0xd0] sm:$0xff] }
 0xddd   :  { %2506 = vmatpush.bf16.msrb.mxu1 %v3612_v23 }
 0xdde   :  { %2294 = vmatmul.bf16.vlgmr.msra.gmra.mxu3 %v2220_v24  ;;  %v3611_v24 = vld [vmem:[#allocation2 + $0xc8] sm:$0xff] }
 0xde1   :  { %2507 = vmatpush.bf16.msrb.mxu1 %v3611_v24 }
 0xe61   :  { %v2295_v27 = vpop.f32.mrf.mxu3 }
 0xe62   :  { %v2296_v33 = vadd.f32 %v2295_v27, %v2237_v26  ;;  %v3625_v27 = vld [vmem:[#allocation2 + $0x138] sm:$0xff] }
 0xe63   :  { %2581 = vmatpush.bf16.msra.mxu2 %v3625_v27 }
 0xe64   :  { %v2300_v58 = vadd.f32 %v2296_v33, %v4133_v32  ;;  %v3609_v32 = vld [vmem:[#allocation2 + $0xb8] sm:$0xff]  ;;  %v3624_v33 = vld [vmem:[#allocation2 + $0x130] sm:$0xff] }
 0xe65   :  { %2421 = vmatpush.bf16.msra.mxu0 %v3609_v32 }
 0xe66   :  { %2302 = vadd.xlane.f32.xlu1 %v2300_v58 }
 0xe67   :  { %2582 = vmatpush.bf16.msra.mxu2 %v3624_v33 }
 0xe69   :  { %v2297_v34 = vpop.f32.mrf.mxu3  ;;  %2422 = vmatpush.bf16.msra.mxu0 %v3608_v37 }
 0xe6a   :  { %v2298_v40 = vadd.f32 %v2297_v34, %v2237_v26  ;;  %v3610_v26 = vld [vmem:[#allocation2 + $0xc0] sm:$0xff]  ;;  %v3621_v34 = vld [vmem:[#allocation2 + $0x118] sm:$0xff] }
 0xe6b   :  { %2508 = vmatpush.bf16.msrb.mxu1 %v3610_v26 }
 0xe6c   :  { %v2301_v47 = vadd.f32 %v2298_v40, %v4135_v61  ;;  %v3607_v61 = vld [vmem:[#allocation2 + $0xa8] sm:$0xff]  ;;  %v3704_v40 = vld [vmem:[%s4160_s4] sm:$0xff] }
 0xe6d   :  { %2423 = vmatpush.bf16.msra.mxu0 %v3607_v61 }
 0xe6e   :  { %2304 = vadd.xlane.f32.xlu0 %v2301_v47 }
 0xe71   :  { %2424 = vmatpush.bf16.msra.mxu0 %v3606_v50 }
 0xe75   :  { %2425 = vmatpush.bf16.msra.mxu0 %v3605_v51  ;;  %v2532_v51 = vperm.slane %v3704_v40, 4 }
 0xe79   :  { %2426 = vmatpush.bf16.msra.mxu0 %v3604_v38  ;;  %v2594_v38 = vld [vmem:[%s4158_s2] sm:$0x3] }
 0xe7a   :  { %vm2595_vm7 = vcmp.eq.s32.totalorder %v2594_v38, 0 }
 0xe7d   :  { %2427 = vmatpush.bf16.msra.mxu0 %v3603_v43 }
 0xed9   :  { %v2303_v41 = vpop.xlane.xlu1 %2302 }
 0xeda   :  { %v2306_v4 = vmul.f32 0.03125, %v2303_v41  ;;  %v3620_v41 = vld [vmem:[#allocation2 + $0x110] sm:$0xff] }
 0xedc   :  { %v2308_v42 = vsub.f32 %v2300_v58, %v2306_v4  ;;  %v3623_v58 = vld [vmem:[#allocation2 + $0x128] sm:$0xff] }
 0xedd   :  { %2583 = vmatpush.bf16.msra.mxu2 %v3623_v58 }
 0xede   :  { %v2310_v52 = vmul.f32 %v3893_v3, %v2308_v42 }
 0xee0   :  { %v2312_v19 = vmul.f32 %v2310_v52, %v2310_v52 }
 0xee1   :  { %v2305_v45 = vpop.xlane.xlu0 %2304  ;;  %2584 = vmatpush.bf16.msra.mxu2 %v3622_v44 }
 0xee2   :  { %v2307_v46 = vmul.f32 0.03125, %v2305_v45  ;;  %2314 = vadd.xlane.f32.xlu0 %v2312_v19 }
 0xee4   :  { %v2309_v35 = vsub.f32 %v2301_v47, %v2307_v46  ;;  %v2372_v47 = vperm.slane %v3704_v40, 2  ;;  %v3619_v46 = vld [vmem:[#allocation2 + $0x108] sm:$0xff] }
 0xee5   :  { %2585 = vmatpush.bf16.msra.mxu2 %v3621_v34 }
 0xee6   :  { %v2311_v48 = vmul.f32 %v3893_v3, %v2309_v35  ;;  %v3602_v3 = vld [vmem:[#allocation2 + $0x80] sm:$0xff] }
 0xee7   :  { %2428 = vmatpush.bf16.msra.mxu0 %v3602_v3  ;;  %v3618_v35 = vld [vmem:[#allocation2 + $0x100] sm:$0xff] }
 0xee8   :  { %v2313_v49 = vmul.f32 %v2311_v48, %v2311_v48 }
 0xee9   :  { %2586 = vmatpush.bf16.msra.mxu2 %v3620_v41 }
 0xeea   :  { %2316 = vadd.xlane.f32.xlu2 %v2313_v49 }
 0xeed   :  { %2587 = vmatpush.bf16.msra.mxu2 %v3619_v46 }
 0xef1   :  { %2588 = vmatpush.bf16.msra.mxu2 %v3618_v35 }
 0xf55   :  { %v2315_v14 = vpop.xlane.xlu0 %2314 }
 0xf56   :  { %v2318_v21 = vmul.f32 0.03125, %v2315_v14 }
 0xf58   :  { %v2320_v53 = vadd.f32 1e-12, %v2318_v21 }
 0xf5a   :  { %3697 = vrsqrt.f32 %v2320_v53  ;;  %vm2328_vm1 = vweird.f32 %v2320_v53 }
 0xf5d   :  { %v2317_v54 = vpop.xlane.xlu2 %2316 }
 0xf5e   :  { %v2319_v55 = vmul.f32 0.03125, %v2317_v54 }
 0xf60   :  { %v3698_v57 = vpop.eup %3697  ;;  %v2321_v39 = vadd.f32 1e-12, %v2319_v55 }
 0xf61   :  { %v2323_v59 = vmul.f32 %v3698_v57, %v2320_v53  ;;  %vm2329_vm0 = vweird.f32 %v3698_v57 }
 0xf62   :  { %3699 = vrsqrt.f32 %v2321_v39  ;;  %vm2330_vm2 = vmor %vm2328_vm1, %vm2329_vm0  ;;  %vm2338_vm4 = vweird.f32 %v2321_v39 }
 0xf63   :  { %v2324_v60 = vmul.f32 %v3698_v57, %v2323_v59 }
 0xf65   :  { %v2325_v28 = vmul.f32 0.5, %v2324_v60 }
 0xf67   :  { %v2326_v62 = vsub.f32 1.5, %v2325_v28 }
 0xf68   :  { %v3700_v63 = vpop.eup %3699 }
 0xf69   :  { %v2333_v1 = vmul.f32 %v3700_v63, %v2321_v39  ;;  %v2327_v36 = vmul.f32 %v3698_v57, %v2326_v62  ;;  %vm2339_vm3 = vweird.f32 %v3700_v63 }
 0xf6a   :  { %vm2340_vm5 = vmor %vm2338_vm4, %vm2339_vm3 }
 0xf6b   :  { %v2334_v2 = vmul.f32 %v3700_v63, %v2333_v1  ;;  %v2331_v25 = vsel %vm2330_vm2, %v3698_v57, %v2327_v36 }
 0xf6c   :  { %v2342_v8 = vmul.f32 %v2331_v25, %v2310_v52 }
 0xf6d   :  { %v2335_v7 = vmul.f32 0.5, %v2334_v2 }
 0xf6e   :  { %v2345_v12 = vmul.f32 %v2344_v5, %v2342_v8 }
 0xf6f   :  { %v2336_v29 = vsub.f32 1.5, %v2335_v7 }
 0xf70   :  { %v2348_v16 = vadd.f32 %v2347_v13, %v2345_v12 }
 0xf71   :  { %v2337_v31 = vmul.f32 %v3700_v63, %v2336_v29 }
 0xf73   :  { %v2341_v9 = vsel %vm2340_vm5, %v3700_v63, %v2337_v31 }
 0xf74   :  { %v2343_v11 = vmul.f32 %v2341_v9, %v2311_v48  ;;  %v2452_v48 = vperm.slane %v3704_v40, 3 }
 0xf76   :  { %v2346_v10 = vmul.f32 %v2344_v5, %v2343_v11 }
 0xf78   :  { %v2349_v15 = vadd.f32 %v2347_v13, %v2346_v10 }
 0xf7a   :  { %v2351_v17 = vrot.slane %v2349_v15, 7 }
 0xf7c   :  { %v2354_v20 = vsel %vm2353_vm6, %v2348_v16, %v2351_v17 }
 0xf7d   :  { %v2355_v22 = vpack.c.bf16 %v2354_v20, %v2354_v20 }
 0xf7f   :  { %2429 = vmatmul.bf16.vlgmr.msra.gmra.mxu0 %v2355_v22 }
 0xffc   :  { %v2430_v4 = vpop.f32.mrf.mxu0 }
 0xffd   :  { %v2431_v42 = vadd.f32 %v2430_v4, %v2372_v47 }
 0xfff   :  { %3701 = vtanh.f32 %v2431_v42 }
0x1004   :  { %v2432_v52 = vpop.f32.mrf.mxu0 }
0x1005   :  { %v3702_v19 = vpop.eup %3701 }
0x1006   :  { %v2435_v45 = vpack.c.bf16 %v3702_v19, %v3702_v19 }
0x1008   :  { %2509 = vmatmul.bf16.vlgmr.msrb.gmra.mxu1 %v2435_v45 }
0x1085   :  { %v2510_v49 = vpop.f32.mrf.mxu1 }
0x1086   :  { %v2511_v32 = vadd.f32 %v2510_v49, %v2452_v48 }
0x1088   :  { %v2514_v37 = vmax.f32 %v2511_v32, 0.0 }
0x108a   :  { %v2515_v61 = vpack.c.bf16 %v2514_v37, %v2514_v37 }
0x108c   :  { %2589 = vmatmul.bf16.vlgmr.msra.gmra.mxu2 %v2515_v61 }
0x108d   :  { %v2512_v50 = vpop.f32.mrf.mxu1 }
0x110f   :  { %v2590_v14 = vpop.f32.mrf.mxu2 }
0x1110   :  { %v2591_v21 = vadd.f32 %v2590_v14, %v2532_v51 }
0x1112   :  { %v2596_v43 = vsel %vm2595_vm7, -1e+09, %v2591_v21 }
0x1113   :  { %2598 = vst.msk [vmem:[#allocation8] sm:$0x3] %vm2597_vm8, %v2596_v43 }
0x1114   :  { %2609 = dma.vmem_to_hbm [thread:$0]  %s2605_s29, 32, %s2607_s9, [#allocation4]  }
0x1117   :  { %v2592_v53 = vpop.f32.mrf.mxu2 }
0x1118   :  { %3805 = dma.done.wait [#allocation4], 32  }
0x1119   :  { %3806 = vsyncadd [#allocation4], 4294967264 }
0x111a   :  { %2614 = vsyncpa [#allocation3], 1 }
0x111b   :  { %2615 = vsyncpa [#allocation6], 1 }
0x111c   :  { %2616 = vsyncpa [#allocation4], 1 }

</bundles_post_ra>
